<compile_context>
chip_gen: v5e
topology: v5e:2x2
jax: 0.10.0
libtpu: 0.0.40
codegen_flags: <defaults>
</compile_context>

<pallas_src>
import functools

import jax
import jax.numpy as jnp
from jax.experimental import pallas as pl
from jax.experimental.pallas import tpu as pltpu


# ----------------------------------------------------------------------------
# Fused CIC forward kernel (one batch element per grid step).
# ----------------------------------------------------------------------------
def _cic_fused_kernel(xyz_ref, x_ref,
                      w1_ref, b1_ref,
                      wc_ref, wn_ref, bx_ref,
                      wm1_ref, bm1_ref, wm2_ref, bm2_ref,
                      w2_ref, b2_ref, wsc_ref, bsc_ref,
                      o_ref, *, k):
    n = xyz_ref.shape[1]

    def leaky(t):
        return jnp.where(t >= 0.0, t, 0.2 * t)

    xyz = xyz_ref[0]                                   # (N, 3)
    x_in = x_ref[0]                                    # (N, Cin)

    # ---- conv1: 1x1 Conv1d + folded BN + LeakyReLU(0.2) ---------------------
    x1 = leaky(jnp.dot(x_in, w1_ref[...],
                       preferred_element_type=jnp.float32) + b1_ref[...])  # (N, P)

    # ---- knn (k nearest incl. self): negdist + iterative argmax -> one-hot --
    inner = jax.lax.dot_general(xyz, xyz, (((1,), (1,)), ((), ())),
                                preferred_element_type=jnp.float32)        # (N, N)
    sq = jnp.sum(xyz * xyz, axis=-1, keepdims=True)                        # (N, 1)
    negdist = 2.0 * inner - sq - jnp.transpose(sq)                         # (N, N)

    colf = jax.lax.broadcasted_iota(jnp.int32, (n, n), 1).astype(jnp.float32)
    masked = negdist
    onehots = []
    for _ in range(k):
        m = jnp.max(masked, axis=-1, keepdims=True)
        # tie-break: smallest column index among the maxima (matches top_k)
        cand = jnp.where(masked == m, colf, float(n))
        sel = jnp.min(cand, axis=-1, keepdims=True)
        hit = colf == sel
        onehots.append(hit.astype(jnp.float32))
        masked = jnp.where(hit, -jnp.inf, masked)
    onehot = jnp.concatenate(onehots, axis=0)          # (k*N, N), slot-major rows

    # ---- LPFA: gather + xyz2feature + feature diff fused into one matmul ----
    # xyz2feature(pf9) with pf9 = [center, nbr, nbr-center] splits exactly as
    #   nbr @ (Wx[3:6]+Wx[6:9]) + center @ (Wx[0:3]-Wx[6:9]) + bias
    # and fdiff = nbr_x - center_x, so with
    #   u = x1 + xyz @ wn   and   v = x1 - xyz @ wc
    # the pre-activation for slot j of point i is (onehot @ u) - v_i + bias.
    u = x1 + jnp.dot(xyz, wn_ref[...], preferred_element_type=jnp.float32)  # (N, P)
    v = x1 - jnp.dot(xyz, wc_ref[...], preferred_element_type=jnp.float32)  # (N, P)

    h = jnp.dot(onehot, u, preferred_element_type=jnp.float32)              # (k*N, P)
    h = leaky(h - jnp.concatenate([v] * k, axis=0) + bx_ref[...])
    h = leaky(jnp.dot(h, wm1_ref[...],
                      preferred_element_type=jnp.float32) + bm1_ref[...])
    h = leaky(jnp.dot(h, wm2_ref[...],
                      preferred_element_type=jnp.float32) + bm2_ref[...])   # (k*N, P)

    # mean over the k neighbour slots (slot-major: rows j*N .. j*N+N-1)
    acc = h[0:n, :]
    for j in range(1, k):
        acc = acc + h[j * n:(j + 1) * n, :]
    x2 = acc * (1.0 / float(k))                                             # (N, P)

    # ---- conv2+BN, shortcut conv+BN, residual add, LeakyReLU(0.2) -----------
    y = jnp.dot(x2, w2_ref[...], preferred_element_type=jnp.float32) + b2_ref[...]
    s = jnp.dot(x_in, wsc_ref[...], preferred_element_type=jnp.float32) + bsc_ref[...]
    o_ref[0] = leaky(y + s)


# ----------------------------------------------------------------------------
# Wrapper: layout conversion + one pallas_call with a parallel batch grid.
# ----------------------------------------------------------------------------
def cic_forward(params, xyz_bcn, x_bcn, *, k):
    B, _, N = xyz_bcn.shape
    Cin = x_bcn.shape[1]
    P = params["w1"].shape[1]
    Cout = params["w2"].shape[1]

    xyz = jnp.transpose(xyz_bcn, (0, 2, 1)).astype(jnp.float32)   # [B, N, 3]
    x_in = jnp.transpose(x_bcn, (0, 2, 1)).astype(jnp.float32)    # [B, N, Cin]

    # Split the 9-channel xyz2feature conv over the [center, nbr, nbr-center]
    # concat (exact linear-algebra identity; done once, outside the kernel).
    wx = params["wxyz"]
    wxyz_c = wx[0:3] - wx[6:9]   # multiplies the centre coordinates
    wxyz_n = wx[3:6] + wx[6:9]   # multiplies the neighbour coordinates

    def wspec(r, c):
        return pl.BlockSpec((r, c), lambda b: (0, 0))

    out = pl.pallas_call(
        functools.partial(_cic_fused_kernel, k=k),
        out_shape=jax.ShapeDtypeStruct((B, N, Cout), jnp.float32),
        grid=(B,),
        in_specs=[
            pl.BlockSpec((1, N, 3), lambda b: (b, 0, 0)),
            pl.BlockSpec((1, N, Cin), lambda b: (b, 0, 0)),
            wspec(Cin, P), wspec(1, P),
            wspec(3, P), wspec(3, P), wspec(1, P),
            wspec(P, P), wspec(1, P),
            wspec(P, P), wspec(1, P),
            wspec(P, Cout), wspec(1, Cout),
            wspec(Cin, Cout), wspec(1, Cout),
        ],
        out_specs=pl.BlockSpec((1, N, Cout), lambda b: (b, 0, 0)),
        compiler_params=pltpu.CompilerParams(
            dimension_semantics=("parallel",)),
    )(xyz, x_in,
      params["w1"], params["b1"],
      wxyz_c, wxyz_n, params["bxyz"],
      params["wm1"], params["bm1"], params["wm2"], params["bm2"],
      params["w2"], params["b2"], params["wsc"], params["bsc"])

    return xyz_bcn, jnp.transpose(out, (0, 2, 1))     # xyz:[B,3,N], x:[B,Cout,N]


# ----------------------------------------------------------------------------
# Parameter construction (deterministic, BN folded in eval mode)
# ----------------------------------------------------------------------------
def init_params(key, cin, planes, cout):
    ks = jax.random.split(key, 12)

    def conv_w(kk, a, b):
        return 0.1 * jax.random.normal(kk, (a, b), jnp.float32)

    def bn_params(kk, c):
        k1, k2, k3, k4 = jax.random.split(kk, 4)
        gamma = 1.0 + 0.1 * jax.random.normal(k1, (c,), jnp.float32)
        beta = 0.1 * jax.random.normal(k2, (c,), jnp.float32)
        mean = 0.05 * jax.random.normal(k3, (c,), jnp.float32)
        var = 1.0 + 0.1 * jnp.abs(jax.random.normal(k4, (c,), jnp.float32))
        return gamma, beta, mean, var

    def fold(w, bnp, eps=1e-5):
        gamma, beta, mean, var = bnp
        scale = gamma * jax.lax.rsqrt(var + eps)
        return w * scale[None, :], (beta - mean * scale)[None, :]

    p = {}
    p["w1"], p["b1"] = fold(conv_w(ks[0], cin, planes), bn_params(ks[1], planes))
    p["wxyz"], p["bxyz"] = fold(conv_w(ks[2], 9, planes), bn_params(ks[3], planes))
    p["wm1"], p["bm1"] = fold(conv_w(ks[4], planes, planes), bn_params(ks[5], planes))
    p["wm2"], p["bm2"] = fold(conv_w(ks[6], planes, planes), bn_params(ks[7], planes))
    p["w2"], p["b2"] = fold(conv_w(ks[8], planes, cout), bn_params(ks[9], cout))
    p["wsc"], p["bsc"] = fold(conv_w(ks[10], cin, cout), bn_params(ks[11], cout))
    return p


if __name__ == "__main__":
    B, N = 2, 64
    in_channels, output_channels = 32, 64
    bottleneck_ratio = 2
    planes = in_channels // bottleneck_ratio        # 16
    k = 8
    npoint = N                                      # ensures maxpool branch is skipped

    key = jax.random.PRNGKey(0)
    k_xyz, k_x, k_par = jax.random.split(key, 3)
    xyz = jax.random.normal(k_xyz, (B, 3, N), jnp.float32)          # [B, 3, N]
    x = jax.random.normal(k_x, (B, in_channels, N), jnp.float32)    # [B, Cin, N]

    params = init_params(k_par, in_channels, planes, output_channels)

    fwd = jax.jit(functools.partial(cic_forward, k=k))
    xyz_out, x_out = fwd(params, xyz, x)
    jax.block_until_ready((xyz_out, x_out))

    assert xyz_out.shape == (B, 3, N)
    assert x_out.shape == (B, output_channels, N)
    assert bool(jnp.all(jnp.isfinite(x_out)))
    print("KERNEL_OK")
</pallas_src>

<mosaic_0001>
module attributes {stable_mosaic.version = 11 : i64} {
  func.func @_cic_fused_kernel(%arg0: i32, %arg1: memref<1x64x3xf32, #tpu.memory_space<vmem>>, %arg2: memref<1x64x32xf32, #tpu.memory_space<vmem>>, %arg3: memref<32x16xf32, #tpu.memory_space<vmem>>, %arg4: memref<1x16xf32, #tpu.memory_space<vmem>>, %arg5: memref<3x16xf32, #tpu.memory_space<vmem>>, %arg6: memref<3x16xf32, #tpu.memory_space<vmem>>, %arg7: memref<1x16xf32, #tpu.memory_space<vmem>>, %arg8: memref<16x16xf32, #tpu.memory_space<vmem>>, %arg9: memref<1x16xf32, #tpu.memory_space<vmem>>, %arg10: memref<16x16xf32, #tpu.memory_space<vmem>>, %arg11: memref<1x16xf32, #tpu.memory_space<vmem>>, %arg12: memref<16x64xf32, #tpu.memory_space<vmem>>, %arg13: memref<1x64xf32, #tpu.memory_space<vmem>>, %arg14: memref<32x64xf32, #tpu.memory_space<vmem>>, %arg15: memref<1x64xf32, #tpu.memory_space<vmem>>, %arg16: memref<1x64x64xf32, #tpu.memory_space<vmem>>) attributes {dimension_semantics = [#tpu.dimension_semantics<parallel>], iteration_bounds = array<i64: 2>, scalar_prefetch = 0 : i64, scratch_operands = 0 : i64, tpu.core_type = #tpu.core_type<tc>, window_params = [{transform_indices = @transform_0, window_bounds = array<i64: 1, 64, 3>}, {transform_indices = @transform_1, window_bounds = array<i64: 1, 64, 32>}, {pipeline_mode = #tpu.pipeline_mode<synchronous>, transform_indices = @transform_2, window_bounds = array<i64: 32, 16>}, {pipeline_mode = #tpu.pipeline_mode<synchronous>, transform_indices = @transform_3, window_bounds = array<i64: 1, 16>}, {pipeline_mode = #tpu.pipeline_mode<synchronous>, transform_indices = @transform_4, window_bounds = array<i64: 3, 16>}, {pipeline_mode = #tpu.pipeline_mode<synchronous>, transform_indices = @transform_5, window_bounds = array<i64: 3, 16>}, {pipeline_mode = #tpu.pipeline_mode<synchronous>, transform_indices = @transform_6, window_bounds = array<i64: 1, 16>}, {pipeline_mode = #tpu.pipeline_mode<synchronous>, transform_indices = @transform_7, window_bounds = array<i64: 16, 16>}, {pipeline_mode = #tpu.pipeline_mode<synchronous>, transform_indices = @transform_8, window_bounds = array<i64: 1, 16>}, {pipeline_mode = #tpu.pipeline_mode<synchronous>, transform_indices = @transform_9, window_bounds = array<i64: 16, 16>}, {pipeline_mode = #tpu.pipeline_mode<synchronous>, transform_indices = @transform_10, window_bounds = array<i64: 1, 16>}, {pipeline_mode = #tpu.pipeline_mode<synchronous>, transform_indices = @transform_11, window_bounds = array<i64: 16, 64>}, {pipeline_mode = #tpu.pipeline_mode<synchronous>, transform_indices = @transform_12, window_bounds = array<i64: 1, 64>}, {pipeline_mode = #tpu.pipeline_mode<synchronous>, transform_indices = @transform_13, window_bounds = array<i64: 32, 64>}, {pipeline_mode = #tpu.pipeline_mode<synchronous>, transform_indices = @transform_14, window_bounds = array<i64: 1, 64>}, {transform_indices = @transform_15, window_bounds = array<i64: 1, 64, 64>}]} {
    %c0 = arith.constant 0 : index
    %c0_0 = arith.constant 0 : index
    %c0_1 = arith.constant 0 : index
    %0 = vector.load %arg1[%c0, %c0_0, %c0_1] : memref<1x64x3xf32, #tpu.memory_space<vmem>>, vector<1x64x3xf32>
    %1 = vector.shape_cast %0 : vector<1x64x3xf32> to vector<64x3xf32>
    %c0_2 = arith.constant 0 : index
    %c0_3 = arith.constant 0 : index
    %c0_4 = arith.constant 0 : index
    %2 = vector.load %arg2[%c0_2, %c0_3, %c0_4] : memref<1x64x32xf32, #tpu.memory_space<vmem>>, vector<1x64x32xf32>
    %3 = vector.shape_cast %2 : vector<1x64x32xf32> to vector<64x32xf32>
    %c0_5 = arith.constant 0 : index
    %c0_6 = arith.constant 0 : index
    %4 = vector.load %arg3[%c0_5, %c0_6] : memref<32x16xf32, #tpu.memory_space<vmem>>, vector<32x16xf32>
    %cst = arith.constant dense<0.000000e+00> : vector<64x16xf32>
    %5 = tpu.matmul %3, %4, %cst {dimension_numbers = #tpu.dot_dimension_numbers<[1], [0], [0], [1], [0, 0, 1, 1], [], []>} : vector<64x32xf32>, vector<32x16xf32>, vector<64x16xf32> -> vector<64x16xf32>
    %c0_7 = arith.constant 0 : index
    %c0_8 = arith.constant 0 : index
    %6 = vector.load %arg4[%c0_7, %c0_8] : memref<1x16xf32, #tpu.memory_space<vmem>>, vector<1x16xf32>
    %7 = vector.broadcast %6 : vector<1x16xf32> to vector<64x16xf32>
    %8 = arith.addf %5, %7 : vector<64x16xf32>
    %cst_9 = arith.constant 0.000000e+00 : f32
    %9 = vector.broadcast %cst_9 : f32 to vector<64x16xf32>
    %10 = arith.cmpf oge, %8, %9 : vector<64x16xf32>
    %cst_10 = arith.constant 2.000000e-01 : f32
    %11 = vector.broadcast %cst_10 : f32 to vector<64x16xf32>
    %12 = arith.mulf %11, %8 : vector<64x16xf32>
    %13 = arith.select %10, %8, %12 : vector<64x16xi1>, vector<64x16xf32>
    %cst_11 = arith.constant dense<0.000000e+00> : vector<64x64xf32>
    %14 = tpu.matmul %1, %1, %cst_11 {dimension_numbers = #tpu.dot_dimension_numbers<[1], [1], [0], [0], [0, 0, 1, 0], [], []>} : vector<64x3xf32>, vector<64x3xf32>, vector<64x64xf32> -> vector<64x64xf32>
    %15 = arith.mulf %1, %1 : vector<64x3xf32>
    %cst_12 = arith.constant dense<0.000000e+00> : vector<64xf32>
    %16 = vector.multi_reduction <add>, %15, %cst_12 [1] : vector<64x3xf32> to vector<64xf32>
    %17 = vector.shape_cast %16 : vector<64xf32> to vector<64x1xf32>
    %cst_13 = arith.constant 2.000000e+00 : f32
    %18 = vector.broadcast %cst_13 : f32 to vector<64x64xf32>
    %19 = arith.mulf %18, %14 : vector<64x64xf32>
    %20 = vector.broadcast %17 : vector<64x1xf32> to vector<64x64xf32>
    %21 = arith.subf %19, %20 : vector<64x64xf32>
    %22 = tpu.transpose %17, [1, 0] : vector<64x1xf32> -> vector<1x64xf32>
    %23 = vector.broadcast %22 : vector<1x64xf32> to vector<64x64xf32>
    %24 = arith.subf %21, %23 : vector<64x64xf32>
    %25 = tpu.iota {dimensions = array<i32: 1>} : vector<64x64xi32>
    %26 = arith.sitofp %25 : vector<64x64xi32> to vector<64x64xf32>
    %cst_14 = arith.constant dense<0xFF800000> : vector<64xf32>
    %27 = vector.multi_reduction <maximumf>, %24, %cst_14 [1] : vector<64x64xf32> to vector<64xf32>
    %28 = vector.shape_cast %27 : vector<64xf32> to vector<64x1xf32>
    %29 = vector.broadcast %28 : vector<64x1xf32> to vector<64x64xf32>
    %30 = arith.cmpf oeq, %24, %29 : vector<64x64xf32>
    %cst_15 = arith.constant 6.400000e+01 : f32
    %31 = vector.broadcast %cst_15 : f32 to vector<64x64xf32>
    %32 = arith.select %30, %26, %31 : vector<64x64xi1>, vector<64x64xf32>
    %cst_16 = arith.constant dense<0x7F800000> : vector<64xf32>
    %33 = vector.multi_reduction <minimumf>, %32, %cst_16 [1] : vector<64x64xf32> to vector<64xf32>
    %34 = vector.shape_cast %33 : vector<64xf32> to vector<64x1xf32>
    %35 = vector.broadcast %34 : vector<64x1xf32> to vector<64x64xf32>
    %36 = arith.cmpf oeq, %26, %35 : vector<64x64xf32>
    %37 = arith.extui %36 : vector<64x64xi1> to vector<64x64xi32>
    %38 = arith.sitofp %37 : vector<64x64xi32> to vector<64x64xf32>
    %cst_17 = arith.constant 0xFF800000 : f32
    %39 = vector.broadcast %cst_17 : f32 to vector<64x64xf32>
    %40 = arith.select %36, %39, %24 : vector<64x64xi1>, vector<64x64xf32>
    %cst_18 = arith.constant dense<0xFF800000> : vector<64xf32>
    %41 = vector.multi_reduction <maximumf>, %40, %cst_18 [1] : vector<64x64xf32> to vector<64xf32>
    %42 = vector.shape_cast %41 : vector<64xf32> to vector<64x1xf32>
    %43 = vector.broadcast %42 : vector<64x1xf32> to vector<64x64xf32>
    %44 = arith.cmpf oeq, %40, %43 : vector<64x64xf32>
    %cst_19 = arith.constant 6.400000e+01 : f32
    %45 = vector.broadcast %cst_19 : f32 to vector<64x64xf32>
    %46 = arith.select %44, %26, %45 : vector<64x64xi1>, vector<64x64xf32>
    %cst_20 = arith.constant dense<0x7F800000> : vector<64xf32>
    %47 = vector.multi_reduction <minimumf>, %46, %cst_20 [1] : vector<64x64xf32> to vector<64xf32>
    %48 = vector.shape_cast %47 : vector<64xf32> to vector<64x1xf32>
    %49 = vector.broadcast %48 : vector<64x1xf32> to vector<64x64xf32>
    %50 = arith.cmpf oeq, %26, %49 : vector<64x64xf32>
    %51 = arith.extui %50 : vector<64x64xi1> to vector<64x64xi32>
    %52 = arith.sitofp %51 : vector<64x64xi32> to vector<64x64xf32>
    %cst_21 = arith.constant 0xFF800000 : f32
    %53 = vector.broadcast %cst_21 : f32 to vector<64x64xf32>
    %54 = arith.select %50, %53, %40 : vector<64x64xi1>, vector<64x64xf32>
    %cst_22 = arith.constant dense<0xFF800000> : vector<64xf32>
    %55 = vector.multi_reduction <maximumf>, %54, %cst_22 [1] : vector<64x64xf32> to vector<64xf32>
    %56 = vector.shape_cast %55 : vector<64xf32> to vector<64x1xf32>
    %57 = vector.broadcast %56 : vector<64x1xf32> to vector<64x64xf32>
    %58 = arith.cmpf oeq, %54, %57 : vector<64x64xf32>
    %cst_23 = arith.constant 6.400000e+01 : f32
    %59 = vector.broadcast %cst_23 : f32 to vector<64x64xf32>
    %60 = arith.select %58, %26, %59 : vector<64x64xi1>, vector<64x64xf32>
    %cst_24 = arith.constant dense<0x7F800000> : vector<64xf32>
    %61 = vector.multi_reduction <minimumf>, %60, %cst_24 [1] : vector<64x64xf32> to vector<64xf32>
    %62 = vector.shape_cast %61 : vector<64xf32> to vector<64x1xf32>
    %63 = vector.broadcast %62 : vector<64x1xf32> to vector<64x64xf32>
    %64 = arith.cmpf oeq, %26, %63 : vector<64x64xf32>
    %65 = arith.extui %64 : vector<64x64xi1> to vector<64x64xi32>
    %66 = arith.sitofp %65 : vector<64x64xi32> to vector<64x64xf32>
    %cst_25 = arith.constant 0xFF800000 : f32
    %67 = vector.broadcast %cst_25 : f32 to vector<64x64xf32>
    %68 = arith.select %64, %67, %54 : vector<64x64xi1>, vector<64x64xf32>
    %cst_26 = arith.constant dense<0xFF800000> : vector<64xf32>
    %69 = vector.multi_reduction <maximumf>, %68, %cst_26 [1] : vector<64x64xf32> to vector<64xf32>
    %70 = vector.shape_cast %69 : vector<64xf32> to vector<64x1xf32>
    %71 = vector.broadcast %70 : vector<64x1xf32> to vector<64x64xf32>
    %72 = arith.cmpf oeq, %68, %71 : vector<64x64xf32>
    %cst_27 = arith.constant 6.400000e+01 : f32
    %73 = vector.broadcast %cst_27 : f32 to vector<64x64xf32>
    %74 = arith.select %72, %26, %73 : vector<64x64xi1>, vector<64x64xf32>
    %cst_28 = arith.constant dense<0x7F800000> : vector<64xf32>
    %75 = vector.multi_reduction <minimumf>, %74, %cst_28 [1] : vector<64x64xf32> to vector<64xf32>
    %76 = vector.shape_cast %75 : vector<64xf32> to vector<64x1xf32>
    %77 = vector.broadcast %76 : vector<64x1xf32> to vector<64x64xf32>
    %78 = arith.cmpf oeq, %26, %77 : vector<64x64xf32>
    %79 = arith.extui %78 : vector<64x64xi1> to vector<64x64xi32>
    %80 = arith.sitofp %79 : vector<64x64xi32> to vector<64x64xf32>
    %cst_29 = arith.constant 0xFF800000 : f32
    %81 = vector.broadcast %cst_29 : f32 to vector<64x64xf32>
    %82 = arith.select %78, %81, %68 : vector<64x64xi1>, vector<64x64xf32>
    %cst_30 = arith.constant dense<0xFF800000> : vector<64xf32>
    %83 = vector.multi_reduction <maximumf>, %82, %cst_30 [1] : vector<64x64xf32> to vector<64xf32>
    %84 = vector.shape_cast %83 : vector<64xf32> to vector<64x1xf32>
    %85 = vector.broadcast %84 : vector<64x1xf32> to vector<64x64xf32>
    %86 = arith.cmpf oeq, %82, %85 : vector<64x64xf32>
    %cst_31 = arith.constant 6.400000e+01 : f32
    %87 = vector.broadcast %cst_31 : f32 to vector<64x64xf32>
    %88 = arith.select %86, %26, %87 : vector<64x64xi1>, vector<64x64xf32>
    %cst_32 = arith.constant dense<0x7F800000> : vector<64xf32>
    %89 = vector.multi_reduction <minimumf>, %88, %cst_32 [1] : vector<64x64xf32> to vector<64xf32>
    %90 = vector.shape_cast %89 : vector<64xf32> to vector<64x1xf32>
    %91 = vector.broadcast %90 : vector<64x1xf32> to vector<64x64xf32>
    %92 = arith.cmpf oeq, %26, %91 : vector<64x64xf32>
    %93 = arith.extui %92 : vector<64x64xi1> to vector<64x64xi32>
    %94 = arith.sitofp %93 : vector<64x64xi32> to vector<64x64xf32>
    %cst_33 = arith.constant 0xFF800000 : f32
    %95 = vector.broadcast %cst_33 : f32 to vector<64x64xf32>
    %96 = arith.select %92, %95, %82 : vector<64x64xi1>, vector<64x64xf32>
    %cst_34 = arith.constant dense<0xFF800000> : vector<64xf32>
    %97 = vector.multi_reduction <maximumf>, %96, %cst_34 [1] : vector<64x64xf32> to vector<64xf32>
    %98 = vector.shape_cast %97 : vector<64xf32> to vector<64x1xf32>
    %99 = vector.broadcast %98 : vector<64x1xf32> to vector<64x64xf32>
    %100 = arith.cmpf oeq, %96, %99 : vector<64x64xf32>
    %cst_35 = arith.constant 6.400000e+01 : f32
    %101 = vector.broadcast %cst_35 : f32 to vector<64x64xf32>
    %102 = arith.select %100, %26, %101 : vector<64x64xi1>, vector<64x64xf32>
    %cst_36 = arith.constant dense<0x7F800000> : vector<64xf32>
    %103 = vector.multi_reduction <minimumf>, %102, %cst_36 [1] : vector<64x64xf32> to vector<64xf32>
    %104 = vector.shape_cast %103 : vector<64xf32> to vector<64x1xf32>
    %105 = vector.broadcast %104 : vector<64x1xf32> to vector<64x64xf32>
    %106 = arith.cmpf oeq, %26, %105 : vector<64x64xf32>
    %107 = arith.extui %106 : vector<64x64xi1> to vector<64x64xi32>
    %108 = arith.sitofp %107 : vector<64x64xi32> to vector<64x64xf32>
    %cst_37 = arith.constant 0xFF800000 : f32
    %109 = vector.broadcast %cst_37 : f32 to vector<64x64xf32>
    %110 = arith.select %106, %109, %96 : vector<64x64xi1>, vector<64x64xf32>
    %cst_38 = arith.constant dense<0xFF800000> : vector<64xf32>
    %111 = vector.multi_reduction <maximumf>, %110, %cst_38 [1] : vector<64x64xf32> to vector<64xf32>
    %112 = vector.shape_cast %111 : vector<64xf32> to vector<64x1xf32>
    %113 = vector.broadcast %112 : vector<64x1xf32> to vector<64x64xf32>
    %114 = arith.cmpf oeq, %110, %113 : vector<64x64xf32>
    %cst_39 = arith.constant 6.400000e+01 : f32
    %115 = vector.broadcast %cst_39 : f32 to vector<64x64xf32>
    %116 = arith.select %114, %26, %115 : vector<64x64xi1>, vector<64x64xf32>
    %cst_40 = arith.constant dense<0x7F800000> : vector<64xf32>
    %117 = vector.multi_reduction <minimumf>, %116, %cst_40 [1] : vector<64x64xf32> to vector<64xf32>
    %118 = vector.shape_cast %117 : vector<64xf32> to vector<64x1xf32>
    %119 = vector.broadcast %118 : vector<64x1xf32> to vector<64x64xf32>
    %120 = arith.cmpf oeq, %26, %119 : vector<64x64xf32>
    %121 = arith.extui %120 : vector<64x64xi1> to vector<64x64xi32>
    %122 = arith.sitofp %121 : vector<64x64xi32> to vector<64x64xf32>
    %cst_41 = arith.constant 0xFF800000 : f32
    %123 = vector.broadcast %cst_41 : f32 to vector<64x64xf32>
    %124 = arith.select %120, %123, %110 : vector<64x64xi1>, vector<64x64xf32>
    %cst_42 = arith.constant dense<0xFF800000> : vector<64xf32>
    %125 = vector.multi_reduction <maximumf>, %124, %cst_42 [1] : vector<64x64xf32> to vector<64xf32>
    %126 = vector.shape_cast %125 : vector<64xf32> to vector<64x1xf32>
    %127 = vector.broadcast %126 : vector<64x1xf32> to vector<64x64xf32>
    %128 = arith.cmpf oeq, %124, %127 : vector<64x64xf32>
    %cst_43 = arith.constant 6.400000e+01 : f32
    %129 = vector.broadcast %cst_43 : f32 to vector<64x64xf32>
    %130 = arith.select %128, %26, %129 : vector<64x64xi1>, vector<64x64xf32>
    %cst_44 = arith.constant dense<0x7F800000> : vector<64xf32>
    %131 = vector.multi_reduction <minimumf>, %130, %cst_44 [1] : vector<64x64xf32> to vector<64xf32>
    %132 = vector.shape_cast %131 : vector<64xf32> to vector<64x1xf32>
    %133 = vector.broadcast %132 : vector<64x1xf32> to vector<64x64xf32>
    %134 = arith.cmpf oeq, %26, %133 : vector<64x64xf32>
    %135 = arith.extui %134 : vector<64x64xi1> to vector<64x64xi32>
    %136 = arith.sitofp %135 : vector<64x64xi32> to vector<64x64xf32>
    %137 = tpu.concatenate %38, %52, %66, %80, %94, %108, %122, %136 in 0 : vector<64x64xf32>, vector<64x64xf32>, vector<64x64xf32>, vector<64x64xf32>, vector<64x64xf32>, vector<64x64xf32>, vector<64x64xf32>, vector<64x64xf32> -> vector<512x64xf32>
    %c0_45 = arith.constant 0 : index
    %c0_46 = arith.constant 0 : index
    %138 = vector.load %arg6[%c0_45, %c0_46] : memref<3x16xf32, #tpu.memory_space<vmem>>, vector<3x16xf32>
    %cst_47 = arith.constant dense<0.000000e+00> : vector<64x16xf32>
    %139 = tpu.matmul %1, %138, %cst_47 {dimension_numbers = #tpu.dot_dimension_numbers<[1], [0], [0], [1], [0, 0, 1, 1], [], []>} : vector<64x3xf32>, vector<3x16xf32>, vector<64x16xf32> -> vector<64x16xf32>
    %140 = arith.addf %13, %139 : vector<64x16xf32>
    %c0_48 = arith.constant 0 : index
    %c0_49 = arith.constant 0 : index
    %141 = vector.load %arg5[%c0_48, %c0_49] : memref<3x16xf32, #tpu.memory_space<vmem>>, vector<3x16xf32>
    %cst_50 = arith.constant dense<0.000000e+00> : vector<64x16xf32>
    %142 = tpu.matmul %1, %141, %cst_50 {dimension_numbers = #tpu.dot_dimension_numbers<[1], [0], [0], [1], [0, 0, 1, 1], [], []>} : vector<64x3xf32>, vector<3x16xf32>, vector<64x16xf32> -> vector<64x16xf32>
    %143 = arith.subf %13, %142 : vector<64x16xf32>
    %cst_51 = arith.constant dense<0.000000e+00> : vector<512x16xf32>
    %144 = tpu.matmul %137, %140, %cst_51 {dimension_numbers = #tpu.dot_dimension_numbers<[1], [0], [0], [1], [0, 0, 1, 1], [], []>} : vector<512x64xf32>, vector<64x16xf32>, vector<512x16xf32> -> vector<512x16xf32>
    %145 = tpu.concatenate %143, %143, %143, %143, %143, %143, %143, %143 in 0 : vector<64x16xf32>, vector<64x16xf32>, vector<64x16xf32>, vector<64x16xf32>, vector<64x16xf32>, vector<64x16xf32>, vector<64x16xf32>, vector<64x16xf32> -> vector<512x16xf32>
    %146 = arith.subf %144, %145 : vector<512x16xf32>
    %c0_52 = arith.constant 0 : index
    %c0_53 = arith.constant 0 : index
    %147 = vector.load %arg7[%c0_52, %c0_53] : memref<1x16xf32, #tpu.memory_space<vmem>>, vector<1x16xf32>
    %148 = vector.broadcast %147 : vector<1x16xf32> to vector<512x16xf32>
    %149 = arith.addf %146, %148 : vector<512x16xf32>
    %cst_54 = arith.constant 0.000000e+00 : f32
    %150 = vector.broadcast %cst_54 : f32 to vector<512x16xf32>
    %151 = arith.cmpf oge, %149, %150 : vector<512x16xf32>
    %cst_55 = arith.constant 2.000000e-01 : f32
    %152 = vector.broadcast %cst_55 : f32 to vector<512x16xf32>
    %153 = arith.mulf %152, %149 : vector<512x16xf32>
    %154 = arith.select %151, %149, %153 : vector<512x16xi1>, vector<512x16xf32>
    %c0_56 = arith.constant 0 : index
    %c0_57 = arith.constant 0 : index
    %155 = vector.load %arg8[%c0_56, %c0_57] : memref<16x16xf32, #tpu.memory_space<vmem>>, vector<16x16xf32>
    %cst_58 = arith.constant dense<0.000000e+00> : vector<512x16xf32>
    %156 = tpu.matmul %154, %155, %cst_58 {dimension_numbers = #tpu.dot_dimension_numbers<[1], [0], [0], [1], [0, 0, 1, 1], [], []>} : vector<512x16xf32>, vector<16x16xf32>, vector<512x16xf32> -> vector<512x16xf32>
    %c0_59 = arith.constant 0 : index
    %c0_60 = arith.constant 0 : index
    %157 = vector.load %arg9[%c0_59, %c0_60] : memref<1x16xf32, #tpu.memory_space<vmem>>, vector<1x16xf32>
    %158 = vector.broadcast %157 : vector<1x16xf32> to vector<512x16xf32>
    %159 = arith.addf %156, %158 : vector<512x16xf32>
    %cst_61 = arith.constant 0.000000e+00 : f32
    %160 = vector.broadcast %cst_61 : f32 to vector<512x16xf32>
    %161 = arith.cmpf oge, %159, %160 : vector<512x16xf32>
    %cst_62 = arith.constant 2.000000e-01 : f32
    %162 = vector.broadcast %cst_62 : f32 to vector<512x16xf32>
    %163 = arith.mulf %162, %159 : vector<512x16xf32>
    %164 = arith.select %161, %159, %163 : vector<512x16xi1>, vector<512x16xf32>
    %c0_63 = arith.constant 0 : index
    %c0_64 = arith.constant 0 : index
    %165 = vector.load %arg10[%c0_63, %c0_64] : memref<16x16xf32, #tpu.memory_space<vmem>>, vector<16x16xf32>
    %cst_65 = arith.constant dense<0.000000e+00> : vector<512x16xf32>
    %166 = tpu.matmul %164, %165, %cst_65 {dimension_numbers = #tpu.dot_dimension_numbers<[1], [0], [0], [1], [0, 0, 1, 1], [], []>} : vector<512x16xf32>, vector<16x16xf32>, vector<512x16xf32> -> vector<512x16xf32>
    %c0_66 = arith.constant 0 : index
    %c0_67 = arith.constant 0 : index
    %167 = vector.load %arg11[%c0_66, %c0_67] : memref<1x16xf32, #tpu.memory_space<vmem>>, vector<1x16xf32>
    %168 = vector.broadcast %167 : vector<1x16xf32> to vector<512x16xf32>
    %169 = arith.addf %166, %168 : vector<512x16xf32>
    %cst_68 = arith.constant 0.000000e+00 : f32
    %170 = vector.broadcast %cst_68 : f32 to vector<512x16xf32>
    %171 = arith.cmpf oge, %169, %170 : vector<512x16xf32>
    %cst_69 = arith.constant 2.000000e-01 : f32
    %172 = vector.broadcast %cst_69 : f32 to vector<512x16xf32>
    %173 = arith.mulf %172, %169 : vector<512x16xf32>
    %174 = arith.select %171, %169, %173 : vector<512x16xi1>, vector<512x16xf32>
    %175 = vector.extract_strided_slice %174 {offsets = [0, 0], sizes = [64, 16], strides = [1, 1]} : vector<512x16xf32> to vector<64x16xf32>
    %176 = vector.extract_strided_slice %174 {offsets = [64, 0], sizes = [64, 16], strides = [1, 1]} : vector<512x16xf32> to vector<64x16xf32>
    %177 = arith.addf %175, %176 : vector<64x16xf32>
    %178 = vector.extract_strided_slice %174 {offsets = [128, 0], sizes = [64, 16], strides = [1, 1]} : vector<512x16xf32> to vector<64x16xf32>
    %179 = arith.addf %177, %178 : vector<64x16xf32>
    %180 = vector.extract_strided_slice %174 {offsets = [192, 0], sizes = [64, 16], strides = [1, 1]} : vector<512x16xf32> to vector<64x16xf32>
    %181 = arith.addf %179, %180 : vector<64x16xf32>
    %182 = vector.extract_strided_slice %174 {offsets = [256, 0], sizes = [64, 16], strides = [1, 1]} : vector<512x16xf32> to vector<64x16xf32>
    %183 = arith.addf %181, %182 : vector<64x16xf32>
    %184 = vector.extract_strided_slice %174 {offsets = [320, 0], sizes = [64, 16], strides = [1, 1]} : vector<512x16xf32> to vector<64x16xf32>
    %185 = arith.addf %183, %184 : vector<64x16xf32>
    %186 = vector.extract_strided_slice %174 {offsets = [384, 0], sizes = [64, 16], strides = [1, 1]} : vector<512x16xf32> to vector<64x16xf32>
    %187 = arith.addf %185, %186 : vector<64x16xf32>
    %188 = vector.extract_strided_slice %174 {offsets = [448, 0], sizes = [64, 16], strides = [1, 1]} : vector<512x16xf32> to vector<64x16xf32>
    %189 = arith.addf %187, %188 : vector<64x16xf32>
    %cst_70 = arith.constant 1.250000e-01 : f32
    %190 = vector.broadcast %cst_70 : f32 to vector<64x16xf32>
    %191 = arith.mulf %189, %190 : vector<64x16xf32>
    %c0_71 = arith.constant 0 : index
    %c0_72 = arith.constant 0 : index
    %192 = vector.load %arg12[%c0_71, %c0_72] : memref<16x64xf32, #tpu.memory_space<vmem>>, vector<16x64xf32>
    %cst_73 = arith.constant dense<0.000000e+00> : vector<64x64xf32>
    %193 = tpu.matmul %191, %192, %cst_73 {dimension_numbers = #tpu.dot_dimension_numbers<[1], [0], [0], [1], [0, 0, 1, 1], [], []>} : vector<64x16xf32>, vector<16x64xf32>, vector<64x64xf32> -> vector<64x64xf32>
    %c0_74 = arith.constant 0 : index
    %c0_75 = arith.constant 0 : index
    %194 = vector.load %arg13[%c0_74, %c0_75] : memref<1x64xf32, #tpu.memory_space<vmem>>, vector<1x64xf32>
    %195 = vector.broadcast %194 : vector<1x64xf32> to vector<64x64xf32>
    %196 = arith.addf %193, %195 : vector<64x64xf32>
    %c0_76 = arith.constant 0 : index
    %c0_77 = arith.constant 0 : index
    %197 = vector.load %arg14[%c0_76, %c0_77] : memref<32x64xf32, #tpu.memory_space<vmem>>, vector<32x64xf32>
    %cst_78 = arith.constant dense<0.000000e+00> : vector<64x64xf32>
    %198 = tpu.matmul %3, %197, %cst_78 {dimension_numbers = #tpu.dot_dimension_numbers<[1], [0], [0], [1], [0, 0, 1, 1], [], []>} : vector<64x32xf32>, vector<32x64xf32>, vector<64x64xf32> -> vector<64x64xf32>
    %c0_79 = arith.constant 0 : index
    %c0_80 = arith.constant 0 : index
    %199 = vector.load %arg15[%c0_79, %c0_80] : memref<1x64xf32, #tpu.memory_space<vmem>>, vector<1x64xf32>
    %200 = vector.broadcast %199 : vector<1x64xf32> to vector<64x64xf32>
    %201 = arith.addf %198, %200 : vector<64x64xf32>
    %202 = arith.addf %196, %201 : vector<64x64xf32>
    %cst_81 = arith.constant 0.000000e+00 : f32
    %203 = vector.broadcast %cst_81 : f32 to vector<64x64xf32>
    %204 = arith.cmpf oge, %202, %203 : vector<64x64xf32>
    %cst_82 = arith.constant 2.000000e-01 : f32
    %205 = vector.broadcast %cst_82 : f32 to vector<64x64xf32>
    %206 = arith.mulf %205, %202 : vector<64x64xf32>
    %207 = arith.select %204, %202, %206 : vector<64x64xi1>, vector<64x64xf32>
    %c0_83 = arith.constant 0 : index
    %c0_84 = arith.constant 0 : index
    %c0_85 = arith.constant 0 : index
    %208 = vector.load %arg16[%c0_83, %c0_84, %c0_85] : memref<1x64x64xf32, #tpu.memory_space<vmem>>, vector<1x64x64xf32>
    %209 = vector.shape_cast %208 : vector<1x64x64xf32> to vector<64x64xf32>
    %210 = vector.shape_cast %207 : vector<64x64xf32> to vector<1x64x64xf32>
    tpu.vector_store %arg16[%c0_83, %c0_84, %c0_85], %210 {strides = array<i32>} : memref<1x64x64xf32, #tpu.memory_space<vmem>>, vector<1x64x64xf32>,
    return
  }
  func.func @transform_0(%arg0: i32) -> (i32, i32, i32) {
    %c0_i32 = arith.constant 0 : i32
    %c0_i32_0 = arith.constant 0 : i32
    %c0_i32_1 = arith.constant 0 : i32
    return %arg0, %c0_i32, %c0_i32_0 : i32, i32, i32
  }
  func.func @transform_1(%arg0: i32) -> (i32, i32, i32) {
    %c0_i32 = arith.constant 0 : i32
    %c0_i32_0 = arith.constant 0 : i32
    %c0_i32_1 = arith.constant 0 : i32
    return %arg0, %c0_i32, %c0_i32_0 : i32, i32, i32
  }
  func.func @transform_2(%arg0: i32) -> (i32, i32) {
    %c0_i32 = arith.constant 0 : i32
    %c0_i32_0 = arith.constant 0 : i32
    %c0_i32_1 = arith.constant 0 : i32
    return %c0_i32, %c0_i32_0 : i32, i32
  }
  func.func @transform_3(%arg0: i32) -> (i32, i32) {
    %c0_i32 = arith.constant 0 : i32
    %c0_i32_0 = arith.constant 0 : i32
    %c0_i32_1 = arith.constant 0 : i32
    return %c0_i32, %c0_i32_0 : i32, i32
  }
  func.func @transform_4(%arg0: i32) -> (i32, i32) {
    %c0_i32 = arith.constant 0 : i32
    %c0_i32_0 = arith.constant 0 : i32
    %c0_i32_1 = arith.constant 0 : i32
    return %c0_i32, %c0_i32_0 : i32, i32
  }
  func.func @transform_5(%arg0: i32) -> (i32, i32) {
    %c0_i32 = arith.constant 0 : i32
    %c0_i32_0 = arith.constant 0 : i32
    %c0_i32_1 = arith.constant 0 : i32
    return %c0_i32, %c0_i32_0 : i32, i32
  }
  func.func @transform_6(%arg0: i32) -> (i32, i32) {
    %c0_i32 = arith.constant 0 : i32
    %c0_i32_0 = arith.constant 0 : i32
    %c0_i32_1 = arith.constant 0 : i32
    return %c0_i32, %c0_i32_0 : i32, i32
  }
  func.func @transform_7(%arg0: i32) -> (i32, i32) {
    %c0_i32 = arith.constant 0 : i32
    %c0_i32_0 = arith.constant 0 : i32
    %c0_i32_1 = arith.constant 0 : i32
    return %c0_i32, %c0_i32_0 : i32, i32
  }
  func.func @transform_8(%arg0: i32) -> (i32, i32) {
    %c0_i32 = arith.constant 0 : i32
    %c0_i32_0 = arith.constant 0 : i32
    %c0_i32_1 = arith.constant 0 : i32
    return %c0_i32, %c0_i32_0 : i32, i32
  }
  func.func @transform_9(%arg0: i32) -> (i32, i32) {
    %c0_i32 = arith.constant 0 : i32
    %c0_i32_0 = arith.constant 0 : i32
    %c0_i32_1 = arith.constant 0 : i32
    return %c0_i32, %c0_i32_0 : i32, i32
  }
  func.func @transform_10(%arg0: i32) -> (i32, i32) {
    %c0_i32 = arith.constant 0 : i32
    %c0_i32_0 = arith.constant 0 : i32
    %c0_i32_1 = arith.constant 0 : i32
    return %c0_i32, %c0_i32_0 : i32, i32
  }
  func.func @transform_11(%arg0: i32) -> (i32, i32) {
    %c0_i32 = arith.constant 0 : i32
    %c0_i32_0 = arith.constant 0 : i32
    %c0_i32_1 = arith.constant 0 : i32
    return %c0_i32, %c0_i32_0 : i32, i32
  }
  func.func @transform_12(%arg0: i32) -> (i32, i32) {
    %c0_i32 = arith.constant 0 : i32
    %c0_i32_0 = arith.constant 0 : i32
    %c0_i32_1 = arith.constant 0 : i32
    return %c0_i32, %c0_i32_0 : i32, i32
  }
  func.func @transform_13(%arg0: i32) -> (i32, i32) {
    %c0_i32 = arith.constant 0 : i32
    %c0_i32_0 = arith.constant 0 : i32
    %c0_i32_1 = arith.constant 0 : i32
    return %c0_i32, %c0_i32_0 : i32, i32
  }
  func.func @transform_14(%arg0: i32) -> (i32, i32) {
    %c0_i32 = arith.constant 0 : i32
    %c0_i32_0 = arith.constant 0 : i32
    %c0_i32_1 = arith.constant 0 : i32
    return %c0_i32, %c0_i32_0 : i32, i32
  }
  func.func @transform_15(%arg0: i32) -> (i32, i32, i32) {
    %c0_i32 = arith.constant 0 : i32
    %c0_i32_0 = arith.constant 0 : i32
    %c0_i32_1 = arith.constant 0 : i32
    return %arg0, %c0_i32, %c0_i32_0 : i32, i32, i32
  }
}

</mosaic_0001>

<bundles_post_ra>
// kernel: cic_forward.1
= control target key start
LH: loop header
LB: loop body
LE: loop exit
PB: predicated region body
PF: predicated region fallthrough
CT: control target
= control target key end

     0   :  { %s4329_s18 = smov 0   ;;  %s6017_s0 = inlined_call_operand.vmem [shape: f32[2,64,3], index: 0, kind: input, shape index: {}]   ;;  %s6018_s1 = inlined_call_operand.vmem [shape: f32[2,64,32], index: 1, kind: input, shape index: {}]   ;;  %s6019_s2 = inlined_call_operand.vmem [shape: f32[32,16], index: 2, kind: input, shape index: {}]   ;;  %s6020_s3 = inlined_call_operand.vmem [shape: f32[1,16], index: 3, kind: input, shape index: {}]   ;;  %s6021_s4 = inlined_call_operand.vmem [shape: f32[3,16], index: 4, kind: input, shape index: {}]   ;;  %s6022_s5 = inlined_call_operand.vmem [shape: f32[3,16], index: 5, kind: input, shape index: {}]   ;;  %s6023_s6 = inlined_call_operand.vmem [shape: f32[1,16], index: 6, kind: input, shape index: {}]   ;;  %s6024_s7 = inlined_call_operand.vmem [shape: f32[16,16], index: 7, kind: input, shape index: {}]   ;;  %s6025_s8 = inlined_call_operand.vmem [shape: f32[1,16], index: 8, kind: input, shape index: {}]   ;;  %s6026_s9 = inlined_call_operand.vmem [shape: f32[16,16], index: 9, kind: input, shape index: {}]   ;;  %s6027_s10 = inlined_call_operand.vmem [shape: f32[1,16], index: 10, kind: input, shape index: {}]   ;;  %s6028_s11 = inlined_call_operand.vmem [shape: f32[16,64], index: 11, kind: input, shape index: {}]   ;;  %s6029_s12 = inlined_call_operand.vmem [shape: f32[1,64], index: 12, kind: input, shape index: {}]   ;;  %s6030_s13 = inlined_call_operand.vmem [shape: f32[32,64], index: 13, kind: input, shape index: {}]   ;;  %s6031_s14 = inlined_call_operand.vmem [shape: f32[1,64], index: 14, kind: input, shape index: {}]   ;;  %s6032_s15 = inlined_call_operand.vmem [shape: f32[2,64,64], index: 15, kind: output, shape index: {}]  }
   0x1 LB: > { %s3870_s19 = sadd.s32 4294967295, %s4246_s18   ;;  %p3874_p0 = scmp.ge.s32.totalorder %s4246_s18, 1  ;;  %s4246_s18 = sphi %s4329_s18, %s25_s18  }
   0x2   : > { %p447_p1 = scmp.lt.s32.totalorder %s4246_s18, 3 }
   0x4   : > { %p448_p2 = pnand %p3874_p0, %p447_p1 }
   0x6   : > { %451 = sbr.rel (%p448_p2) target bundleno = 2934 (0xb76), region = 80 }
   0xb   : > { %p500_p3 = scmp.lt.s32.totalorder %s3870_s19, 1  ;;  %vm629_vm0 = vcmask 23552   ;;  %v534_v39 = vld [vmem:[%s6019_s2 + $0x18] sm:$0xff]  ;;  %v533_v40 = vld [vmem:[%s6019_s2 + $0x10] sm:$0xff]  ;;  %vm1549_vm1 = vcmask 1042432   ;;  %v532_v43 = vld [vmem:[%s6019_s2 + $0x8] sm:$0xff] }
   0xc   : > { %576 = vmatpush.msra.mxu0 %v534_v39  ;;  %v1548_v41 = vld [vmem:[%s6022_s5] sm:$0x7]  ;;  %vm787_vm2 = vcmask 523264   ;;  %vm539_vm3 = vcmask 261120  }
   0xd   : > { %s6055_s19 = smov (!%p500_p3, %s3870_s19), 1  ;;  %3969 = vmatpush.msk.msra.mxu2 %vm1549_vm1, %v1548_v41  ;;  %v531_v47 = vld [vmem:[%s6019_s2] sm:$0xff] }
   0xe   : > { %s4337_s20 = sshll.u32 %s6055_s19, 6  ;;  %577 = vmatpush.msra.mxu0 %v533_v40 }
   0xf   : > { %s504_s23 = scalar_lea.vmem %s6017_s0, %s4337_s20  ;;  %s5996_s19 = scalar_lea.vmem %s6032_s15, %s4337_s20 }
  0x10   : > { %v4343_v0 = vld [vmem:[%s504_s23 + $0x38] sm:$0xff]  ;;  %v4345_v1 = vld [vmem:[%s504_s23] sm:$0xff]  ;;  %v4353_v4 = vld [vmem:[%s504_s23 + $0x30] sm:$0xff]  ;;  %578 = vmatpush.msra.mxu0 %v532_v43 }
  0x11   : > { %3889 = vmatpush.xpose.msk.msra.mxu1 %vm629_vm0, %v4343_v0  ;;  %v695_v2 = vmul.f32 %v4345_v1, %v4345_v1  ;;  %v4351_v3 = vld [vmem:[%s504_s23 + $0x20] sm:$0xff]  ;;  %v4355_v5 = vld [vmem:[%s504_s23 + $0x8] sm:$0xff]  ;;  %v4357_v6 = vld [vmem:[%s504_s23 + $0x10] sm:$0xff]  ;;  %v701_v20 = vmul.f32 %v4353_v4, %v4353_v4  ;;  %v702_v22 = vmul.f32 %v4343_v0, %v4343_v0  ;;  %3970 = vmatmul.msk.f32.vlgmr.msra.gmra.mxu2 %vm629_vm0, %v4345_v1 }
  0x12   : > { %v699_v7 = vmul.f32 %v4351_v3, %v4351_v3  ;;  %v697_v9 = vmul.f32 %v4357_v6, %v4357_v6  ;;  %v696_v11 = vmul.f32 %v4355_v5, %v4355_v5  ;;  %v4370_v13 = vld [vmem:[%s504_s23 + $0x28] sm:$0xff]  ;;  %v4372_v14 = vld [vmem:[%s504_s23 + $0x18] sm:$0xff]  ;;  %s4447_s23 = scalar_lea.vmem %s6018_s1, %s4337_s20  ;;  %579 = vmatpush.msra.mxu0 %v531_v47 }
  0x13   : > { %v703_v8 = vsel %vm629_vm0, %v695_v2, 0.0  ;;  %v698_v15 = vmul.f32 %v4372_v14, %v4372_v14  ;;  %v700_v16 = vmul.f32 %v4370_v13, %v4370_v13  ;;  %v721_v21 = vsel %vm629_vm0, %v701_v20, 0.0  ;;  %v523_v55 = vld [vmem:[%s4447_s23] sm:$0xff]  ;;  %v524_v2 = vld [vmem:[%s4447_s23 + $0x8] sm:$0xff] }
  0x14   : > { %704 = vadd.xlane.f32.xlu0 %v703_v8  ;;  %v715_v10 = vsel %vm629_vm0, %v699_v7, 0.0  ;;  %v709_v12 = vsel %vm629_vm0, %v697_v9, 0.0  ;;  %v706_v17 = vsel %vm629_vm0, %v696_v11, 0.0  ;;  %v724_v23 = vsel %vm629_vm0, %v702_v22, 0.0  ;;  %3881 = vmatmul.msk.f32.vlgmr.msra.gmra.mxu0 %vm539_vm3, %v523_v55 }
  0x15   : > { %3890 = vmatpush.xpose.msk.msra.mxu1 %vm629_vm0, %v4353_v4  ;;  %716 = vadd.xlane.f32.xlu2 %v715_v10  ;;  %v718_v18 = vsel %vm629_vm0, %v700_v16, 0.0  ;;  %v712_v19 = vsel %vm629_vm0, %v698_v15, 0.0 }
  0x16   : > { %710 = vadd.xlane.f32.xlu1 %v709_v12 }
  0x19   : > { %3891 = vmatpush.xpose.msk.msra.mxu1 %vm629_vm0, %v4370_v13  ;;  %3971 = vmatmul.msk.f32.gmra.mxu2 %vm629_vm0, %v4355_v5 }
  0x1c   : > { %707 = vadd.xlane.f32.xlu0 %v706_v17  ;;  %3882 = vmatmul.msk.f32.gmra.mxu0 %vm539_vm3, %v524_v2  ;;  %v525_v17 = vld [vmem:[%s4447_s23 + $0x10] sm:$0xff] }
  0x1d   : > { %3892 = vmatpush.xpose.msk.msra.mxu1 %vm629_vm0, %v4351_v3  ;;  %719 = vadd.xlane.f32.xlu2 %v718_v18 }
  0x1e   : > { %713 = vadd.xlane.f32.xlu1 %v712_v19 }
  0x21   : > { %3893 = vmatpush.xpose.msk.msra.mxu1 %vm629_vm0, %v4372_v14  ;;  %3972 = vmatmul.msk.f32.gmra.mxu2 %vm629_vm0, %v4357_v6 }
  0x24   : > { %722 = vadd.xlane.f32.xlu0 %v721_v21  ;;  %3883 = vmatmul.msk.f32.gmra.mxu0 %vm539_vm3, %v525_v17 }
  0x25   : > { %3894 = vmatpush.xpose.msk.msra.mxu1 %vm629_vm0, %v4357_v6 }
  0x26   : > { %725 = vadd.xlane.f32.xlu1 %v724_v23  ;;  %v526_v23 = vld [vmem:[%s4447_s23 + $0x18] sm:$0xff] }
  0x29   : > { %3895 = vmatpush.xpose.msk.msra.mxu1 %vm629_vm0, %v4355_v5  ;;  %3973 = vmatmul.msk.f32.gmra.mxu2 %vm629_vm0, %v4372_v14 }
  0x2c   : > { %3884 = vmatmul.msk.f32.gmra.mxu0 %vm539_vm3, %v526_v23  ;;  %v4221_v23 = vld [vmem:[%s6020_s3] ss:$0 sm:$0xff] }
  0x2d   : > { %3896 = vmatpush.xpose.msk.msra.mxu1 %vm629_vm0, %v4345_v1 }
  0x30   : > { %3897 = vmatmul.msk.f32.vlgmr.msra.gmra.mxu1 %vm629_vm0, %v4345_v1 }
  0x31   : > { %3974 = vmatmul.msk.f32.gmra.mxu2 %vm629_vm0, %v4351_v3 }
  0x38   : > { %3898 = vmatmul.msk.f32.gmra.mxu1 %vm629_vm0, %v4355_v5 }
  0x39   : > { %3975 = vmatmul.msk.f32.gmra.mxu2 %vm629_vm0, %v4370_v13 }
  0x40   : > { %3899 = vmatmul.msk.f32.gmra.mxu1 %vm629_vm0, %v4357_v6 }
  0x41   : > { %3976 = vmatmul.msk.f32.gmra.mxu2 %vm629_vm0, %v4353_v4 }
  0x48   : > { %3900 = vmatmul.msk.f32.gmra.mxu1 %vm629_vm0, %v4372_v14 }
  0x49   : > { %3977 = vmatmul.msk.f32.gmra.mxu2 %vm629_vm0, %v4343_v0 }
  0x50   : > { %3901 = vmatmul.msk.f32.gmra.mxu1 %vm629_vm0, %v4351_v3 }
  0x58   : > { %3902 = vmatmul.msk.f32.gmra.mxu1 %vm629_vm0, %v4370_v13 }
  0x60   : > { %3903 = vmatmul.msk.f32.gmra.mxu1 %vm629_vm0, %v4353_v4 }
  0x68   : > { %3904 = vmatmul.msk.f32.gmra.mxu1 %vm629_vm0, %v4343_v0 }
  0x87   : > { %v705_v24 = vpop.xlane.xlu0 %704 }
  0x88   : > { %743 = vxpose.xlu2.b32.start [1/8] (short) (narrow) %v705_v24, 8  ;;  %v717_v28 = vpop.xlane.xlu2 %716 }
  0x89   : > { %v711_v26 = vpop.xlane.xlu1 %710 }
  0x8f   : > { %v708_v25 = vpop.xlane.xlu0 %707 }
  0x90   : > { %744 = vxpose.xlu2.b32.cont [2/8] (short) (narrow) %v708_v25, 8  ;;  %v720_v29 = vpop.xlane.xlu2 %719 }
  0x91   : > { %v714_v27 = vpop.xlane.xlu1 %713 }
  0x97   : > { %v4415_v30 = vpop.xlane.xlu0 %722 }
  0x98   : > { %745 = vxpose.xlu2.b32.cont [3/8] (short) (narrow) %v711_v26, 8 }
  0x99   : > { %v4418_v31 = vpop.xlane.xlu1 %725 }
  0xa0   : > { %746 = vxpose.xlu2.b32.cont [4/8] (short) (narrow) %v714_v27, 8 }
  0xa8   : > { %747 = vxpose.xlu2.b32.cont [5/8] (short) (narrow) %v717_v28, 8 }
  0xad   : > { %v671_v32 = vpop.f32.mrf.mxu1 }
  0xae   : > { %v727_v37 = vmul.f32 2.0, %v671_v32 }
  0xb0   : > { %748 = vxpose.xlu2.b32.cont [6/8] (short) (narrow) %v720_v29, 8  ;;  %v735_v44 = vsub.f32 %v727_v37, %v705_v24 }
  0xb5   : > { %v674_v33 = vpop.f32.mrf.mxu1 }
  0xb6   : > { %v728_v38 = vmul.f32 2.0, %v674_v33 }
  0xb8   : > { %749 = vxpose.xlu2.b32.cont [7/8] (short) (narrow) %v4415_v30, 8  ;;  %v736_v45 = vsub.f32 %v728_v38, %v708_v25 }
  0xbd   : > { %v677_v34 = vpop.f32.mrf.mxu1 }
  0xbe   : > { %v729_v48 = vmul.f32 2.0, %v677_v34 }
  0xc0   : > { %750 = vxpose.xlu2.b32.end [8/8] (short) (narrow) %v4418_v31, 8  ;;  %v737_v56 = vsub.f32 %v729_v48, %v711_v26 }
  0xc5   : > { %v680_v35 = vpop.f32.mrf.mxu1 }
  0xc6   : > { %v730_v49 = vmul.f32 2.0, %v680_v35 }
  0xc8   : > { %v738_v57 = vsub.f32 %v730_v49, %v714_v27  ;;  %v527_v27 = vld [vmem:[%s4447_s23 + $0x20] sm:$0xff] }
  0xc9   : > { %3885 = vmatmul.msk.f32.gmra.mxu0 %vm539_vm3, %v527_v27 }
  0xcd   : > { %v683_v36 = vpop.f32.mrf.mxu1 }
  0xce   : > { %v731_v60 = vmul.f32 2.0, %v683_v36 }
  0xd0   : > { %v739_v8 = vsub.f32 %v731_v60, %v717_v28  ;;  %v528_v28 = vld [vmem:[%s4447_s23 + $0x28] sm:$0xff] }
  0xd1   : > { %3886 = vmatmul.msk.f32.gmra.mxu0 %vm539_vm3, %v528_v28 }
  0xd5   : > { %v686_v52 = vpop.f32.mrf.mxu1 }
  0xd6   : > { %v732_v61 = vmul.f32 2.0, %v686_v52 }
  0xd8   : > { %v740_v9 = vsub.f32 %v732_v61, %v720_v29  ;;  %v529_v29 = vld [vmem:[%s4447_s23 + $0x30] sm:$0xff] }
  0xd9   : > { %3887 = vmatmul.msk.f32.gmra.mxu0 %vm539_vm3, %v529_v29 }
  0xdd   : > { %v689_v7 = vpop.f32.mrf.mxu1 }
  0xde   : > { %v733_v12 = vmul.f32 2.0, %v689_v7 }
  0xe0   : > { %v741_v18 = vsub.f32 %v733_v12, %v4415_v30  ;;  %v530_v30 = vld [vmem:[%s4447_s23 + $0x38] sm:$0xff] }
  0xe1   : > { %3888 = vmatmul.msk.f32.gmra.mxu0 %vm539_vm3, %v530_v30 }
  0xe5   : > { %v692_v19 = vpop.f32.mrf.mxu1 }
  0xe6   : > { %v734_v21 = vmul.f32 2.0, %v692_v19 }
  0xe8   : > { %v742_v24 = vsub.f32 %v734_v21, %v4418_v31  ;;  %v784_v31 = vlaneseq }
  0xea   : > { %v785_v32 = vand.u32 127, %v784_v31 }
  0xec   : > { %v4509_v33 = vcvt.s32.f32 %v785_v32 }
 0x121   : > { %v759_v42 = vpop.trf.xlu2 }
 0x122   : > { %v775_v46 = vperm.slane %v759_v42, 0 }
 0x124   : > { %v4439_v50 = vsub.f32 %v735_v44, %v775_v46  ;;  %v4441_v51 = vsub.f32 %v736_v45, %v775_v46  ;;  %v4455_v58 = vsub.f32 %v737_v56, %v775_v46  ;;  %v4457_v59 = vsub.f32 %v738_v57, %v775_v46  ;;  %v4520_v44 = vpop.f32.mrf.mxu2  ;;  %v4522_v45 = vpop.f32.mrf.mxu0 }
 0x125   : > { %v4467_v10 = vsub.f32 %v739_v8, %v775_v46  ;;  %v4469_v11 = vsub.f32 %v740_v9, %v775_v46  ;;  %v4480_v20 = vsub.f32 %v741_v18, %v775_v46  ;;  %v4489_v25 = vsub.f32 %v742_v24, %v775_v46  ;;  %v1602_v18 = vld [vmem:[%s6021_s4] sm:$0x7] }
 0x126   : > { %v788_v53 = vsel %vm787_vm2, %v4439_v50, -inf  ;;  %v791_v54 = vsel %vm787_vm2, %v4441_v51, -inf  ;;  %v794_v62 = vsel %vm787_vm2, %v4455_v58, -inf  ;;  %v797_v63 = vsel %vm787_vm2, %v4457_v59, -inf  ;;  %3978 = vmatpush.msk.msra.mxu3 %vm1549_vm1, %v1602_v18 }
 0x127   : > { %789 = vmax.xlane.f32.xlu0 %v788_v53  ;;  %792 = vmax.xlane.f32.xlu1 %v791_v54  ;;  %v800_v15 = vsel %vm787_vm2, %v4467_v10, -inf  ;;  %v803_v16 = vsel %vm787_vm2, %v4469_v11, -inf  ;;  %v806_v22 = vsel %vm787_vm2, %v4480_v20, -inf  ;;  %v809_v26 = vsel %vm787_vm2, %v4489_v25, -inf }
 0x128   : > { %3979 = vmatmul.msk.f32.vlgmr.msra.gmra.mxu3 %vm629_vm0, %v4345_v1 }
 0x12c   : > { %v4530_v54 = vpop.f32.mrf.mxu2  ;;  %v584_v55 = vpop.f32.mrf.mxu0 }
 0x12f   : > { %795 = vmax.xlane.f32.xlu0 %v794_v62  ;;  %798 = vmax.xlane.f32.xlu1 %v797_v63 }
 0x130   : > { %3980 = vmatmul.msk.f32.gmra.mxu3 %vm629_vm0, %v4355_v5 }
 0x134   : > { %v4538_v63 = vpop.f32.mrf.mxu2  ;;  %v587_v2 = vpop.f32.mrf.mxu0 }
 0x137   : > { %801 = vmax.xlane.f32.xlu0 %v800_v15  ;;  %804 = vmax.xlane.f32.xlu1 %v803_v16 }
 0x138   : > { %3981 = vmatmul.msk.f32.gmra.mxu3 %vm629_vm0, %v4357_v6 }
 0x13c   : > { %v1579_v12 = vpop.f32.mrf.mxu2  ;;  %v590_v15 = vpop.f32.mrf.mxu0 }
 0x13d   : > { %v591_v1 = vadd.f32 %v4221_v23, %v590_v15 }
 0x13f   : > { %807 = vmax.xlane.f32.xlu1 %v806_v22  ;;  %vm608_vm1 = vcmp.ge.f32.partialorder %v591_v1, 0.0 }
 0x140   : > { %3982 = vmatmul.msk.f32.gmra.mxu3 %vm629_vm0, %v4372_v14 }
 0x144   : > { %v1582_v16 = vpop.f32.mrf.mxu2 }
 0x146   : > { %v593_v17 = vpop.f32.mrf.mxu0 }
 0x147   : > { %810 = vmax.xlane.f32.xlu1 %v809_v26  ;;  %v594_v28 = vadd.f32 %v4221_v23, %v593_v17 }
 0x148   : > { %3983 = vmatmul.msk.f32.gmra.mxu3 %vm629_vm0, %v4351_v3 }
 0x149   : > { %v617_v5 = vmul.f32 0.2, %v594_v28  ;;  %vm609_vm15 = vcmp.ge.f32.partialorder %v594_v28, 0.0 }
 0x14c   : > { %v1585_v19 = vpop.f32.mrf.mxu2 }
 0x14e   : > { %v596_v21 = vpop.f32.mrf.mxu0 }
 0x14f   : > { %v597_v27 = vadd.f32 %v4221_v23, %v596_v21 }
 0x150   : > { %3984 = vmatmul.msk.f32.gmra.mxu3 %vm629_vm0, %v4370_v13 }
 0x151   : > { %v618_v31 = vmul.f32 0.2, %v597_v27  ;;  %vm610_vm13 = vcmp.ge.f32.partialorder %v597_v27, 0.0 }
 0x153   : > { %v4560_v6 = vsel %vm610_vm13, %v597_v27, %v618_v31 }
 0x154   : > { %v1588_v24 = vpop.f32.mrf.mxu2 }
 0x156   : > { %v599_v22 = vpop.f32.mrf.mxu0 }
 0x157   : > { %v600_v26 = vadd.f32 %v4221_v23, %v599_v22 }
 0x158   : > { %3985 = vmatmul.msk.f32.gmra.mxu3 %vm629_vm0, %v4353_v4 }
 0x159   : > { %v619_v29 = vmul.f32 0.2, %v600_v26  ;;  %vm611_vm12 = vcmp.ge.f32.partialorder %v600_v26, 0.0 }
 0x15e   : > { %v602_v30 = vpop.f32.mrf.mxu0 }
 0x15f   : > { %v603_v32 = vadd.f32 %v4221_v23, %v602_v30 }
 0x160   : > { %3986 = vmatmul.msk.f32.gmra.mxu3 %vm629_vm0, %v4343_v0 }
 0x161   : > { %vm612_vm14 = vcmp.ge.f32.partialorder %v603_v32, 0.0 }
 0x19a   : > { %v790_v34 = vpop.xlane.xlu0 %789  ;;  %v793_v35 = vpop.xlane.xlu1 %792 }
 0x19b   : > { %vm812_vm4 = vcmp.eq.f32.partialorder %v4439_v50, %v790_v34  ;;  %vm813_vm5 = vcmp.eq.f32.partialorder %v4441_v51, %v793_v35  ;;  %v588_v34 = vadd.f32 %v4221_v23, %v587_v2  ;;  %v620_v35 = vmul.f32 0.2, %v603_v32 }
 0x19c   : > { %v820_v36 = vsel %vm812_vm4, %v4509_v33, 64.0  ;;  %v821_v40 = vsel %vm813_vm5, %v4509_v33, 64.0 }
 0x19d   : > { %v828_v37 = vsel %vm787_vm2, %v820_v36, inf  ;;  %v831_v42 = vsel %vm787_vm2, %v821_v40, inf  ;;  %v1591_v36 = vpop.f32.mrf.mxu2  ;;  %v4558_v40 = vsel %vm612_vm14, %v603_v32, %v620_v35  ;;  %vm607_vm4 = vcmp.ge.f32.partialorder %v588_v34, 0.0 }
 0x19e   : > { %829 = vmin.xlane.f32.xlu0 %v828_v37  ;;  %v4556_v37 = vsel %vm611_vm12, %v600_v26, %v619_v29 }
 0x1a2   : > { %v796_v38 = vpop.xlane.xlu0 %795  ;;  %v799_v39 = vpop.xlane.xlu1 %798 }
 0x1a3   : > { %vm815_vm6 = vcmp.eq.f32.partialorder %v4457_v59, %v799_v39  ;;  %vm814_vm7 = vcmp.eq.f32.partialorder %v4455_v58, %v796_v38  ;;  %v585_v38 = vadd.f32 %v4221_v23, %v584_v55  ;;  %v616_v39 = vmul.f32 0.2, %v591_v1 }
 0x1a4   : > { %v823_v41 = vsel %vm815_vm6, %v4509_v33, 64.0  ;;  %v822_v47 = vsel %vm814_vm7, %v4509_v33, 64.0 }
 0x1a5   : > { %v837_v43 = vsel %vm787_vm2, %v823_v41, inf  ;;  %v834_v52 = vsel %vm787_vm2, %v822_v47, inf  ;;  %v1601_v41 = vadd.f32 %v1591_v36, %v4558_v40  ;;  %v1599_v47 = vadd.f32 %v1585_v19, %v4560_v6 }
 0x1a6   : > { %832 = vmin.xlane.f32.xlu0 %v831_v42  ;;  %838 = vmin.xlane.f32.xlu1 %v837_v43  ;;  %v1600_v42 = vadd.f32 %v1588_v24, %v4556_v37  ;;  %v615_v43 = vmul.f32 0.2, %v588_v34  ;;  %vm606_vm5 = vcmp.ge.f32.partialorder %v585_v38, 0.0 }
 0x1a7   : > { %1855 = vmatpush.msrb.mxu1 %v1601_v41  ;;  %4200 = vmatpush.msrb.mxu2 %v1601_v41 }
 0x1a8   : > { %v4573_v55 = vsel %vm607_vm4, %v588_v34, %v615_v43 }
 0x1a9   : > { %1856 = vmatpush.msrb.mxu1 %v1600_v42  ;;  %4201 = vmatpush.msrb.mxu2 %v1600_v42 }
 0x1aa   : > { %v805_v46 = vpop.xlane.xlu1 %804  ;;  %v802_v48 = vpop.xlane.xlu0 %801 }
 0x1ab   : > { %vm817_vm8 = vcmp.eq.f32.partialorder %v4469_v11, %v805_v46  ;;  %vm816_vm9 = vcmp.eq.f32.partialorder %v4467_v10, %v802_v48  ;;  %v4566_v46 = vsel %vm609_vm15, %v594_v28, %v617_v5  ;;  %v614_v48 = vmul.f32 0.2, %v585_v38  ;;  %1857 = vmatpush.msrb.mxu1 %v1599_v47  ;;  %4202 = vmatpush.msrb.mxu2 %v1599_v47 }
 0x1ac   : > { %v825_v49 = vsel %vm817_vm8, %v4509_v33, 64.0  ;;  %v824_v57 = vsel %vm816_vm9, %v4509_v33, 64.0 }
 0x1ad   : > { %v843_v53 = vsel %vm787_vm2, %v825_v49, inf  ;;  %v840_v61 = vsel %vm787_vm2, %v824_v57, inf  ;;  %v4569_v49 = vsel %vm608_vm1, %v591_v1, %v616_v39  ;;  %v1596_v57 = vadd.f32 %v4538_v63, %v4573_v55 }
 0x1ae   : > { %835 = vmin.xlane.f32.xlu0 %v834_v52  ;;  %844 = vmin.xlane.f32.xlu1 %v843_v53  ;;  %v1598_v52 = vadd.f32 %v1582_v16, %v4566_v46  ;;  %v582_v53 = vadd.f32 %v4221_v23, %v4522_v45  ;;  %v1597_v14 = vadd.f32 %v1579_v12, %v4569_v49 }
 0x1b0   : > { %1858 = vmatpush.msrb.mxu1 %v1598_v52  ;;  %4203 = vmatpush.msrb.mxu2 %v1598_v52  ;;  %vm605_vm6 = vcmp.ge.f32.partialorder %v582_v53, 0.0 }
 0x1b2   : > { %v808_v56 = vpop.xlane.xlu1 %807  ;;  %1859 = vmatpush.msrb.mxu1 %v1597_v14  ;;  %4204 = vmatpush.msrb.mxu2 %v1597_v14 }
 0x1b3   : > { %vm818_vm10 = vcmp.eq.f32.partialorder %v4480_v20, %v808_v56  ;;  %v4576_v56 = vsel %vm606_vm5, %v585_v38, %v614_v48 }
 0x1b4   : > { %v826_v60 = vsel %vm818_vm10, %v4509_v33, 64.0  ;;  %v1595_v45 = vadd.f32 %v4530_v54, %v4576_v56  ;;  %1860 = vmatpush.msrb.mxu1 %v1596_v57  ;;  %4205 = vmatpush.msrb.mxu2 %v1596_v57  ;;  %v6033_v54 = vmov 0.0  }
 0x1b5   : > { %v846_v62 = vsel %vm787_vm2, %v826_v60, inf  ;;  %v613_v60 = vmul.f32 0.2, %v582_v53 }
 0x1b6   : > { %841 = vmin.xlane.f32.xlu0 %v840_v61  ;;  %847 = vmin.xlane.f32.xlu1 %v846_v62 }
 0x1b7   : > { %v4584_v61 = vsel %vm605_vm6, %v582_v53, %v613_v60  ;;  %1861 = vmatpush.msrb.mxu1 %v1595_v45  ;;  %4206 = vmatpush.msrb.mxu2 %v1595_v45 }
 0x1b8   : > { %v1594_v62 = vadd.f32 %v4520_v44, %v4584_v61 }
 0x1ba   : > { %v811_v7 = vpop.xlane.xlu1 %810  ;;  %1862 = vmatpush.msrb.mxu1 %v1594_v62  ;;  %4207 = vmatpush.msrb.mxu2 %v1594_v62  ;;  %v2381_v62 = vld [vmem:[%s6024_s7 + $0x8] sm:$0xff] }
 0x1bb   : > { %vm819_vm11 = vcmp.eq.f32.partialorder %v4489_v25, %v811_v7  ;;  %4208 = vmatpush.msrb.mxu3 %v2381_v62 }
 0x1bc   : > { %v827_v8 = vsel %vm819_vm11, %v4509_v33, 64.0  ;;  %2593 = vmatpush.msra.mxu1 %v2381_v62 }
 0x1bd   : > { %v849_v9 = vsel %vm787_vm2, %v827_v8, inf }
 0x1be   : > { %850 = vmin.xlane.f32.xlu1 %v849_v9 }
 0x211   : > { %v830_v3 = vpop.xlane.xlu0 %829 }
 0x212   : > { %vm852_vm7 = vcmp.eq.f32.partialorder %v4509_v33, %v830_v3  ;;  %v1623_v3 = vpop.f32.mrf.mxu3 }
 0x213   : > { %v3905_v63 = vsel %vm852_vm7, 1.0, %v6033_v54  ;;  %v4597_v44 = vsel %vm852_vm7, -inf, %v4439_v50 }
 0x214   : > { %3987 = vmatmul.msk.f32.vlgmr.msrb.gmra.mxu1 %vm787_vm2, %v3905_v63  ;;  %v884_v13 = vsel %vm787_vm2, %v4597_v44, -inf  ;;  %v2380_v63 = vld [vmem:[%s6024_s7] sm:$0xff] }
 0x215   : > { %885 = vmax.xlane.f32.xlu0 %v884_v13  ;;  %2594 = vmatpush.msra.mxu1 %v2380_v63 }
 0x216   : > { %4209 = vmatpush.msrb.mxu3 %v2380_v63 }
 0x219   : > { %v833_v2 = vpop.xlane.xlu0 %832  ;;  %v839_v4 = vpop.xlane.xlu1 %838 }
 0x21a   : > { %vm853_vm8 = vcmp.eq.f32.partialorder %v4509_v33, %v833_v2  ;;  %vm855_vm0 = vcmp.eq.f32.partialorder %v4509_v33, %v839_v4  ;;  %v1626_v2 = vpop.f32.mrf.mxu3 }
 0x21b   : > { %v3906_v0 = vsel %vm853_vm8, 1.0, %v6033_v54  ;;  %v4606_v7 = vsel %vm853_vm8, -inf, %v4441_v51  ;;  %v4611_v50 = vsel %vm855_vm0, -inf, %v4457_v59 }
 0x21c   : > { %3988 = vmatmul.msk.f32.gmra.mxu1 %vm787_vm2, %v3906_v0  ;;  %v887_v8 = vsel %vm787_vm2, %v4606_v7, -inf  ;;  %v893_v9 = vsel %vm787_vm2, %v4611_v50, -inf }
 0x21d   : > { %888 = vmax.xlane.f32.xlu0 %v887_v8  ;;  %894 = vmax.xlane.f32.xlu1 %v893_v9  ;;  %v4695_v8 = vsub.f32 %v4584_v61, %v1623_v3 }
 0x221   : > { %v836_v12 = vpop.xlane.xlu0 %835  ;;  %v845_v15 = vpop.xlane.xlu1 %844 }
 0x222   : > { %vm854_vm9 = vcmp.eq.f32.partialorder %v4509_v33, %v836_v12  ;;  %vm857_vm10 = vcmp.eq.f32.partialorder %v4509_v33, %v845_v15 }
 0x223   : > { %v3907_v51 = vsel %vm854_vm9, 1.0, %v6033_v54  ;;  %v4622_v59 = vsel %vm854_vm9, -inf, %v4455_v58  ;;  %v4627_v16 = vsel %vm857_vm10, -inf, %v4469_v11  ;;  %v3908_v58 = vsel %vm855_vm0, 1.0, %v6033_v54 }
 0x224   : > { %3989 = vmatmul.msk.f32.gmra.mxu1 %vm787_vm2, %v3907_v51  ;;  %v890_v17 = vsel %vm787_vm2, %v4622_v59, -inf  ;;  %v899_v18 = vsel %vm787_vm2, %v4627_v16, -inf  ;;  %v1629_v51 = vpop.f32.mrf.mxu3 }
 0x225   : > { %891 = vmax.xlane.f32.xlu0 %v890_v17  ;;  %900 = vmax.xlane.f32.xlu1 %v899_v18  ;;  %v4708_v18 = vld [vmem:[%s6023_s6] ss:$0 sm:$0xff] }
 0x229   : > { %v842_v19 = vpop.xlane.xlu0 %841  ;;  %v848_v21 = vpop.xlane.xlu1 %847 }
 0x22a   : > { %vm856_vm11 = vcmp.eq.f32.partialorder %v4509_v33, %v842_v19  ;;  %vm858_vm12 = vcmp.eq.f32.partialorder %v4509_v33, %v848_v21  ;;  %v4711_v21 = vsub.f32 %v4576_v56, %v1626_v2 }
 0x22b   : > { %v4640_v11 = vsel %vm856_vm11, -inf, %v4467_v10  ;;  %v4643_v22 = vsel %vm858_vm12, -inf, %v4480_v20  ;;  %v3909_v26 = vsel %vm856_vm11, 1.0, %v6033_v54  ;;  %v3910_v10 = vsel %vm857_vm10, 1.0, %v6033_v54 }
 0x22c   : > { %3990 = vmatmul.msk.f32.gmra.mxu1 %vm787_vm2, %v3908_v58  ;;  %v896_v23 = vsel %vm787_vm2, %v4640_v11, -inf  ;;  %v902_v24 = vsel %vm787_vm2, %v4643_v22, -inf  ;;  %v3911_v20 = vsel %vm858_vm12, 1.0, %v6033_v54  ;;  %vm2386_vm11 = vcmask 130048  }
 0x22d   : > { %897 = vmax.xlane.f32.xlu0 %v896_v23  ;;  %903 = vmax.xlane.f32.xlu1 %v902_v24 }
 0x231   : > { %v851_v27 = vpop.xlane.xlu1 %850 }
 0x232   : > { %vm859_vm13 = vcmp.eq.f32.partialorder %v4509_v33, %v851_v27 }
 0x233   : > { %v3912_v28 = vsel %vm859_vm13, 1.0, %v6033_v54  ;;  %v4665_v31 = vsel %vm859_vm13, -inf, %v4489_v25 }
 0x234   : > { %3991 = vmatmul.msk.f32.gmra.mxu1 %vm787_vm2, %v3909_v26  ;;  %v905_v36 = vsel %vm787_vm2, %v4665_v31, -inf }
 0x23c   : > { %3992 = vmatmul.msk.f32.gmra.mxu1 %vm787_vm2, %v3910_v10 }
 0x244   : > { %3993 = vmatmul.msk.f32.gmra.mxu1 %vm787_vm2, %v3911_v20 }
 0x24c   : > { %3994 = vmatmul.msk.f32.gmra.mxu1 %vm787_vm2, %v3912_v28  ;;  %v1632_v28 = vpop.f32.mrf.mxu3 }
 0x288   : > { %v886_v29 = vpop.xlane.xlu0 %885 }
 0x289   : > { %vm908_vm14 = vcmp.eq.f32.partialorder %v4597_v44, %v886_v29 }
 0x28a   : > { %v916_v30 = vsel %vm908_vm14, %v4509_v33, 64.0 }
 0x28b   : > { %v924_v1 = vsel %vm787_vm2, %v916_v30, inf }
 0x28c   : > { %925 = vmin.xlane.f32.xlu0 %v924_v1  ;;  %v4728_v1 = vsub.f32 %v4573_v55, %v1629_v51 }
 0x290   : > { %v889_v32 = vpop.xlane.xlu0 %888  ;;  %v895_v34 = vpop.xlane.xlu1 %894 }
 0x291   : > { %vm909_vm15 = vcmp.eq.f32.partialorder %v4606_v7, %v889_v32  ;;  %vm911_vm1 = vcmp.eq.f32.partialorder %v4611_v50, %v895_v34  ;;  %v1864_v13 = vpop.f32.mrf.mxu1 }
 0x292   : > { %v917_v5 = vsel %vm909_vm15, %v4509_v33, 64.0  ;;  %v919_v25 = vsel %vm911_vm1, %v4509_v33, 64.0  ;;  %v2056_v17 = vsub.f32 %v1864_v13, %v4695_v8 }
 0x293   : > { %v927_v35 = vsel %vm787_vm2, %v917_v5, inf  ;;  %v933_v43 = vsel %vm787_vm2, %v919_v25, inf }
 0x294   : > { %928 = vmin.xlane.f32.xlu2 %v927_v35  ;;  %906 = vmax.xlane.f32.xlu0 %v905_v36  ;;  %v2124_v58 = vadd.f32 %v4708_v18, %v2056_v17 }
 0x296   : > { %v2252_v27 = vmul.f32 0.2, %v2124_v58  ;;  %vm2188_vm10 = vcmp.ge.f32.partialorder %v2124_v58, 0.0 }
 0x298   : > { %v892_v38 = vpop.xlane.xlu0 %891  ;;  %v901_v39 = vpop.xlane.xlu1 %900  ;;  %v2316_v35 = vsel %vm2188_vm10, %v2124_v58, %v2252_v27 }
 0x299   : > { %vm910_vm4 = vcmp.eq.f32.partialorder %v4622_v59, %v892_v38  ;;  %vm913_vm5 = vcmp.eq.f32.partialorder %v4627_v16, %v901_v39  ;;  %v1867_v4 = vpop.f32.mrf.mxu1 }
 0x29a   : > { %v918_v41 = vsel %vm910_vm4, %v4509_v33, 64.0  ;;  %v921_v48 = vsel %vm913_vm5, %v4509_v33, 64.0  ;;  %v2057_v20 = vsub.f32 %v1867_v4, %v4711_v21 }
 0x29b   : > { %v930_v42 = vsel %vm787_vm2, %v918_v41, inf  ;;  %v939_v57 = vsel %vm787_vm2, %v921_v48, inf  ;;  %v4749_v41 = vsub.f32 %v4569_v49, %v1632_v28 }
 0x29c   : > { %931 = vmin.xlane.f32.xlu1 %v930_v42  ;;  %934 = vmin.xlane.f32.xlu0 %v933_v43  ;;  %v1635_v42 = vpop.f32.mrf.mxu3 }
 0x2a0   : > { %v898_v47 = vpop.xlane.xlu0 %897  ;;  %v904_v52 = vpop.xlane.xlu1 %903 }
 0x2a1   : > { %vm912_vm6 = vcmp.eq.f32.partialorder %v4640_v11, %v898_v47  ;;  %vm914_vm7 = vcmp.eq.f32.partialorder %v4643_v22, %v904_v52 }
 0x2a2   : > { %v920_v53 = vsel %vm912_vm6, %v4509_v33, 64.0  ;;  %v922_v60 = vsel %vm914_vm7, %v4509_v33, 64.0 }
 0x2a3   : > { %v936_v14 = vsel %vm787_vm2, %v920_v53, inf  ;;  %v942_v45 = vsel %vm787_vm2, %v922_v60, inf }
 0x2a4   : > { %937 = vmin.xlane.f32.xlu1 %v936_v14  ;;  %940 = vmin.xlane.f32.xlu0 %v939_v57  ;;  %v1638_v2 = vpop.f32.mrf.mxu3 }
 0x2ac   : > { %943 = vmin.xlane.f32.xlu0 %v942_v45 }
 0x2ff   : > { %v926_v0 = vpop.xlane.xlu0 %925 }
 0x300   : > { %vm948_vm8 = vcmp.eq.f32.partialorder %v4509_v33, %v926_v0 }
 0x301   : > { %v3913_v9 = vsel %vm948_vm8, 1.0, %v6033_v54  ;;  %v4699_v12 = vsel %vm948_vm8, -inf, %v4597_v44  ;;  %v1870_v44 = vpop.f32.mrf.mxu1 }
 0x302   : > { %3995 = vmatmul.msk.f32.gmra.mxu1 %vm787_vm2, %v3913_v9  ;;  %v980_v15 = vsel %vm787_vm2, %v4699_v12, -inf  ;;  %v2058_v39 = vsub.f32 %v1870_v44, %v4728_v1 }
 0x303   : > { %981 = vmax.xlane.f32.xlu1 %v980_v15 }
 0x304   : > { %v2126_v47 = vadd.f32 %v4708_v18, %v2058_v39 }
 0x306   : > { %v2254_v60 = vmul.f32 0.2, %v2126_v47  ;;  %vm2190_vm4 = vcmp.ge.f32.partialorder %v2126_v47, 0.0 }
 0x307   : > { %v929_v61 = vpop.xlane.xlu2 %928  ;;  %v907_v19 = vpop.xlane.xlu0 %906 }
 0x308   : > { %vm949_vm0 = vcmp.eq.f32.partialorder %v4509_v33, %v929_v61  ;;  %vm915_vm9 = vcmp.eq.f32.partialorder %v4665_v31, %v907_v19  ;;  %v2318_v13 = vsel %vm2190_vm4, %v2126_v47, %v2254_v60  ;;  %v1641_v61 = vpop.f32.mrf.mxu3 }
 0x309   : > { %v3914_v23 = vsel %vm949_vm0, 1.0, %v6033_v54  ;;  %v4718_v24 = vsel %vm949_vm0, -inf, %v4606_v7  ;;  %v923_v26 = vsel %vm915_vm9, %v4509_v33, 64.0  ;;  %v2125_v7 = vadd.f32 %v4708_v18, %v2057_v20  ;;  %v1873_v36 = vpop.f32.mrf.mxu1 }
 0x30a   : > { %3996 = vmatmul.msk.f32.gmra.mxu1 %vm787_vm2, %v3914_v23  ;;  %v983_v56 = vsel %vm787_vm2, %v4718_v24, -inf  ;;  %v945_v10 = vsel %vm787_vm2, %v923_v26, inf }
 0x30b   : > { %984 = vmax.xlane.f32.xlu1 %v983_v56  ;;  %946 = vmin.xlane.f32.xlu0 %v945_v10  ;;  %vm2189_vm14 = vcmp.ge.f32.partialorder %v2125_v7, 0.0 }
 0x30f   : > { %v935_v29 = vpop.xlane.xlu0 %934  ;;  %v932_v30 = vpop.xlane.xlu1 %931 }
 0x310   : > { %vm951_vm12 = vcmp.eq.f32.partialorder %v4509_v33, %v935_v29  ;;  %vm950_vm13 = vcmp.eq.f32.partialorder %v4509_v33, %v932_v30  ;;  %v1644_v27 = vpop.f32.mrf.mxu3 }
 0x311   : > { %v4735_v32 = vsel %vm951_vm12, -inf, %v4611_v50  ;;  %v3915_v34 = vsel %vm950_vm13, 1.0, %v6033_v54  ;;  %v4739_v5 = vsel %vm950_vm13, -inf, %v4622_v59  ;;  %v2253_v50 = vmul.f32 0.2, %v2125_v7  ;;  %v1876_v57 = vpop.f32.mrf.mxu1 }
 0x312   : > { %3997 = vmatmul.msk.f32.vlgmr.msrb.gmra.mxu2 %vm787_vm2, %v3915_v34  ;;  %4051 = vmatmul.msk.f32.vlgmr.msra.gmra.mxu1 %vm2386_vm11, %v2316_v35  ;;  %v989_v55 = vsel %vm787_vm2, %v4735_v32, -inf  ;;  %v986_v38 = vsel %vm787_vm2, %v4739_v5, -inf  ;;  %v3916_v48 = vsel %vm951_vm12, 1.0, %v6033_v54  ;;  %v4814_v29 = vsub.f32 %v4558_v40, %v1644_v27  ;;  %v2981_v40 = vld [vmem:[%s6026_s9 + $0x8] sm:$0xff] }
 0x313   : > { %990 = vmax.xlane.f32.xlu0 %v989_v55  ;;  %987 = vmax.xlane.f32.xlu1 %v986_v38  ;;  %v2317_v43 = vsel %vm2189_vm14, %v2125_v7, %v2253_v50  ;;  %v2980_v50 = vld [vmem:[%s6026_s9] sm:$0xff] }
 0x314   : > { %3192 = vmatpush.msrb.mxu0 %v2981_v40  ;;  %4210 = vmatpush.msrb.mxu1 %v2981_v40 }
 0x316   : > { %3193 = vmatpush.msrb.mxu0 %v2980_v50  ;;  %4211 = vmatpush.msrb.mxu1 %v2980_v50 }
 0x317   : > { %v941_v59 = vpop.xlane.xlu0 %940  ;;  %v938_v25 = vpop.xlane.xlu1 %937 }
 0x318   : > { %vm953_vm15 = vcmp.eq.f32.partialorder %v4509_v33, %v941_v59  ;;  %vm952_vm1 = vcmp.eq.f32.partialorder %v4509_v33, %v938_v25 }
 0x319   : > { %v4760_v52 = vsel %vm953_vm15, -inf, %v4627_v16  ;;  %v4765_v49 = vsel %vm952_vm1, -inf, %v4640_v11  ;;  %v2059_v16 = vsub.f32 %v1873_v36, %v4749_v41  ;;  %v4775_v11 = vsub.f32 %v4566_v46, %v1635_v42  ;;  %v1879_v9 = vpop.f32.mrf.mxu1 }
 0x31a   : > { %3998 = vmatmul.msk.f32.gmra.mxu2 %vm787_vm2, %v3916_v48  ;;  %4052 = vmatmul.msk.f32.gmra.mxu1 %vm2386_vm11, %v2317_v43  ;;  %v995_v53 = vsel %vm787_vm2, %v4760_v52, -inf  ;;  %v992_v14 = vsel %vm787_vm2, %v4765_v49, -inf  ;;  %v3917_v3 = vsel %vm952_vm1, 1.0, %v6033_v54  ;;  %v3918_v51 = vsel %vm953_vm15, 1.0, %v6033_v54 }
 0x31b   : > { %996 = vmax.xlane.f32.xlu0 %v995_v53  ;;  %993 = vmax.xlane.f32.xlu1 %v992_v14  ;;  %v2127_v62 = vadd.f32 %v4708_v18, %v2059_v16  ;;  %v2060_v4 = vsub.f32 %v1876_v57, %v4775_v11 }
 0x31d   : > { %v2255_v0 = vmul.f32 0.2, %v2127_v62  ;;  %vm2191_vm6 = vcmp.ge.f32.partialorder %v2127_v62, 0.0  ;;  %v2128_v15 = vadd.f32 %v4708_v18, %v2060_v4 }
 0x31f   : > { %v944_v45 = vpop.xlane.xlu0 %943  ;;  %v2319_v17 = vsel %vm2191_vm6, %v2127_v62, %v2255_v0  ;;  %v2256_v44 = vmul.f32 0.2, %v2128_v15  ;;  %vm2192_vm7 = vcmp.ge.f32.partialorder %v2128_v15, 0.0 }
 0x320   : > { %vm954_vm5 = vcmp.eq.f32.partialorder %v4509_v33, %v944_v45 }
 0x321   : > { %v4785_v63 = vsel %vm954_vm5, -inf, %v4643_v22  ;;  %v4794_v22 = vsub.f32 %v4560_v6, %v1638_v2  ;;  %v1882_v58 = vpop.f32.mrf.mxu1  ;;  %v4804_v6 = vsub.f32 %v4556_v37, %v1641_v61  ;;  %v3919_v26 = vsel %vm954_vm5, 1.0, %v6033_v54 }
 0x322   : > { %3999 = vmatmul.msk.f32.gmra.mxu2 %vm787_vm2, %v3917_v3  ;;  %4053 = vmatmul.msk.f32.gmra.mxu1 %vm2386_vm11, %v2318_v13  ;;  %v998_v46 = vsel %vm787_vm2, %v4785_v63, -inf  ;;  %v2320_v56 = vsel %vm2192_vm7, %v2128_v15, %v2256_v44 }
 0x323   : > { %999 = vmax.xlane.f32.xlu0 %v998_v46  ;;  %v2061_v19 = vsub.f32 %v1879_v9, %v4794_v22  ;;  %v2062_v10 = vsub.f32 %v1882_v58, %v4804_v6 }
 0x325   : > { %v2129_v23 = vadd.f32 %v4708_v18, %v2061_v19  ;;  %v2130_v28 = vadd.f32 %v4708_v18, %v2062_v10 }
 0x327   : > { %v2257_v20 = vmul.f32 0.2, %v2129_v23  ;;  %vm2193_vm8 = vcmp.ge.f32.partialorder %v2129_v23, 0.0  ;;  %v2258_v34 = vmul.f32 0.2, %v2130_v28  ;;  %vm2194_vm0 = vcmp.ge.f32.partialorder %v2130_v28, 0.0 }
 0x329   : > { %v2321_v37 = vsel %vm2193_vm8, %v2129_v23, %v2257_v20  ;;  %v1885_v30 = vpop.f32.mrf.mxu1  ;;  %v2322_v36 = vsel %vm2194_vm0, %v2130_v28, %v2258_v34 }
 0x32a   : > { %4000 = vmatmul.msk.f32.gmra.mxu2 %vm787_vm2, %v3918_v51  ;;  %4054 = vmatmul.msk.f32.gmra.mxu1 %vm2386_vm11, %v2319_v17  ;;  %v2063_v7 = vsub.f32 %v1885_v30, %v4814_v29  ;;  %v4855_v17 = vld [vmem:[%s6025_s8] ss:$0 sm:$0xff] }
 0x32c   : > { %v2131_v35 = vadd.f32 %v4708_v18, %v2063_v7 }
 0x32e   : > { %v2259_v55 = vmul.f32 0.2, %v2131_v35  ;;  %vm2195_vm9 = vcmp.ge.f32.partialorder %v2131_v35, 0.0 }
 0x330   : > { %v2323_v38 = vsel %vm2195_vm9, %v2131_v35, %v2259_v55 }
 0x332   : > { %4001 = vmatmul.msk.f32.gmra.mxu2 %vm787_vm2, %v3919_v26  ;;  %4055 = vmatmul.msk.f32.gmra.mxu1 %vm2386_vm11, %v2320_v56 }
 0x33a   : > { %4056 = vmatmul.msk.f32.gmra.mxu1 %vm2386_vm11, %v2321_v37 }
 0x342   : > { %4057 = vmatmul.msk.f32.gmra.mxu1 %vm2386_vm11, %v2322_v36 }
 0x34a   : > { %4058 = vmatmul.msk.f32.gmra.mxu1 %vm2386_vm11, %v2323_v38 }
 0x376   : > { %v982_v39 = vpop.xlane.xlu1 %981 }
 0x377   : > { %vm1004_vm10 = vcmp.eq.f32.partialorder %v4699_v12, %v982_v39 }
 0x378   : > { %v1012_v59 = vsel %vm1004_vm10, %v4509_v33, 64.0 }
 0x379   : > { %v1020_v25 = vsel %vm787_vm2, %v1012_v59, inf }
 0x37a   : > { %1021 = vmin.xlane.f32.xlu1 %v1020_v25 }
 0x37e   : > { %v947_v42 = vpop.xlane.xlu0 %946  ;;  %v985_v43 = vpop.xlane.xlu1 %984 }
 0x37f   : > { %vm955_vm12 = vcmp.eq.f32.partialorder %v4509_v33, %v947_v42  ;;  %vm1005_vm13 = vcmp.eq.f32.partialorder %v4718_v24, %v985_v43  ;;  %v1888_v47 = vpop.f32.mrf.mxu1 }
 0x380   : > { %v3920_v48 = vsel %vm955_vm12, 1.0, %v6033_v54  ;;  %v4834_v53 = vsel %vm955_vm12, -inf, %v4665_v31  ;;  %v2064_v14 = vsub.f32 %v1888_v47, %v4695_v8  ;;  %v1013_v57 = vsel %vm1005_vm13, %v4509_v33, 64.0 }
 0x381   : > { %4002 = vmatmul.msk.f32.gmra.mxu2 %vm787_vm2, %v3920_v48  ;;  %v1001_v16 = vsel %vm787_vm2, %v4834_v53, -inf  ;;  %v1023_v60 = vsel %vm787_vm2, %v1013_v57, inf }
 0x382   : > { %v2132_v45 = vadd.f32 %v4708_v18, %v2064_v14  ;;  %1002 = vmax.xlane.f32.xlu0 %v1001_v16  ;;  %1024 = vmin.xlane.f32.xlu1 %v1023_v60 }
 0x384   : > { %vm2196_vm14 = vcmp.ge.f32.partialorder %v2132_v45, 0.0  ;;  %v2260_v62 = vmul.f32 0.2, %v2132_v45 }
 0x386   : > { %v991_v3 = vpop.xlane.xlu0 %990  ;;  %v988_v31 = vpop.xlane.xlu1 %987  ;;  %v2324_v13 = vsel %vm2196_vm14, %v2132_v45, %v2260_v62 }
 0x387   : > { %vm1007_vm15 = vcmp.eq.f32.partialorder %v4735_v32, %v991_v3  ;;  %vm1006_vm1 = vcmp.eq.f32.partialorder %v4739_v5, %v988_v31  ;;  %v1891_v2 = vpop.f32.mrf.mxu1  ;;  %4059 = vmatmul.msk.f32.gmra.mxu1 %vm2386_vm11, %v2324_v13 }
 0x388   : > { %v2065_v46 = vsub.f32 %v1891_v2, %v4711_v21  ;;  %v1015_v4 = vsel %vm1007_vm15, %v4509_v33, 64.0  ;;  %v1014_v0 = vsel %vm1006_vm1, %v4509_v33, 64.0 }
 0x389   : > { %v1029_v9 = vsel %vm787_vm2, %v1015_v4, inf  ;;  %v1026_v15 = vsel %vm787_vm2, %v1014_v0, inf }
 0x38a   : > { %v2133_v51 = vadd.f32 %v4708_v18, %v2065_v46  ;;  %1030 = vmin.xlane.f32.xlu0 %v1029_v9  ;;  %1027 = vmin.xlane.f32.xlu1 %v1026_v15 }
 0x38c   : > { %vm2197_vm4 = vcmp.ge.f32.partialorder %v2133_v51, 0.0  ;;  %v2261_v61 = vmul.f32 0.2, %v2133_v51 }
 0x38e   : > { %v997_v19 = vpop.xlane.xlu0 %996  ;;  %v994_v44 = vpop.xlane.xlu1 %993  ;;  %v2325_v58 = vsel %vm2197_vm4, %v2133_v51, %v2261_v61 }
 0x38f   : > { %vm1009_vm5 = vcmp.eq.f32.partialorder %v4760_v52, %v997_v19  ;;  %vm1008_vm6 = vcmp.eq.f32.partialorder %v4765_v49, %v994_v44  ;;  %v2596_v23 = vpop.f32.mrf.mxu1  ;;  %4060 = vmatmul.msk.f32.gmra.mxu1 %vm2386_vm11, %v2325_v58 }
 0x390   : > { %v2597_v26 = vadd.f32 %v4855_v17, %v2596_v23  ;;  %v1017_v56 = vsel %vm1009_vm5, %v4509_v33, 64.0  ;;  %v1016_v10 = vsel %vm1008_vm6, %v4509_v33, 64.0 }
 0x391   : > { %v1035_v20 = vsel %vm787_vm2, %v1017_v56, inf  ;;  %v1032_v27 = vsel %vm787_vm2, %v1016_v10, inf }
 0x392   : > { %v2852_v28 = vmul.f32 0.2, %v2597_v26  ;;  %1036 = vmin.xlane.f32.xlu0 %v1035_v20  ;;  %1033 = vmin.xlane.f32.xlu1 %v1032_v27  ;;  %vm2788_vm7 = vcmp.ge.f32.partialorder %v2597_v26, 0.0 }
 0x394   : > { %v2916_v37 = vsel %vm2788_vm7, %v2597_v26, %v2852_v28 }
 0x395   : > { %v1894_v30 = vpop.f32.mrf.mxu2  ;;  %4115 = vmatmul.msk.f32.vlgmr.msrb.gmra.mxu0 %vm2386_vm11, %v2916_v37 }
 0x396   : > { %v2066_v7 = vsub.f32 %v1894_v30, %v4728_v1  ;;  %v1000_v34 = vpop.xlane.xlu0 %999 }
 0x397   : > { %vm1010_vm8 = vcmp.eq.f32.partialorder %v4785_v63, %v1000_v34  ;;  %v2599_v35 = vpop.f32.mrf.mxu1 }
 0x398   : > { %v2134_v36 = vadd.f32 %v4708_v18, %v2066_v7  ;;  %v2600_v55 = vadd.f32 %v4855_v17, %v2599_v35  ;;  %v1018_v38 = vsel %vm1010_vm8, %v4509_v33, 64.0 }
 0x399   : > { %v1038_v40 = vsel %vm787_vm2, %v1018_v38, inf }
 0x39a   : > { %1039 = vmin.xlane.f32.xlu0 %v1038_v40  ;;  %vm2198_vm0 = vcmp.ge.f32.partialorder %v2134_v36, 0.0  ;;  %v2262_v50 = vmul.f32 0.2, %v2134_v36  ;;  %vm2789_vm9 = vcmp.ge.f32.partialorder %v2600_v55, 0.0  ;;  %v2853_v39 = vmul.f32 0.2, %v2600_v55 }
 0x39c   : > { %v2326_v59 = vsel %vm2198_vm0, %v2134_v36, %v2262_v50  ;;  %v2917_v25 = vsel %vm2789_vm9, %v2600_v55, %v2853_v39 }
 0x39d   : > { %v1897_v42 = vpop.f32.mrf.mxu2  ;;  %4061 = vmatmul.msk.f32.vlgmr.msrb.gmra.mxu3 %vm2386_vm11, %v2326_v59  ;;  %4116 = vmatmul.msk.f32.gmra.mxu0 %vm2386_vm11, %v2917_v25 }
 0x39e   : > { %v2067_v43 = vsub.f32 %v1897_v42, %v4749_v41 }
 0x39f   : > { %v2602_v47 = vpop.f32.mrf.mxu1 }
 0x3a0   : > { %v2135_v48 = vadd.f32 %v4708_v18, %v2067_v43  ;;  %v2603_v14 = vadd.f32 %v4855_v17, %v2602_v47 }
 0x3a2   : > { %vm2199_vm10 = vcmp.ge.f32.partialorder %v2135_v48, 0.0  ;;  %v2263_v57 = vmul.f32 0.2, %v2135_v48  ;;  %vm2790_vm12 = vcmp.ge.f32.partialorder %v2603_v14, 0.0  ;;  %v2854_v16 = vmul.f32 0.2, %v2603_v14 }
 0x3a4   : > { %v2327_v60 = vsel %vm2199_vm10, %v2135_v48, %v2263_v57  ;;  %v2918_v45 = vsel %vm2790_vm12, %v2603_v14, %v2854_v16 }
 0x3a5   : > { %v1900_v62 = vpop.f32.mrf.mxu2  ;;  %4062 = vmatmul.msk.f32.gmra.mxu3 %vm2386_vm11, %v2327_v60  ;;  %4117 = vmatmul.msk.f32.gmra.mxu0 %vm2386_vm11, %v2918_v45 }
 0x3a6   : > { %v2068_v3 = vsub.f32 %v1900_v62, %v4775_v11 }
 0x3a7   : > { %v2605_v31 = vpop.f32.mrf.mxu1 }
 0x3a8   : > { %v2136_v13 = vadd.f32 %v4708_v18, %v2068_v3  ;;  %v2606_v2 = vadd.f32 %v4855_v17, %v2605_v31 }
 0x3aa   : > { %vm2200_vm13 = vcmp.ge.f32.partialorder %v2136_v13, 0.0  ;;  %v2264_v46 = vmul.f32 0.2, %v2136_v13  ;;  %vm2791_vm14 = vcmp.ge.f32.partialorder %v2606_v2, 0.0  ;;  %v2855_v4 = vmul.f32 0.2, %v2606_v2 }
 0x3ac   : > { %v2328_v0 = vsel %vm2200_vm13, %v2136_v13, %v2264_v46  ;;  %v2919_v9 = vsel %vm2791_vm14, %v2606_v2, %v2855_v4 }
 0x3ad   : > { %v1903_v15 = vpop.f32.mrf.mxu2  ;;  %4063 = vmatmul.msk.f32.gmra.mxu3 %vm2386_vm11, %v2328_v0  ;;  %4118 = vmatmul.msk.f32.gmra.mxu0 %vm2386_vm11, %v2919_v9 }
 0x3ae   : > { %v2069_v51 = vsub.f32 %v1903_v15, %v4794_v22 }
 0x3af   : > { %v2608_v61 = vpop.f32.mrf.mxu1 }
 0x3b0   : > { %v2137_v19 = vadd.f32 %v4708_v18, %v2069_v51  ;;  %v2609_v44 = vadd.f32 %v4855_v17, %v2608_v61 }
 0x3b2   : > { %vm2201_vm15 = vcmp.ge.f32.partialorder %v2137_v19, 0.0  ;;  %v2265_v58 = vmul.f32 0.2, %v2137_v19  ;;  %vm2792_vm1 = vcmp.ge.f32.partialorder %v2609_v44, 0.0  ;;  %v2856_v23 = vmul.f32 0.2, %v2609_v44 }
 0x3b4   : > { %v2329_v26 = vsel %vm2201_vm15, %v2137_v19, %v2265_v58  ;;  %v2920_v56 = vsel %vm2792_vm1, %v2609_v44, %v2856_v23 }
 0x3b5   : > { %v1906_v10 = vpop.f32.mrf.mxu2  ;;  %4064 = vmatmul.msk.f32.gmra.mxu3 %vm2386_vm11, %v2329_v26  ;;  %4119 = vmatmul.msk.f32.gmra.mxu0 %vm2386_vm11, %v2920_v56 }
 0x3b6   : > { %v2070_v20 = vsub.f32 %v1906_v10, %v4804_v6 }
 0x3b7   : > { %v2611_v27 = vpop.f32.mrf.mxu1 }
 0x3b8   : > { %v2138_v28 = vadd.f32 %v4708_v18, %v2070_v20  ;;  %v2612_v37 = vadd.f32 %v4855_v17, %v2611_v27 }
 0x3ba   : > { %vm2202_vm4 = vcmp.ge.f32.partialorder %v2138_v28, 0.0  ;;  %v2266_v30 = vmul.f32 0.2, %v2138_v28  ;;  %vm2793_vm5 = vcmp.ge.f32.partialorder %v2612_v37, 0.0  ;;  %v2857_v7 = vmul.f32 0.2, %v2612_v37 }
 0x3bc   : > { %v2330_v34 = vsel %vm2202_vm4, %v2138_v28, %v2266_v30  ;;  %v2921_v35 = vsel %vm2793_vm5, %v2612_v37, %v2857_v7 }
 0x3bd   : > { %4065 = vmatmul.msk.f32.gmra.mxu3 %vm2386_vm11, %v2330_v34  ;;  %4120 = vmatmul.msk.f32.gmra.mxu0 %vm2386_vm11, %v2921_v35 }
 0x3bf   : > { %v2614_v36 = vpop.f32.mrf.mxu1 }
 0x3c0   : > { %v2615_v55 = vadd.f32 %v4855_v17, %v2614_v36 }
 0x3c2   : > { %vm2794_vm6 = vcmp.ge.f32.partialorder %v2615_v55, 0.0  ;;  %v2858_v38 = vmul.f32 0.2, %v2615_v55 }
 0x3c4   : > { %v2922_v40 = vsel %vm2794_vm6, %v2615_v55, %v2858_v38 }
 0x3c5   : > { %4121 = vmatmul.msk.f32.gmra.mxu0 %vm2386_vm11, %v2922_v40 }
 0x3c7   : > { %v2617_v50 = vpop.f32.mrf.mxu1 }
 0x3c8   : > { %v2618_v39 = vadd.f32 %v4855_v17, %v2617_v50 }
 0x3ca   : > { %vm2795_vm7 = vcmp.ge.f32.partialorder %v2618_v39, 0.0  ;;  %v2859_v59 = vmul.f32 0.2, %v2618_v39 }
 0x3cc   : > { %v2923_v25 = vsel %vm2795_vm7, %v2618_v39, %v2859_v59 }
 0x3cd   : > { %4122 = vmatmul.msk.f32.gmra.mxu0 %vm2386_vm11, %v2923_v25 }
 0x3ed   : > { %v1022_v42 = vpop.xlane.xlu1 %1021 }
 0x3ee   : > { %vm1044_vm8 = vcmp.eq.f32.partialorder %v4509_v33, %v1022_v42 }
 0x3ef   : > { %v3921_v43 = vsel %vm1044_vm8, 1.0, %v6033_v54  ;;  %v4901_v47 = vsel %vm1044_vm8, -inf, %v4699_v12 }
 0x3f0   : > { %4003 = vmatmul.msk.f32.gmra.mxu2 %vm787_vm2, %v3921_v43  ;;  %v1076_v48 = vsel %vm787_vm2, %v4901_v47, -inf }
 0x3f1   : > { %1077 = vmax.xlane.f32.xlu1 %v1076_v48 }
 0x3f5   : > { %v1003_v14 = vpop.xlane.xlu0 %1002  ;;  %v1025_v57 = vpop.xlane.xlu1 %1024 }
 0x3f6   : > { %vm1011_vm0 = vcmp.eq.f32.partialorder %v4834_v53, %v1003_v14  ;;  %vm1045_vm9 = vcmp.eq.f32.partialorder %v4509_v33, %v1025_v57 }
 0x3f7   : > { %v3922_v16 = vsel %vm1045_vm9, 1.0, %v6033_v54  ;;  %v4910_v60 = vsel %vm1045_vm9, -inf, %v4718_v24  ;;  %v1019_v12 = vsel %vm1011_vm0, %v4509_v33, 64.0 }
 0x3f8   : > { %4004 = vmatmul.msk.f32.gmra.mxu2 %vm787_vm2, %v3922_v16  ;;  %v1041_v45 = vsel %vm787_vm2, %v1019_v12, inf  ;;  %v1079_v62 = vsel %vm787_vm2, %v4910_v60, -inf }
 0x3f9   : > { %1042 = vmin.xlane.f32.xlu0 %v1041_v45  ;;  %1080 = vmax.xlane.f32.xlu1 %v1079_v62 }
 0x3fd   : > { %v1031_v3 = vpop.xlane.xlu0 %1030  ;;  %v1028_v31 = vpop.xlane.xlu1 %1027 }
 0x3fe   : > { %vm1047_vm10 = vcmp.eq.f32.partialorder %v4509_v33, %v1031_v3  ;;  %vm1046_vm12 = vcmp.eq.f32.partialorder %v4509_v33, %v1028_v31 }
 0x3ff   : > { %v4922_v24 = vsel %vm1047_vm10, -inf, %v4735_v32  ;;  %v3923_v13 = vsel %vm1046_vm12, 1.0, %v6033_v54  ;;  %v4926_v2 = vsel %vm1046_vm12, -inf, %v4739_v5  ;;  %v3924_v5 = vsel %vm1047_vm10, 1.0, %v6033_v54 }
 0x400   : > { %4005 = vmatmul.msk.f32.gmra.mxu2 %vm787_vm2, %v3923_v13  ;;  %v1085_v46 = vsel %vm787_vm2, %v4922_v24, -inf  ;;  %v1082_v4 = vsel %vm787_vm2, %v4926_v2, -inf }
 0x401   : > { %1086 = vmax.xlane.f32.xlu0 %v1085_v46  ;;  %1083 = vmax.xlane.f32.xlu1 %v1082_v4 }
 0x404   : > { %v1909_v0 = vpop.f32.mrf.mxu2  ;;  %v2620_v9 = vpop.f32.mrf.mxu1 }
 0x405   : > { %v2071_v32 = vsub.f32 %v1909_v0, %v4814_v29  ;;  %v2621_v15 = vadd.f32 %v4855_v17, %v2620_v9  ;;  %v1037_v51 = vpop.xlane.xlu0 %1036  ;;  %v1034_v61 = vpop.xlane.xlu1 %1033 }
 0x406   : > { %vm1049_vm13 = vcmp.eq.f32.partialorder %v4509_v33, %v1037_v51  ;;  %vm1048_vm14 = vcmp.eq.f32.partialorder %v4509_v33, %v1034_v61 }
 0x407   : > { %v2139_v19 = vadd.f32 %v4708_v18, %v2071_v32  ;;  %v4944_v44 = vsel %vm1049_vm13, -inf, %v4760_v52  ;;  %v4949_v58 = vsel %vm1048_vm14, -inf, %v4765_v49  ;;  %vm2796_vm15 = vcmp.ge.f32.partialorder %v2621_v15, 0.0 }
 0x408   : > { %4006 = vmatmul.msk.f32.gmra.mxu2 %vm787_vm2, %v3924_v5  ;;  %v1091_v23 = vsel %vm787_vm2, %v4944_v44, -inf  ;;  %v2860_v26 = vmul.f32 0.2, %v2621_v15  ;;  %v1088_v56 = vsel %vm787_vm2, %v4949_v58, -inf  ;;  %v3925_v37 = vsel %vm1048_vm14, 1.0, %v6033_v54 }
 0x409   : > { %1092 = vmax.xlane.f32.xlu2 %v1091_v23  ;;  %vm2203_vm1 = vcmp.ge.f32.partialorder %v2139_v19, 0.0  ;;  %v2267_v10 = vmul.f32 0.2, %v2139_v19  ;;  %1089 = vmax.xlane.f32.xlu1 %v1088_v56  ;;  %v3926_v36 = vsel %vm1049_vm13, 1.0, %v6033_v54 }
 0x40a   : > { %v2924_v52 = vsel %vm2796_vm15, %v2621_v15, %v2860_v26 }
 0x40b   : > { %4123 = vmatmul.msk.f32.gmra.mxu0 %vm2386_vm11, %v2924_v52  ;;  %v2331_v20 = vsel %vm2203_vm1, %v2139_v19, %v2267_v10 }
 0x40c   : > { %v2623_v49 = vpop.f32.mrf.mxu1  ;;  %4066 = vmatmul.msk.f32.gmra.mxu3 %vm2386_vm11, %v2331_v20 }
 0x40d   : > { %v2624_v27 = vadd.f32 %v4855_v17, %v2623_v49  ;;  %v1040_v28 = vpop.xlane.xlu0 %1039 }
 0x40e   : > { %vm1050_vm4 = vcmp.eq.f32.partialorder %v4509_v33, %v1040_v28 }
 0x40f   : > { %v4964_v30 = vsel %vm1050_vm4, -inf, %v4785_v63  ;;  %vm2797_vm5 = vcmp.ge.f32.partialorder %v2624_v27, 0.0  ;;  %v2861_v7 = vmul.f32 0.2, %v2624_v27  ;;  %v3927_v63 = vsel %vm1050_vm4, 1.0, %v6033_v54 }
 0x410   : > { %4007 = vmatmul.msk.f32.gmra.mxu2 %vm787_vm2, %v3925_v37  ;;  %v1094_v34 = vsel %vm787_vm2, %v4964_v30, -inf }
 0x411   : > { %v2925_v35 = vsel %vm2797_vm5, %v2624_v27, %v2861_v7  ;;  %1095 = vmax.xlane.f32.xlu1 %v1094_v34 }
 0x413   : > { %4124 = vmatmul.msk.f32.gmra.mxu0 %vm2386_vm11, %v2925_v35 }
 0x418   : > { %4008 = vmatmul.msk.f32.gmra.mxu2 %vm787_vm2, %v3926_v36 }
 0x420   : > { %4009 = vmatmul.msk.f32.gmra.mxu2 %vm787_vm2, %v3927_v63  ;;  %v2626_v55 = vpop.f32.mrf.mxu3 }
 0x421   : > { %v2627_v38 = vadd.f32 %v4855_v17, %v2626_v55 }
 0x423   : > { %vm2798_vm6 = vcmp.ge.f32.partialorder %v2627_v38, 0.0  ;;  %v2862_v40 = vmul.f32 0.2, %v2627_v38 }
 0x425   : > { %v2926_v50 = vsel %vm2798_vm6, %v2627_v38, %v2862_v40 }
 0x426   : > { %4125 = vmatmul.msk.f32.gmra.mxu0 %vm2386_vm11, %v2926_v50 }
 0x428   : > { %v2629_v39 = vpop.f32.mrf.mxu3 }
 0x429   : > { %v2630_v59 = vadd.f32 %v4855_v17, %v2629_v39 }
 0x42b   : > { %vm2799_vm7 = vcmp.ge.f32.partialorder %v2630_v59, 0.0  ;;  %v2863_v25 = vmul.f32 0.2, %v2630_v59 }
 0x42d   : > { %v2927_v42 = vsel %vm2799_vm7, %v2630_v59, %v2863_v25 }
 0x42e   : > { %4126 = vmatmul.msk.f32.gmra.mxu0 %vm2386_vm11, %v2927_v42 }
 0x430   : > { %v2632_v43 = vpop.f32.mrf.mxu3 }
 0x431   : > { %v2633_v48 = vadd.f32 %v4855_v17, %v2632_v43 }
 0x433   : > { %vm2800_vm8 = vcmp.ge.f32.partialorder %v2633_v48, 0.0  ;;  %v2864_v14 = vmul.f32 0.2, %v2633_v48 }
 0x435   : > { %v2928_v57 = vsel %vm2800_vm8, %v2633_v48, %v2864_v14 }
 0x436   : > { %4127 = vmatmul.msk.f32.gmra.mxu0 %vm2386_vm11, %v2928_v57 }
 0x438   : > { %v2635_v16 = vpop.f32.mrf.mxu3 }
 0x439   : > { %v2636_v12 = vadd.f32 %v4855_v17, %v2635_v16 }
 0x43b   : > { %vm2801_vm0 = vcmp.ge.f32.partialorder %v2636_v12, 0.0  ;;  %v2865_v45 = vmul.f32 0.2, %v2636_v12 }
 0x43d   : > { %v2929_v62 = vsel %vm2801_vm0, %v2636_v12, %v2865_v45 }
 0x43e   : > { %4128 = vmatmul.msk.f32.gmra.mxu0 %vm2386_vm11, %v2929_v62 }
 0x440   : > { %v2638_v3 = vpop.f32.mrf.mxu3 }
 0x441   : > { %v2639_v31 = vadd.f32 %v4855_v17, %v2638_v3 }
 0x443   : > { %vm2802_vm9 = vcmp.ge.f32.partialorder %v2639_v31, 0.0  ;;  %v2866_v13 = vmul.f32 0.2, %v2639_v31 }
 0x445   : > { %v2930_v46 = vsel %vm2802_vm9, %v2639_v31, %v2866_v13 }
 0x446   : > { %4129 = vmatmul.msk.f32.gmra.mxu0 %vm2386_vm11, %v2930_v46 }
 0x464   : > { %v1078_v4 = vpop.xlane.xlu1 %1077 }
 0x465   : > { %vm1100_vm10 = vcmp.eq.f32.partialorder %v4901_v47, %v1078_v4 }
 0x466   : > { %v1108_v0 = vsel %vm1100_vm10, %v4509_v33, 64.0 }
 0x467   : > { %v1116_v9 = vsel %vm787_vm2, %v1108_v0, inf }
 0x468   : > { %1117 = vmin.xlane.f32.xlu0 %v1116_v9 }
 0x46c   : > { %v1043_v32 = vpop.xlane.xlu0 %1042  ;;  %v1081_v15 = vpop.xlane.xlu1 %1080 }
 0x46d   : > { %vm1051_vm12 = vcmp.eq.f32.partialorder %v4509_v33, %v1043_v32  ;;  %vm1101_vm13 = vcmp.eq.f32.partialorder %v4910_v60, %v1081_v15 }
 0x46e   : > { %v3928_v51 = vsel %vm1051_vm12, 1.0, %v6033_v54  ;;  %v4993_v61 = vsel %vm1051_vm12, -inf, %v4834_v53  ;;  %v1109_v5 = vsel %vm1101_vm13, %v4509_v33, 64.0 }
 0x46f   : > { %4010 = vmatmul.msk.f32.gmra.mxu2 %vm787_vm2, %v3928_v51  ;;  %v1097_v19 = vsel %vm787_vm2, %v4993_v61, -inf  ;;  %v1119_v23 = vsel %vm787_vm2, %v1109_v5, inf }
 0x470   : > { %1098 = vmax.xlane.f32.xlu0 %v1097_v19  ;;  %1120 = vmin.xlane.f32.xlu2 %v1119_v23 }
 0x473   : > { %v1912_v26 = vpop.f32.mrf.mxu2 }
 0x474   : > { %v2072_v56 = vsub.f32 %v1912_v26, %v4695_v8  ;;  %v1087_v10 = vpop.xlane.xlu0 %1086  ;;  %v1084_v52 = vpop.xlane.xlu1 %1083 }
 0x475   : > { %vm1103_vm14 = vcmp.eq.f32.partialorder %v4922_v24, %v1087_v10  ;;  %vm1102_vm15 = vcmp.eq.f32.partialorder %v4926_v2, %v1084_v52 }
 0x476   : > { %v2140_v53 = vadd.f32 %v4708_v18, %v2072_v56  ;;  %v1111_v20 = vsel %vm1103_vm14, %v4509_v33, 64.0  ;;  %v1110_v49 = vsel %vm1102_vm15, %v4509_v33, 64.0 }
 0x477   : > { %v1125_v27 = vsel %vm787_vm2, %v1111_v20, inf  ;;  %v1122_v28 = vsel %vm787_vm2, %v1110_v49, inf }
 0x478   : > { %1126 = vmin.xlane.f32.xlu2 %v1125_v27  ;;  %1123 = vmin.xlane.f32.xlu1 %v1122_v28  ;;  %vm2204_vm1 = vcmp.ge.f32.partialorder %v2140_v53, 0.0  ;;  %v2268_v37 = vmul.f32 0.2, %v2140_v53 }
 0x47a   : > { %v2332_v7 = vsel %vm2204_vm1, %v2140_v53, %v2268_v37 }
 0x47b   : > { %v1915_v34 = vpop.f32.mrf.mxu2  ;;  %4067 = vmatmul.msk.f32.gmra.mxu3 %vm2386_vm11, %v2332_v7 }
 0x47c   : > { %v2073_v35 = vsub.f32 %v1915_v34, %v4711_v21  ;;  %v1093_v36 = vpop.xlane.xlu2 %1092  ;;  %v1090_v63 = vpop.xlane.xlu1 %1089 }
 0x47d   : > { %vm1105_vm4 = vcmp.eq.f32.partialorder %v4944_v44, %v1093_v36  ;;  %vm1104_vm5 = vcmp.eq.f32.partialorder %v4949_v58, %v1090_v63 }
 0x47e   : > { %v2141_v55 = vadd.f32 %v4708_v18, %v2073_v35  ;;  %v1113_v38 = vsel %vm1105_vm4, %v4509_v33, 64.0  ;;  %v1112_v50 = vsel %vm1104_vm5, %v4509_v33, 64.0 }
 0x47f   : > { %v1131_v40 = vsel %vm787_vm2, %v1113_v38, inf  ;;  %v1128_v39 = vsel %vm787_vm2, %v1112_v50, inf }
 0x480   : > { %1132 = vmin.xlane.f32.xlu1 %v1131_v40  ;;  %vm2205_vm6 = vcmp.ge.f32.partialorder %v2141_v55, 0.0  ;;  %v2269_v59 = vmul.f32 0.2, %v2141_v55  ;;  %1129 = vmin.xlane.f32.xlu0 %v1128_v39 }
 0x482   : > { %v2333_v25 = vsel %vm2205_vm6, %v2141_v55, %v2269_v59 }
 0x483   : > { %v1918_v42 = vpop.f32.mrf.mxu2  ;;  %4068 = vmatmul.msk.f32.gmra.mxu3 %vm2386_vm11, %v2333_v25 }
 0x484   : > { %v2074_v43 = vsub.f32 %v1918_v42, %v4728_v1  ;;  %v1096_v48 = vpop.xlane.xlu1 %1095 }
 0x485   : > { %vm1106_vm7 = vcmp.eq.f32.partialorder %v4964_v30, %v1096_v48 }
 0x486   : > { %v2142_v14 = vadd.f32 %v4708_v18, %v2074_v43  ;;  %v1114_v57 = vsel %vm1106_vm7, %v4509_v33, 64.0 }
 0x487   : > { %v1134_v16 = vsel %vm787_vm2, %v1114_v57, inf }
 0x488   : > { %vm2206_vm8 = vcmp.ge.f32.partialorder %v2142_v14, 0.0  ;;  %v2270_v12 = vmul.f32 0.2, %v2142_v14  ;;  %1135 = vmin.xlane.f32.xlu0 %v1134_v16 }
 0x48a   : > { %v2334_v45 = vsel %vm2206_vm8, %v2142_v14, %v2270_v12 }
 0x48b   : > { %v1921_v62 = vpop.f32.mrf.mxu2  ;;  %4069 = vmatmul.msk.f32.gmra.mxu3 %vm2386_vm11, %v2334_v45 }
 0x48c   : > { %v2075_v3 = vsub.f32 %v1921_v62, %v4749_v41 }
 0x48e   : > { %v2143_v31 = vadd.f32 %v4708_v18, %v2075_v3 }
 0x48f   : > { %v2641_v13 = vpop.f32.mrf.mxu3 }
 0x490   : > { %v2642_v46 = vadd.f32 %v4855_v17, %v2641_v13  ;;  %vm2207_vm0 = vcmp.ge.f32.partialorder %v2143_v31, 0.0  ;;  %v2271_v4 = vmul.f32 0.2, %v2143_v31 }
 0x492   : > { %v2335_v0 = vsel %vm2207_vm0, %v2143_v31, %v2271_v4  ;;  %vm2803_vm9 = vcmp.ge.f32.partialorder %v2642_v46, 0.0  ;;  %v2867_v9 = vmul.f32 0.2, %v2642_v46 }
 0x493   : > { %v1924_v32 = vpop.f32.mrf.mxu2  ;;  %4070 = vmatmul.msk.f32.gmra.mxu3 %vm2386_vm11, %v2335_v0 }
 0x494   : > { %v2076_v15 = vsub.f32 %v1924_v32, %v4775_v11  ;;  %v2931_v51 = vsel %vm2803_vm9, %v2642_v46, %v2867_v9 }
 0x495   : > { %4130 = vmatmul.msk.f32.gmra.mxu0 %vm2386_vm11, %v2931_v51 }
 0x496   : > { %v2144_v5 = vadd.f32 %v4708_v18, %v2076_v15 }
 0x498   : > { %vm2208_vm10 = vcmp.ge.f32.partialorder %v2144_v5, 0.0  ;;  %v2272_v19 = vmul.f32 0.2, %v2144_v5 }
 0x49a   : > { %v2336_v23 = vsel %vm2208_vm10, %v2144_v5, %v2272_v19 }
 0x49b   : > { %v1927_v26 = vpop.f32.mrf.mxu2  ;;  %4071 = vmatmul.msk.f32.gmra.mxu3 %vm2386_vm11, %v2336_v23 }
 0x49c   : > { %v2077_v56 = vsub.f32 %v1927_v26, %v4794_v22 }
 0x49e   : > { %v2145_v10 = vadd.f32 %v4708_v18, %v2077_v56 }
 0x4a0   : > { %vm2209_vm12 = vcmp.ge.f32.partialorder %v2145_v10, 0.0  ;;  %v2273_v52 = vmul.f32 0.2, %v2145_v10 }
 0x4a2   : > { %v2337_v53 = vsel %vm2209_vm12, %v2145_v10, %v2273_v52 }
 0x4a3   : > { %v1930_v20 = vpop.f32.mrf.mxu2  ;;  %4072 = vmatmul.msk.f32.gmra.mxu3 %vm2386_vm11, %v2337_v53 }
 0x4a4   : > { %v2078_v49 = vsub.f32 %v1930_v20, %v4804_v6 }
 0x4a6   : > { %v2146_v27 = vadd.f32 %v4708_v18, %v2078_v49 }
 0x4a8   : > { %vm2210_vm13 = vcmp.ge.f32.partialorder %v2146_v27, 0.0  ;;  %v2274_v28 = vmul.f32 0.2, %v2146_v27 }
 0x4aa   : > { %v2338_v37 = vsel %vm2210_vm13, %v2146_v27, %v2274_v28 }
 0x4ab   : > { %4073 = vmatmul.msk.f32.gmra.mxu3 %vm2386_vm11, %v2338_v37 }
 0x4db   : > { %v1118_v7 = vpop.xlane.xlu0 %1117 }
 0x4dc   : > { %vm1140_vm14 = vcmp.eq.f32.partialorder %v4509_v33, %v1118_v7 }
 0x4dd   : > { %v3929_v34 = vsel %vm1140_vm14, 1.0, %v6033_v54  ;;  %v5041_v35 = vsel %vm1140_vm14, -inf, %v4901_v47 }
 0x4de   : > { %4011 = vmatmul.msk.f32.gmra.mxu2 %vm787_vm2, %v3929_v34  ;;  %v1172_v36 = vsel %vm787_vm2, %v5041_v35, -inf }
 0x4df   : > { %1173 = vmax.xlane.f32.xlu2 %v1172_v36 }
 0x4e3   : > { %v1099_v63 = vpop.xlane.xlu0 %1098  ;;  %v1121_v55 = vpop.xlane.xlu2 %1120 }
 0x4e4   : > { %vm1107_vm15 = vcmp.eq.f32.partialorder %v4993_v61, %v1099_v63  ;;  %vm1141_vm1 = vcmp.eq.f32.partialorder %v4509_v33, %v1121_v55 }
 0x4e5   : > { %v3930_v38 = vsel %vm1141_vm1, 1.0, %v6033_v54  ;;  %v5050_v40 = vsel %vm1141_vm1, -inf, %v4910_v60  ;;  %v1115_v47 = vsel %vm1107_vm15, %v4509_v33, 64.0 }
 0x4e6   : > { %4012 = vmatmul.msk.f32.gmra.mxu2 %vm787_vm2, %v3930_v38  ;;  %v1137_v50 = vsel %vm787_vm2, %v1115_v47, inf  ;;  %v1175_v39 = vsel %vm787_vm2, %v5050_v40, -inf }
 0x4e7   : > { %1138 = vmin.xlane.f32.xlu2 %v1137_v50  ;;  %1176 = vmax.xlane.f32.xlu1 %v1175_v39 }
 0x4eb   : > { %v1127_v59 = vpop.xlane.xlu2 %1126  ;;  %v1124_v25 = vpop.xlane.xlu1 %1123 }
 0x4ec   : > { %vm1143_vm4 = vcmp.eq.f32.partialorder %v4509_v33, %v1127_v59  ;;  %vm1142_vm5 = vcmp.eq.f32.partialorder %v4509_v33, %v1124_v25 }
 0x4ed   : > { %v5060_v60 = vsel %vm1143_vm4, -inf, %v4922_v24  ;;  %v3931_v42 = vsel %vm1142_vm5, 1.0, %v6033_v54  ;;  %v5064_v43 = vsel %vm1142_vm5, -inf, %v4926_v2  ;;  %v3932_v2 = vsel %vm1143_vm4, 1.0, %v6033_v54 }
 0x4ee   : > { %4013 = vmatmul.msk.f32.gmra.mxu2 %vm787_vm2, %v3931_v42  ;;  %v1181_v48 = vsel %vm787_vm2, %v5060_v60, -inf  ;;  %v1178_v14 = vsel %vm787_vm2, %v5064_v43, -inf }
 0x4ef   : > { %1182 = vmax.xlane.f32.xlu1 %v1181_v48  ;;  %1179 = vmax.xlane.f32.xlu0 %v1178_v14 }
 0x4f2   : > { %v1933_v57 = vpop.f32.mrf.mxu2 }
 0x4f3   : > { %v2079_v16 = vsub.f32 %v1933_v57, %v4814_v29  ;;  %v1133_v24 = vpop.xlane.xlu1 %1132  ;;  %v1130_v12 = vpop.xlane.xlu0 %1129 }
 0x4f4   : > { %vm1145_vm6 = vcmp.eq.f32.partialorder %v4509_v33, %v1133_v24  ;;  %vm1144_vm7 = vcmp.eq.f32.partialorder %v4509_v33, %v1130_v12 }
 0x4f5   : > { %v2147_v45 = vadd.f32 %v4708_v18, %v2079_v16  ;;  %v5079_v62 = vsel %vm1145_vm6, -inf, %v4944_v44  ;;  %v5082_v3 = vsel %vm1144_vm7, -inf, %v4949_v58  ;;  %v3933_v4 = vsel %vm1144_vm7, 1.0, %v6033_v54 }
 0x4f6   : > { %4014 = vmatmul.msk.f32.gmra.mxu2 %vm787_vm2, %v3932_v2  ;;  %v1187_v31 = vsel %vm787_vm2, %v5079_v62, -inf  ;;  %v1184_v13 = vsel %vm787_vm2, %v5082_v3, -inf  ;;  %v3934_v5 = vsel %vm1145_vm6, 1.0, %v6033_v54 }
 0x4f7   : > { %1188 = vmax.xlane.f32.xlu0 %v1187_v31  ;;  %vm2211_vm8 = vcmp.ge.f32.partialorder %v2147_v45, 0.0  ;;  %v2275_v18 = vmul.f32 0.2, %v2147_v45  ;;  %1185 = vmax.xlane.f32.xlu2 %v1184_v13 }
 0x4f9   : > { %v2339_v46 = vsel %vm2211_vm8, %v2147_v45, %v2275_v18 }
 0x4fa   : > { %4074 = vmatmul.msk.f32.gmra.mxu3 %vm2386_vm11, %v2339_v46 }
 0x4fb   : > { %v1136_v44 = vpop.xlane.xlu0 %1135 }
 0x4fc   : > { %vm1146_vm0 = vcmp.eq.f32.partialorder %v4509_v33, %v1136_v44 }
 0x4fd   : > { %v5095_v58 = vsel %vm1146_vm0, -inf, %v4964_v30  ;;  %v3935_v56 = vsel %vm1146_vm0, 1.0, %v6033_v54 }
 0x4fe   : > { %4015 = vmatmul.msk.f32.gmra.mxu2 %vm787_vm2, %v3933_v4  ;;  %v2644_v0 = vpop.f32.mrf.mxu3  ;;  %v1190_v32 = vsel %vm787_vm2, %v5095_v58, -inf }
 0x4ff   : > { %v2645_v9 = vadd.f32 %v4855_v17, %v2644_v0  ;;  %1191 = vmax.xlane.f32.xlu2 %v1190_v32 }
 0x501   : > { %v2868_v15 = vmul.f32 0.2, %v2645_v9  ;;  %vm2804_vm9 = vcmp.ge.f32.partialorder %v2645_v9, 0.0 }
 0x503   : > { %v2932_v51 = vsel %vm2804_vm9, %v2645_v9, %v2868_v15 }
 0x504   : > { %4131 = vmatmul.msk.f32.gmra.mxu0 %vm2386_vm11, %v2932_v51 }
 0x506   : > { %4016 = vmatmul.msk.f32.gmra.mxu2 %vm787_vm2, %v3934_v5  ;;  %v2647_v30 = vpop.f32.mrf.mxu3 }
 0x507   : > { %v2648_v19 = vadd.f32 %v4855_v17, %v2647_v30 }
 0x509   : > { %v2869_v23 = vmul.f32 0.2, %v2648_v19  ;;  %vm2805_vm10 = vcmp.ge.f32.partialorder %v2648_v19, 0.0 }
 0x50b   : > { %v2933_v26 = vsel %vm2805_vm10, %v2648_v19, %v2869_v23 }
 0x50c   : > { %4132 = vmatmul.msk.f32.gmra.mxu0 %vm2386_vm11, %v2933_v26 }
 0x50e   : > { %4017 = vmatmul.msk.f32.gmra.mxu2 %vm787_vm2, %v3935_v56  ;;  %v2650_v10 = vpop.f32.mrf.mxu3 }
 0x50f   : > { %v2651_v52 = vadd.f32 %v4855_v17, %v2650_v10 }
 0x511   : > { %v2870_v53 = vmul.f32 0.2, %v2651_v52  ;;  %vm2806_vm12 = vcmp.ge.f32.partialorder %v2651_v52, 0.0 }
 0x513   : > { %v2934_v20 = vsel %vm2806_vm12, %v2651_v52, %v2870_v53 }
 0x514   : > { %4133 = vmatmul.msk.f32.gmra.mxu0 %vm2386_vm11, %v2934_v20 }
 0x516   : > { %v2653_v49 = vpop.f32.mrf.mxu3 }
 0x517   : > { %v2654_v27 = vadd.f32 %v4855_v17, %v2653_v49 }
 0x519   : > { %v2871_v28 = vmul.f32 0.2, %v2654_v27  ;;  %vm2807_vm13 = vcmp.ge.f32.partialorder %v2654_v27, 0.0 }
 0x51b   : > { %v2935_v37 = vsel %vm2807_vm13, %v2654_v27, %v2871_v28 }
 0x51c   : > { %4134 = vmatmul.msk.f32.gmra.mxu0 %vm2386_vm11, %v2935_v37 }
 0x51e   : > { %v2656_v7 = vpop.f32.mrf.mxu3 }
 0x51f   : > { %v2657_v34 = vadd.f32 %v4855_v17, %v2656_v7 }
 0x521   : > { %v2872_v36 = vmul.f32 0.2, %v2657_v34  ;;  %vm2808_vm14 = vcmp.ge.f32.partialorder %v2657_v34, 0.0 }
 0x523   : > { %v2936_v63 = vsel %vm2808_vm14, %v2657_v34, %v2872_v36 }
 0x524   : > { %4135 = vmatmul.msk.f32.gmra.mxu0 %vm2386_vm11, %v2936_v63 }
 0x526   : > { %v2659_v55 = vpop.f32.mrf.mxu3 }
 0x527   : > { %v2660_v38 = vadd.f32 %v4855_v17, %v2659_v55 }
 0x529   : > { %v2873_v47 = vmul.f32 0.2, %v2660_v38  ;;  %vm2809_vm15 = vcmp.ge.f32.partialorder %v2660_v38, 0.0 }
 0x52b   : > { %v2937_v50 = vsel %vm2809_vm15, %v2660_v38, %v2873_v47 }
 0x52c   : > { %4136 = vmatmul.msk.f32.gmra.mxu0 %vm2386_vm11, %v2937_v50 }
 0x52e   : > { %v2662_v39 = vpop.f32.mrf.mxu3 }
 0x52f   : > { %v2663_v59 = vadd.f32 %v4855_v17, %v2662_v39 }
 0x531   : > { %v2874_v25 = vmul.f32 0.2, %v2663_v59  ;;  %vm2810_vm1 = vcmp.ge.f32.partialorder %v2663_v59, 0.0 }
 0x533   : > { %v2938_v42 = vsel %vm2810_vm1, %v2663_v59, %v2874_v25 }
 0x534   : > { %4137 = vmatmul.msk.f32.gmra.mxu0 %vm2386_vm11, %v2938_v42 }
 0x552   : > { %v1174_v48 = vpop.xlane.xlu2 %1173 }
 0x553   : > { %vm1196_vm4 = vcmp.eq.f32.partialorder %v5041_v35, %v1174_v48 }
 0x554   : > { %v1204_v14 = vsel %vm1196_vm4, %v4509_v33, 64.0 }
 0x555   : > { %v1212_v57 = vsel %vm787_vm2, %v1204_v14, inf }
 0x556   : > { %1213 = vmin.xlane.f32.xlu1 %v1212_v57 }
 0x55a   : > { %v1139_v16 = vpop.xlane.xlu2 %1138  ;;  %v1177_v24 = vpop.xlane.xlu1 %1176 }
 0x55b   : > { %vm1147_vm5 = vcmp.eq.f32.partialorder %v4509_v33, %v1139_v16  ;;  %vm1197_vm6 = vcmp.eq.f32.partialorder %v5050_v40, %v1177_v24 }
 0x55c   : > { %v3936_v12 = vsel %vm1147_vm5, 1.0, %v6033_v54  ;;  %v5129_v2 = vsel %vm1147_vm5, -inf, %v4993_v61  ;;  %v1205_v45 = vsel %vm1197_vm6, %v4509_v33, 64.0  ;;  %v5142_v61 = vld [vmem:[%s6023_s6] ss:$0 sm:$0xff] }
 0x55d   : > { %4018 = vmatmul.msk.f32.gmra.mxu2 %vm787_vm2, %v3936_v12  ;;  %v1193_v31 = vsel %vm787_vm2, %v5129_v2, -inf  ;;  %v1215_v13 = vsel %vm787_vm2, %v1205_v45, inf }
 0x55e   : > { %1194 = vmax.xlane.f32.xlu1 %v1193_v31  ;;  %1216 = vmin.xlane.f32.xlu0 %v1215_v13 }
 0x561   : > { %v1936_v18 = vpop.f32.mrf.mxu2 }
 0x562   : > { %v2080_v46 = vsub.f32 %v1936_v18, %v4695_v8  ;;  %v1180_v44 = vpop.xlane.xlu0 %1179  ;;  %v1183_v4 = vpop.xlane.xlu1 %1182 }
 0x563   : > { %vm1198_vm7 = vcmp.eq.f32.partialorder %v5064_v43, %v1180_v44  ;;  %vm1199_vm8 = vcmp.eq.f32.partialorder %v5060_v60, %v1183_v4 }
 0x564   : > { %v2148_v0 = vadd.f32 %v5142_v61, %v2080_v46  ;;  %v1206_v9 = vsel %vm1198_vm7, %v4509_v33, 64.0  ;;  %v1207_v32 = vsel %vm1199_vm8, %v4509_v33, 64.0 }
 0x565   : > { %v1218_v15 = vsel %vm787_vm2, %v1206_v9, inf  ;;  %v1221_v51 = vsel %vm787_vm2, %v1207_v32, inf }
 0x566   : > { %1219 = vmin.xlane.f32.xlu2 %v1218_v15  ;;  %1222 = vmin.xlane.f32.xlu0 %v1221_v51  ;;  %vm2212_vm0 = vcmp.ge.f32.partialorder %v2148_v0, 0.0  ;;  %v2276_v5 = vmul.f32 0.2, %v2148_v0 }
 0x568   : > { %v2340_v30 = vsel %vm2212_vm0, %v2148_v0, %v2276_v5 }
 0x569   : > { %v1939_v19 = vpop.f32.mrf.mxu2  ;;  %4075 = vmatmul.msk.f32.gmra.mxu3 %vm2386_vm11, %v2340_v30 }
 0x56a   : > { %v2081_v23 = vsub.f32 %v1939_v19, %v4711_v21  ;;  %v1189_v26 = vpop.xlane.xlu0 %1188  ;;  %v1186_v56 = vpop.xlane.xlu2 %1185 }
 0x56b   : > { %vm1201_vm9 = vcmp.eq.f32.partialorder %v5079_v62, %v1189_v26  ;;  %vm1200_vm10 = vcmp.eq.f32.partialorder %v5082_v3, %v1186_v56 }
 0x56c   : > { %v2149_v10 = vadd.f32 %v5142_v61, %v2081_v23  ;;  %v1209_v52 = vsel %vm1201_vm9, %v4509_v33, 64.0  ;;  %v1208_v53 = vsel %vm1200_vm10, %v4509_v33, 64.0 }
 0x56d   : > { %v1227_v20 = vsel %vm787_vm2, %v1209_v52, inf  ;;  %v1224_v49 = vsel %vm787_vm2, %v1208_v53, inf }
 0x56e   : > { %1228 = vmin.xlane.f32.xlu2 %v1227_v20  ;;  %vm2213_vm12 = vcmp.ge.f32.partialorder %v2149_v10, 0.0  ;;  %v2277_v27 = vmul.f32 0.2, %v2149_v10  ;;  %1225 = vmin.xlane.f32.xlu1 %v1224_v49 }
 0x570   : > { %v2341_v28 = vsel %vm2213_vm12, %v2149_v10, %v2277_v27 }
 0x571   : > { %v1942_v37 = vpop.f32.mrf.mxu2  ;;  %4076 = vmatmul.msk.f32.gmra.mxu3 %vm2386_vm11, %v2341_v28 }
 0x572   : > { %v2082_v7 = vsub.f32 %v1942_v37, %v4728_v1  ;;  %v1192_v34 = vpop.xlane.xlu2 %1191 }
 0x573   : > { %vm1202_vm13 = vcmp.eq.f32.partialorder %v5095_v58, %v1192_v34 }
 0x574   : > { %v2150_v36 = vadd.f32 %v5142_v61, %v2082_v7  ;;  %v1210_v63 = vsel %vm1202_vm13, %v4509_v33, 64.0 }
 0x575   : > { %v1230_v55 = vsel %vm787_vm2, %v1210_v63, inf }
 0x576   : > { %vm2214_vm14 = vcmp.ge.f32.partialorder %v2150_v36, 0.0  ;;  %v2278_v38 = vmul.f32 0.2, %v2150_v36  ;;  %1231 = vmin.xlane.f32.xlu1 %v1230_v55 }
 0x578   : > { %v2342_v47 = vsel %vm2214_vm14, %v2150_v36, %v2278_v38 }
 0x579   : > { %v1945_v50 = vpop.f32.mrf.mxu2  ;;  %4077 = vmatmul.msk.f32.gmra.mxu3 %vm2386_vm11, %v2342_v47 }
 0x57a   : > { %v2083_v39 = vsub.f32 %v1945_v50, %v4749_v41 }
 0x57c   : > { %v2151_v59 = vadd.f32 %v5142_v61, %v2083_v39 }
 0x57d   : > { %v2665_v25 = vpop.f32.mrf.mxu3 }
 0x57e   : > { %v2666_v42 = vadd.f32 %v4855_v17, %v2665_v25  ;;  %vm2215_vm15 = vcmp.ge.f32.partialorder %v2151_v59, 0.0  ;;  %v2279_v48 = vmul.f32 0.2, %v2151_v59 }
 0x580   : > { %v2875_v14 = vmul.f32 0.2, %v2666_v42  ;;  %v2343_v57 = vsel %vm2215_vm15, %v2151_v59, %v2279_v48  ;;  %vm2811_vm1 = vcmp.ge.f32.partialorder %v2666_v42, 0.0 }
 0x581   : > { %v1948_v16 = vpop.f32.mrf.mxu2  ;;  %4078 = vmatmul.msk.f32.gmra.mxu3 %vm2386_vm11, %v2343_v57 }
 0x582   : > { %v2084_v24 = vsub.f32 %v1948_v16, %v4775_v11  ;;  %v2939_v12 = vsel %vm2811_vm1, %v2666_v42, %v2875_v14  ;;  %v5230_v42 = vpop.f32.mrf.mxu0  ;;  %v5244_v16 = vld [vmem:[%s6025_s8] ss:$0 sm:$0xff] }
 0x583   : > { %4138 = vmatmul.msk.f32.gmra.mxu0 %vm2386_vm11, %v2939_v12 }
 0x584   : > { %v2152_v45 = vadd.f32 %v5142_v61, %v2084_v24 }
 0x586   : > { %vm2216_vm4 = vcmp.ge.f32.partialorder %v2152_v45, 0.0  ;;  %v2280_v31 = vmul.f32 0.2, %v2152_v45 }
 0x588   : > { %v2344_v13 = vsel %vm2216_vm4, %v2152_v45, %v2280_v31 }
 0x589   : > { %v1951_v18 = vpop.f32.mrf.mxu2  ;;  %4079 = vmatmul.msk.f32.gmra.mxu3 %vm2386_vm11, %v2344_v13 }
 0x58a   : > { %v2085_v17 = vsub.f32 %v1951_v18, %v4794_v22  ;;  %v5249_v31 = vpop.f32.mrf.mxu0 }
 0x58c   : > { %v2153_v46 = vadd.f32 %v5142_v61, %v2085_v17 }
 0x58e   : > { %vm2217_vm5 = vcmp.ge.f32.partialorder %v2153_v46, 0.0  ;;  %v2281_v44 = vmul.f32 0.2, %v2153_v46 }
 0x590   : > { %v2345_v4 = vsel %vm2217_vm5, %v2153_v46, %v2281_v44 }
 0x591   : > { %v1954_v0 = vpop.f32.mrf.mxu2  ;;  %4080 = vmatmul.msk.f32.gmra.mxu3 %vm2386_vm11, %v2345_v4 }
 0x592   : > { %v2086_v9 = vsub.f32 %v1954_v0, %v4804_v6  ;;  %v5257_v4 = vpop.f32.mrf.mxu0 }
 0x594   : > { %v2154_v32 = vadd.f32 %v5142_v61, %v2086_v9 }
 0x596   : > { %vm2218_vm6 = vcmp.ge.f32.partialorder %v2154_v32, 0.0  ;;  %v2282_v15 = vmul.f32 0.2, %v2154_v32 }
 0x598   : > { %v2346_v51 = vsel %vm2218_vm6, %v2154_v32, %v2282_v15 }
 0x599   : > { %4081 = vmatmul.msk.f32.gmra.mxu3 %vm2386_vm11, %v2346_v51 }
 0x5c9   : > { %v1214_v5 = vpop.xlane.xlu1 %1213 }
 0x5ca   : > { %vm1236_vm7 = vcmp.eq.f32.partialorder %v4509_v33, %v1214_v5  ;;  %v5266_v5 = vpop.f32.mrf.mxu0 }
 0x5cb   : > { %v3937_v30 = vsel %vm1236_vm7, 1.0, %v6033_v54  ;;  %v5182_v19 = vsel %vm1236_vm7, -inf, %v5041_v35 }
 0x5cc   : > { %4019 = vmatmul.msk.f32.gmra.mxu2 %vm787_vm2, %v3937_v30  ;;  %v1268_v23 = vsel %vm787_vm2, %v5182_v19, -inf }
 0x5cd   : > { %1269 = vmax.xlane.f32.xlu0 %v1268_v23 }
 0x5d1   : > { %v1217_v26 = vpop.xlane.xlu0 %1216  ;;  %v1195_v56 = vpop.xlane.xlu1 %1194 }
 0x5d2   : > { %vm1237_vm8 = vcmp.eq.f32.partialorder %v4509_v33, %v1217_v26  ;;  %vm1203_vm0 = vcmp.eq.f32.partialorder %v5129_v2, %v1195_v56 }
 0x5d3   : > { %v3938_v10 = vsel %vm1237_vm8, 1.0, %v6033_v54  ;;  %v5191_v52 = vsel %vm1237_vm8, -inf, %v5050_v40  ;;  %v1211_v35 = vsel %vm1203_vm0, %v4509_v33, 64.0 }
 0x5d4   : > { %4020 = vmatmul.msk.f32.gmra.mxu2 %vm787_vm2, %v3938_v10  ;;  %v1271_v53 = vsel %vm787_vm2, %v5191_v52, -inf  ;;  %v1233_v20 = vsel %vm787_vm2, %v1211_v35, inf }
 0x5d5   : > { %1272 = vmax.xlane.f32.xlu2 %v1271_v53  ;;  %1234 = vmin.xlane.f32.xlu0 %v1233_v20  ;;  %v5271_v53 = vpop.f32.mrf.mxu0 }
 0x5d9   : > { %v1220_v49 = vpop.xlane.xlu2 %1219  ;;  %v1223_v27 = vpop.xlane.xlu0 %1222 }
 0x5da   : > { %vm1238_vm9 = vcmp.eq.f32.partialorder %v4509_v33, %v1220_v49  ;;  %vm1239_vm10 = vcmp.eq.f32.partialorder %v4509_v33, %v1223_v27 }
 0x5db   : > { %v3939_v40 = vsel %vm1238_vm9, 1.0, %v6033_v54  ;;  %v5202_v28 = vsel %vm1238_vm9, -inf, %v5064_v43  ;;  %v5205_v37 = vsel %vm1239_vm10, -inf, %v5060_v60  ;;  %v3940_v60 = vsel %vm1239_vm10, 1.0, %v6033_v54 }
 0x5dc   : > { %4021 = vmatmul.msk.f32.gmra.mxu2 %vm787_vm2, %v3939_v40  ;;  %v1274_v7 = vsel %vm787_vm2, %v5202_v28, -inf  ;;  %v1277_v34 = vsel %vm787_vm2, %v5205_v37, -inf }
 0x5dd   : > { %1275 = vmax.xlane.f32.xlu1 %v1274_v7  ;;  %1278 = vmax.xlane.f32.xlu2 %v1277_v34  ;;  %v5275_v34 = vpop.f32.mrf.mxu0 }
 0x5e0   : > { %v1957_v36 = vpop.f32.mrf.mxu2 }
 0x5e1   : > { %v2087_v63 = vsub.f32 %v1957_v36, %v4814_v29  ;;  %v1229_v55 = vpop.xlane.xlu2 %1228  ;;  %v1226_v43 = vpop.xlane.xlu1 %1225 }
 0x5e2   : > { %vm1241_vm12 = vcmp.eq.f32.partialorder %v4509_v33, %v1229_v55  ;;  %vm1240_vm13 = vcmp.eq.f32.partialorder %v4509_v33, %v1226_v43 }
 0x5e3   : > { %v2155_v38 = vadd.f32 %v5142_v61, %v2087_v63  ;;  %v5219_v47 = vsel %vm1241_vm12, -inf, %v5079_v62  ;;  %v5223_v50 = vsel %vm1240_vm13, -inf, %v5082_v3  ;;  %v3941_v3 = vsel %vm1240_vm13, 1.0, %v6033_v54 }
 0x5e4   : > { %4022 = vmatmul.msk.f32.gmra.mxu2 %vm787_vm2, %v3940_v60  ;;  %v1283_v39 = vsel %vm787_vm2, %v5219_v47, -inf  ;;  %v1280_v59 = vsel %vm787_vm2, %v5223_v50, -inf  ;;  %v3942_v13 = vsel %vm1241_vm12, 1.0, %v6033_v54 }
 0x5e5   : > { %1284 = vmax.xlane.f32.xlu1 %v1283_v39  ;;  %vm2219_vm14 = vcmp.ge.f32.partialorder %v2155_v38, 0.0  ;;  %v2283_v25 = vmul.f32 0.2, %v2155_v38  ;;  %1281 = vmax.xlane.f32.xlu0 %v1280_v59 }
 0x5e7   : > { %v2347_v62 = vsel %vm2219_vm14, %v2155_v38, %v2283_v25  ;;  %v5279_v38 = vpop.f32.mrf.mxu0 }
 0x5e8   : > { %4082 = vmatmul.msk.f32.gmra.mxu3 %vm2386_vm11, %v2347_v62  ;;  %6035 = vst [vmem:[#allocation2_spill] sm:$0xff] %v5279_v38 }
 0x5e9   : > { %v1232_v48 = vpop.xlane.xlu1 %1231 }
 0x5ea   : > { %vm1242_vm15 = vcmp.eq.f32.partialorder %v4509_v33, %v1232_v48 }
 0x5eb   : > { %v5238_v14 = vsel %vm1242_vm15, -inf, %v5095_v58  ;;  %v3943_v0 = vsel %vm1242_vm15, 1.0, %v6033_v54 }
 0x5ec   : > { %4023 = vmatmul.msk.f32.gmra.mxu2 %vm787_vm2, %v3941_v3  ;;  %v2668_v57 = vpop.f32.mrf.mxu3  ;;  %v1286_v12 = vsel %vm787_vm2, %v5238_v14, -inf }
 0x5ed   : > { %v2669_v24 = vadd.f32 %v5244_v16, %v2668_v57  ;;  %1287 = vmax.xlane.f32.xlu0 %v1286_v12 }
 0x5ef   : > { %v2876_v45 = vmul.f32 0.2, %v2669_v24  ;;  %vm2812_vm1 = vcmp.ge.f32.partialorder %v2669_v24, 0.0 }
 0x5f1   : > { %v2940_v58 = vsel %vm2812_vm1, %v2669_v24, %v2876_v45 }
 0x5f2   : > { %4139 = vmatmul.msk.f32.gmra.mxu0 %vm2386_vm11, %v2940_v58 }
 0x5f4   : > { %4024 = vmatmul.msk.f32.gmra.mxu2 %vm787_vm2, %v3942_v13  ;;  %v2671_v18 = vpop.f32.mrf.mxu3 }
 0x5f5   : > { %v2672_v17 = vadd.f32 %v5244_v16, %v2671_v18 }
 0x5f7   : > { %v2877_v46 = vmul.f32 0.2, %v2672_v17  ;;  %vm2813_vm4 = vcmp.ge.f32.partialorder %v2672_v17, 0.0 }
 0x5f9   : > { %v2941_v44 = vsel %vm2813_vm4, %v2672_v17, %v2877_v46 }
 0x5fa   : > { %4140 = vmatmul.msk.f32.gmra.mxu0 %vm2386_vm11, %v2941_v44 }
 0x5fc   : > { %4025 = vmatmul.msk.f32.gmra.mxu2 %vm787_vm2, %v3943_v0  ;;  %v2674_v9 = vpop.f32.mrf.mxu3 }
 0x5fd   : > { %v2675_v32 = vadd.f32 %v5244_v16, %v2674_v9 }
 0x5ff   : > { %v2878_v15 = vmul.f32 0.2, %v2675_v32  ;;  %vm2814_vm5 = vcmp.ge.f32.partialorder %v2675_v32, 0.0 }
 0x601   : > { %v2942_v51 = vsel %vm2814_vm5, %v2675_v32, %v2878_v15 }
 0x602   : > { %4141 = vmatmul.msk.f32.gmra.mxu0 %vm2386_vm11, %v2942_v51 }
 0x604   : > { %v2677_v30 = vpop.f32.mrf.mxu3 }
 0x605   : > { %v2678_v23 = vadd.f32 %v5244_v16, %v2677_v30 }
 0x607   : > { %v2879_v26 = vmul.f32 0.2, %v2678_v23  ;;  %vm2815_vm6 = vcmp.ge.f32.partialorder %v2678_v23, 0.0 }
 0x609   : > { %v2943_v56 = vsel %vm2815_vm6, %v2678_v23, %v2879_v26 }
 0x60a   : > { %4142 = vmatmul.msk.f32.gmra.mxu0 %vm2386_vm11, %v2943_v56 }
 0x60c   : > { %v2680_v10 = vpop.f32.mrf.mxu3 }
 0x60d   : > { %v2681_v35 = vadd.f32 %v5244_v16, %v2680_v10 }
 0x60f   : > { %v2880_v20 = vmul.f32 0.2, %v2681_v35  ;;  %vm2816_vm7 = vcmp.ge.f32.partialorder %v2681_v35, 0.0 }
 0x611   : > { %v2944_v49 = vsel %vm2816_vm7, %v2681_v35, %v2880_v20 }
 0x612   : > { %4143 = vmatmul.msk.f32.gmra.mxu0 %vm2386_vm11, %v2944_v49 }
 0x614   : > { %v2683_v27 = vpop.f32.mrf.mxu3 }
 0x615   : > { %v2684_v40 = vadd.f32 %v5244_v16, %v2683_v27 }
 0x617   : > { %v2881_v7 = vmul.f32 0.2, %v2684_v40  ;;  %vm2817_vm8 = vcmp.ge.f32.partialorder %v2684_v40, 0.0 }
 0x619   : > { %v2945_v36 = vsel %vm2817_vm8, %v2684_v40, %v2881_v7 }
 0x61a   : > { %4144 = vmatmul.msk.f32.gmra.mxu0 %vm2386_vm11, %v2945_v36 }
 0x61c   : > { %v2686_v63 = vpop.f32.mrf.mxu3 }
 0x61d   : > { %v2687_v55 = vadd.f32 %v5244_v16, %v2686_v63 }
 0x61f   : > { %v2882_v43 = vmul.f32 0.2, %v2687_v55  ;;  %vm2818_vm0 = vcmp.ge.f32.partialorder %v2687_v55, 0.0 }
 0x621   : > { %v2946_v60 = vsel %vm2818_vm0, %v2687_v55, %v2882_v43 }
 0x622   : > { %4145 = vmatmul.msk.f32.gmra.mxu0 %vm2386_vm11, %v2946_v60 }
 0x640   : > { %v1270_v39 = vpop.xlane.xlu0 %1269 }
 0x641   : > { %vm1292_vm9 = vcmp.eq.f32.partialorder %v5182_v19, %v1270_v39 }
 0x642   : > { %v1300_v59 = vsel %vm1292_vm9, %v4509_v33, 64.0 }
 0x643   : > { %v1308_v25 = vsel %vm787_vm2, %v1300_v59, inf }
 0x644   : > { %1309 = vmin.xlane.f32.xlu2 %v1308_v25 }
 0x648   : > { %v1273_v62 = vpop.xlane.xlu2 %1272  ;;  %v1235_v48 = vpop.xlane.xlu0 %1234 }
 0x649   : > { %vm1293_vm10 = vcmp.eq.f32.partialorder %v5191_v52, %v1273_v62  ;;  %vm1243_vm12 = vcmp.eq.f32.partialorder %v4509_v33, %v1235_v48 }
 0x64a   : > { %v3944_v3 = vsel %vm1243_vm12, 1.0, %v6033_v54  ;;  %v5289_v57 = vsel %vm1243_vm12, -inf, %v5129_v2  ;;  %v1301_v24 = vsel %vm1293_vm10, %v4509_v33, 64.0 }
 0x64b   : > { %4026 = vmatmul.msk.f32.gmra.mxu2 %vm787_vm2, %v3944_v3  ;;  %v1311_v12 = vsel %vm787_vm2, %v1301_v24, inf  ;;  %v1289_v45 = vsel %vm787_vm2, %v5289_v57, -inf }
 0x64c   : > { %1312 = vmin.xlane.f32.xlu1 %v1311_v12  ;;  %1290 = vmax.xlane.f32.xlu2 %v1289_v45 }
 0x64f   : > { %v1960_v58 = vpop.f32.mrf.mxu2 }
 0x650   : > { %v2088_v13 = vsub.f32 %v1960_v58, %v4695_v8  ;;  %v1279_v18 = vpop.xlane.xlu2 %1278  ;;  %v1276_v17 = vpop.xlane.xlu1 %1275 }
 0x651   : > { %vm1295_vm13 = vcmp.eq.f32.partialorder %v5205_v37, %v1279_v18  ;;  %vm1294_vm14 = vcmp.eq.f32.partialorder %v5202_v28, %v1276_v17 }
 0x652   : > { %v2156_v2 = vadd.f32 %v5142_v61, %v2088_v13  ;;  %v1303_v46 = vsel %vm1295_vm13, %v4509_v33, 64.0  ;;  %v1302_v44 = vsel %vm1294_vm14, %v4509_v33, 64.0 }
 0x653   : > { %v1317_v0 = vsel %vm787_vm2, %v1303_v46, inf  ;;  %v1314_v9 = vsel %vm787_vm2, %v1302_v44, inf }
 0x654   : > { %1318 = vmin.xlane.f32.xlu1 %v1317_v0  ;;  %1315 = vmin.xlane.f32.xlu0 %v1314_v9  ;;  %vm2220_vm15 = vcmp.ge.f32.partialorder %v2156_v2, 0.0  ;;  %v2284_v32 = vmul.f32 0.2, %v2156_v2 }
 0x656   : > { %v2348_v15 = vsel %vm2220_vm15, %v2156_v2, %v2284_v32  ;;  %v5325_v2 = vpop.f32.mrf.mxu0 }
 0x657   : > { %v1963_v51 = vpop.f32.mrf.mxu2  ;;  %4083 = vmatmul.msk.f32.gmra.mxu3 %vm2386_vm11, %v2348_v15  ;;  %6036 = vst [vmem:[#allocation3_spill] sm:$0xff] %v5325_v2 }
 0x658   : > { %v2089_v30 = vsub.f32 %v1963_v51, %v4711_v21  ;;  %v1285_v23 = vpop.xlane.xlu1 %1284  ;;  %v1282_v26 = vpop.xlane.xlu0 %1281 }
 0x659   : > { %vm1297_vm1 = vcmp.eq.f32.partialorder %v5219_v47, %v1285_v23  ;;  %vm1296_vm4 = vcmp.eq.f32.partialorder %v5223_v50, %v1282_v26 }
 0x65a   : > { %v2157_v56 = vadd.f32 %v5142_v61, %v2089_v30  ;;  %v1305_v10 = vsel %vm1297_vm1, %v4509_v33, 64.0  ;;  %v1304_v35 = vsel %vm1296_vm4, %v4509_v33, 64.0 }
 0x65b   : > { %v1323_v20 = vsel %vm787_vm2, %v1305_v10, inf  ;;  %v1320_v49 = vsel %vm787_vm2, %v1304_v35, inf }
 0x65c   : > { %1324 = vmin.xlane.f32.xlu0 %v1323_v20  ;;  %vm2221_vm5 = vcmp.ge.f32.partialorder %v2157_v56, 0.0  ;;  %v2285_v27 = vmul.f32 0.2, %v2157_v56  ;;  %1321 = vmin.xlane.f32.xlu2 %v1320_v49 }
 0x65e   : > { %v2349_v40 = vsel %vm2221_vm5, %v2157_v56, %v2285_v27  ;;  %v5332_v51 = vpop.f32.mrf.mxu0 }
 0x65f   : > { %v1966_v7 = vpop.f32.mrf.mxu2  ;;  %4084 = vmatmul.msk.f32.gmra.mxu3 %vm2386_vm11, %v2349_v40 }
 0x660   : > { %v2090_v36 = vsub.f32 %v1966_v7, %v4728_v1  ;;  %v1288_v63 = vpop.xlane.xlu0 %1287 }
 0x661   : > { %vm1298_vm6 = vcmp.eq.f32.partialorder %v5238_v14, %v1288_v63 }
 0x662   : > { %v2158_v55 = vadd.f32 %v5142_v61, %v2090_v36  ;;  %v1306_v43 = vsel %vm1298_vm6, %v4509_v33, 64.0 }
 0x663   : > { %v1326_v60 = vsel %vm787_vm2, %v1306_v43, inf }
 0x664   : > { %vm2222_vm7 = vcmp.ge.f32.partialorder %v2158_v55, 0.0  ;;  %v2286_v39 = vmul.f32 0.2, %v2158_v55  ;;  %1327 = vmin.xlane.f32.xlu2 %v1326_v60 }
 0x666   : > { %v2350_v59 = vsel %vm2222_vm7, %v2158_v55, %v2286_v39  ;;  %v5337_v20 = vpop.f32.mrf.mxu0 }
 0x667   : > { %v1969_v25 = vpop.f32.mrf.mxu2  ;;  %4085 = vmatmul.msk.f32.gmra.mxu3 %vm2386_vm11, %v2350_v59 }
 0x668   : > { %v2091_v62 = vsub.f32 %v1969_v25, %v4749_v41 }
 0x66a   : > { %v2159_v48 = vadd.f32 %v5142_v61, %v2091_v62 }
 0x66b   : > { %v2689_v3 = vpop.f32.mrf.mxu3 }
 0x66c   : > { %v2690_v24 = vadd.f32 %v5244_v16, %v2689_v3  ;;  %vm2223_vm8 = vcmp.ge.f32.partialorder %v2159_v48, 0.0  ;;  %v2287_v12 = vmul.f32 0.2, %v2159_v48 }
 0x66e   : > { %v2883_v45 = vmul.f32 0.2, %v2690_v24  ;;  %v2351_v58 = vsel %vm2223_vm8, %v2159_v48, %v2287_v12  ;;  %vm2819_vm0 = vcmp.ge.f32.partialorder %v2690_v24, 0.0  ;;  %v5340_v27 = vpop.f32.mrf.mxu0 }
 0x66f   : > { %v1972_v13 = vpop.f32.mrf.mxu2  ;;  %4086 = vmatmul.msk.f32.gmra.mxu3 %vm2386_vm11, %v2351_v58 }
 0x670   : > { %v2092_v18 = vsub.f32 %v1972_v13, %v4775_v11  ;;  %v2947_v17 = vsel %vm2819_vm0, %v2690_v24, %v2883_v45 }
 0x671   : > { %4146 = vmatmul.msk.f32.gmra.mxu0 %vm2386_vm11, %v2947_v17 }
 0x672   : > { %v2160_v46 = vadd.f32 %v5142_v61, %v2092_v18 }
 0x674   : > { %vm2224_vm9 = vcmp.ge.f32.partialorder %v2160_v46, 0.0  ;;  %v2288_v44 = vmul.f32 0.2, %v2160_v46 }
 0x676   : > { %v2352_v0 = vsel %vm2224_vm9, %v2160_v46, %v2288_v44  ;;  %v5342_v40 = vpop.f32.mrf.mxu0 }
 0x677   : > { %v1975_v9 = vpop.f32.mrf.mxu2  ;;  %4087 = vmatmul.msk.f32.gmra.mxu3 %vm2386_vm11, %v2352_v0 }
 0x678   : > { %v2093_v32 = vsub.f32 %v1975_v9, %v4794_v22 }
 0x67a   : > { %v2161_v15 = vadd.f32 %v5142_v61, %v2093_v32 }
 0x67c   : > { %vm2225_vm10 = vcmp.ge.f32.partialorder %v2161_v15, 0.0  ;;  %v2289_v30 = vmul.f32 0.2, %v2161_v15 }
 0x67e   : > { %v2353_v23 = vsel %vm2225_vm10, %v2161_v15, %v2289_v30  ;;  %v5344_v7 = vpop.f32.mrf.mxu0 }
 0x67f   : > { %v1978_v26 = vpop.f32.mrf.mxu2  ;;  %4088 = vmatmul.msk.f32.gmra.mxu3 %vm2386_vm11, %v2353_v23 }
 0x680   : > { %v2094_v56 = vsub.f32 %v1978_v26, %v4804_v6 }
 0x682   : > { %v2162_v10 = vadd.f32 %v5142_v61, %v2094_v56 }
 0x684   : > { %vm2226_vm12 = vcmp.ge.f32.partialorder %v2162_v10, 0.0  ;;  %v2290_v35 = vmul.f32 0.2, %v2162_v10 }
 0x686   : > { %v2354_v49 = vsel %vm2226_vm12, %v2162_v10, %v2290_v35  ;;  %v5346_v36 = vpop.f32.mrf.mxu0 }
 0x687   : > { %4089 = vmatmul.msk.f32.gmra.mxu3 %vm2386_vm11, %v2354_v49 }
 0x68e   : > { %v5348_v63 = vpop.f32.mrf.mxu0 }
 0x68f   : > { %6037 = vst [vmem:[#allocation4_spill] sm:$0xff] %v5348_v63 }
 0x696   : > { %v5358_v59 = vpop.f32.mrf.mxu0 }
 0x697   : > { %6038 = vst [vmem:[#allocation5_spill] sm:$0xff] %v5358_v59 }
 0x69e   : > { %v5371_v45 = vpop.f32.mrf.mxu0 }
 0x6a6   : > { %v5387_v9 = vpop.f32.mrf.mxu0 }
 0x6b7   : > { %v1310_v55 = vpop.xlane.xlu2 %1309 }
 0x6b8   : > { %vm1332_vm13 = vcmp.eq.f32.partialorder %v4509_v33, %v1310_v55  ;;  %v5408_v55 = vpop.f32.mrf.mxu0 }
 0x6b9   : > { %v3945_v43 = vsel %vm1332_vm13, 1.0, %v6033_v54  ;;  %v5353_v60 = vsel %vm1332_vm13, -inf, %v5182_v19 }
 0x6ba   : > { %4027 = vmatmul.msk.f32.gmra.mxu2 %vm787_vm2, %v3945_v43  ;;  %v1364_v39 = vsel %vm787_vm2, %v5353_v60, -inf }
 0x6bb   : > { %1365 = vmax.xlane.f32.xlu1 %v1364_v39 }
 0x6bf   : > { %v1291_v25 = vpop.xlane.xlu2 %1290  ;;  %v1313_v62 = vpop.xlane.xlu1 %1312 }
 0x6c0   : > { %vm1299_vm14 = vcmp.eq.f32.partialorder %v5289_v57, %v1291_v25  ;;  %vm1333_vm15 = vcmp.eq.f32.partialorder %v4509_v33, %v1313_v62 }
 0x6c1   : > { %v3946_v48 = vsel %vm1333_vm15, 1.0, %v6033_v54  ;;  %v5364_v3 = vsel %vm1333_vm15, -inf, %v5191_v52  ;;  %v1307_v19 = vsel %vm1299_vm14, %v4509_v33, 64.0 }
 0x6c2   : > { %4028 = vmatmul.msk.f32.gmra.mxu2 %vm787_vm2, %v3946_v48  ;;  %v1329_v24 = vsel %vm787_vm2, %v1307_v19, inf  ;;  %v1367_v12 = vsel %vm787_vm2, %v5364_v3, -inf }
 0x6c3   : > { %1330 = vmin.xlane.f32.xlu1 %v1329_v24  ;;  %1368 = vmax.xlane.f32.xlu0 %v1367_v12  ;;  %v5426_v12 = vpop.f32.mrf.mxu0 }
 0x6c7   : > { %v1316_v58 = vpop.xlane.xlu0 %1315  ;;  %v1319_v13 = vpop.xlane.xlu1 %1318 }
 0x6c8   : > { %vm1334_vm1 = vcmp.eq.f32.partialorder %v4509_v33, %v1316_v58  ;;  %vm1335_vm4 = vcmp.eq.f32.partialorder %v4509_v33, %v1319_v13 }
 0x6c9   : > { %v3947_v52 = vsel %vm1334_vm1, 1.0, %v6033_v54  ;;  %v5377_v18 = vsel %vm1334_vm1, -inf, %v5202_v28  ;;  %v5380_v17 = vsel %vm1335_vm4, -inf, %v5205_v37  ;;  %v3948_v37 = vsel %vm1335_vm4, 1.0, %v6033_v54 }
 0x6ca   : > { %4029 = vmatmul.msk.f32.gmra.mxu2 %vm787_vm2, %v3947_v52  ;;  %v1370_v46 = vsel %vm787_vm2, %v5377_v18, -inf  ;;  %v1373_v44 = vsel %vm787_vm2, %v5380_v17, -inf }
 0x6cb   : > { %1371 = vmax.xlane.f32.xlu2 %v1370_v46  ;;  %1374 = vmax.xlane.f32.xlu0 %v1373_v44 }
 0x6ce   : > { %v1981_v0 = vpop.f32.mrf.mxu2 }
 0x6cf   : > { %v2095_v32 = vsub.f32 %v1981_v0, %v4814_v29  ;;  %v1325_v28 = vpop.xlane.xlu0 %1324  ;;  %v1322_v15 = vpop.xlane.xlu2 %1321 }
 0x6d0   : > { %vm1337_vm5 = vcmp.eq.f32.partialorder %v4509_v33, %v1325_v28  ;;  %vm1336_vm6 = vcmp.eq.f32.partialorder %v4509_v33, %v1322_v15 }
 0x6d1   : > { %v2163_v30 = vadd.f32 %v5142_v61, %v2095_v32  ;;  %v5397_v23 = vsel %vm1337_vm5, -inf, %v5219_v47  ;;  %v5400_v26 = vsel %vm1336_vm6, -inf, %v5223_v50  ;;  %v3949_v50 = vsel %vm1336_vm6, 1.0, %v6033_v54  ;;  %v5435_v32 = vpop.f32.mrf.mxu0 }
 0x6d2   : > { %4030 = vmatmul.msk.f32.gmra.mxu2 %vm787_vm2, %v3948_v37  ;;  %v1379_v56 = vsel %vm787_vm2, %v5397_v23, -inf  ;;  %v1376_v10 = vsel %vm787_vm2, %v5400_v26, -inf  ;;  %v3950_v24 = vsel %vm1337_vm5, 1.0, %v6033_v54 }
 0x6d3   : > { %1380 = vmax.xlane.f32.xlu2 %v1379_v56  ;;  %vm2227_vm7 = vcmp.ge.f32.partialorder %v2163_v30, 0.0  ;;  %v2291_v35 = vmul.f32 0.2, %v2163_v30  ;;  %1377 = vmax.xlane.f32.xlu1 %v1376_v10 }
 0x6d5   : > { %v2355_v49 = vsel %vm2227_vm7, %v2163_v30, %v2291_v35 }
 0x6d6   : > { %4090 = vmatmul.msk.f32.gmra.mxu3 %vm2386_vm11, %v2355_v49 }
 0x6d7   : > { %v1328_v47 = vpop.xlane.xlu2 %1327 }
 0x6d8   : > { %vm1338_vm8 = vcmp.eq.f32.partialorder %v4509_v33, %v1328_v47 }
 0x6d9   : > { %v5415_v43 = vsel %vm1338_vm8, -inf, %v5238_v14  ;;  %v3951_v46 = vsel %vm1338_vm8, 1.0, %v6033_v54  ;;  %v5439_v10 = vpop.f32.mrf.mxu0 }
 0x6da   : > { %4031 = vmatmul.msk.f32.gmra.mxu2 %vm787_vm2, %v3949_v50  ;;  %v2692_v39 = vpop.f32.mrf.mxu3  ;;  %v1382_v62 = vsel %vm787_vm2, %v5415_v43, -inf }
 0x6db   : > { %v2693_v25 = vadd.f32 %v5244_v16, %v2692_v39  ;;  %1383 = vmax.xlane.f32.xlu1 %v1382_v62 }
 0x6dd   : > { %v2884_v48 = vmul.f32 0.2, %v2693_v25  ;;  %vm2820_vm0 = vcmp.ge.f32.partialorder %v2693_v25, 0.0 }
 0x6df   : > { %v2948_v19 = vsel %vm2820_vm0, %v2693_v25, %v2884_v48 }
 0x6e0   : > { %4147 = vmatmul.msk.f32.gmra.mxu0 %vm2386_vm11, %v2948_v19 }
 0x6e1   : > { %v5444_v25 = vpop.f32.mrf.mxu0 }
 0x6e2   : > { %4032 = vmatmul.msk.f32.gmra.mxu2 %vm787_vm2, %v3950_v24  ;;  %v2695_v14 = vpop.f32.mrf.mxu3  ;;  %6039 = vst [vmem:[#allocation6_spill] sm:$0xff] %v5444_v25 }
 0x6e3   : > { %v2696_v58 = vadd.f32 %v5244_v16, %v2695_v14 }
 0x6e5   : > { %v2885_v13 = vmul.f32 0.2, %v2696_v58  ;;  %vm2821_vm9 = vcmp.ge.f32.partialorder %v2696_v58, 0.0 }
 0x6e7   : > { %v2949_v52 = vsel %vm2821_vm9, %v2696_v58, %v2885_v13 }
 0x6e8   : > { %4148 = vmatmul.msk.f32.gmra.mxu0 %vm2386_vm11, %v2949_v52 }
 0x6e9   : > { %v5448_v14 = vpop.f32.mrf.mxu0 }
 0x6ea   : > { %4033 = vmatmul.msk.f32.gmra.mxu2 %vm787_vm2, %v3951_v46  ;;  %v2698_v44 = vpop.f32.mrf.mxu3  ;;  %6040 = vst [vmem:[#allocation7_spill] sm:$0xff] %v5448_v14 }
 0x6eb   : > { %v2699_v0 = vadd.f32 %v5244_v16, %v2698_v44 }
 0x6ed   : > { %v2886_v28 = vmul.f32 0.2, %v2699_v0  ;;  %vm2822_vm10 = vcmp.ge.f32.partialorder %v2699_v0, 0.0 }
 0x6ef   : > { %v2950_v15 = vsel %vm2822_vm10, %v2699_v0, %v2886_v28 }
 0x6f0   : > { %4149 = vmatmul.msk.f32.gmra.mxu0 %vm2386_vm11, %v2950_v15 }
 0x6f1   : > { %v5452_v44 = vpop.f32.mrf.mxu0 }
 0x6f2   : > { %v2701_v37 = vpop.f32.mrf.mxu3 }
 0x6f3   : > { %v2702_v30 = vadd.f32 %v5244_v16, %v2701_v37 }
 0x6f5   : > { %v2887_v56 = vmul.f32 0.2, %v2702_v30  ;;  %vm2823_vm12 = vcmp.ge.f32.partialorder %v2702_v30, 0.0 }
 0x6f7   : > { %v2951_v35 = vsel %vm2823_vm12, %v2702_v30, %v2887_v56 }
 0x6f8   : > { %4150 = vmatmul.msk.f32.gmra.mxu0 %vm2386_vm11, %v2951_v35 }
 0x6f9   : > { %v5454_v0 = vpop.f32.mrf.mxu0 }
 0x6fa   : > { %v2704_v49 = vpop.f32.mrf.mxu3 }
 0x6fb   : > { %v2705_v47 = vadd.f32 %v5244_v16, %v2704_v49 }
 0x6fd   : > { %v2888_v50 = vmul.f32 0.2, %v2705_v47  ;;  %vm2824_vm13 = vcmp.ge.f32.partialorder %v2705_v47, 0.0 }
 0x6ff   : > { %v2952_v39 = vsel %vm2824_vm13, %v2705_v47, %v2888_v50 }
 0x700   : > { %4151 = vmatmul.msk.f32.gmra.mxu0 %vm2386_vm11, %v2952_v39 }
 0x701   : > { %v5456_v28 = vpop.f32.mrf.mxu0 }
 0x702   : > { %v2707_v62 = vpop.f32.mrf.mxu3 }
 0x703   : > { %v2708_v48 = vadd.f32 %v5244_v16, %v2707_v62 }
 0x705   : > { %v2889_v19 = vmul.f32 0.2, %v2708_v48  ;;  %vm2825_vm14 = vcmp.ge.f32.partialorder %v2708_v48, 0.0 }
 0x707   : > { %v2953_v24 = vsel %vm2825_vm14, %v2708_v48, %v2889_v19 }
 0x708   : > { %4152 = vmatmul.msk.f32.gmra.mxu0 %vm2386_vm11, %v2953_v24 }
 0x709   : > { %v5458_v37 = vpop.f32.mrf.mxu0 }
 0x70a   : > { %v2710_v58 = vpop.f32.mrf.mxu3 }
 0x70b   : > { %v2711_v13 = vadd.f32 %v5244_v16, %v2710_v58 }
 0x70d   : > { %v2890_v52 = vmul.f32 0.2, %v2711_v13  ;;  %vm2826_vm15 = vcmp.ge.f32.partialorder %v2711_v13, 0.0 }
 0x70f   : > { %v2954_v46 = vsel %vm2826_vm15, %v2711_v13, %v2890_v52 }
 0x710   : > { %4153 = vmatmul.msk.f32.gmra.mxu0 %vm2386_vm11, %v2954_v46 }
 0x711   : > { %v5470_v62 = vpop.f32.mrf.mxu0 }
 0x72e   : > { %v1366_v15 = vpop.xlane.xlu1 %1365 }
 0x72f   : > { %vm1388_vm1 = vcmp.eq.f32.partialorder %v5353_v60, %v1366_v15 }
 0x730   : > { %v1396_v30 = vsel %vm1388_vm1, %v4509_v33, 64.0 }
 0x731   : > { %v1404_v56 = vsel %vm787_vm2, %v1396_v30, inf }
 0x732   : > { %1405 = vmin.xlane.f32.xlu0 %v1404_v56 }
 0x736   : > { %v1369_v35 = vpop.xlane.xlu0 %1368  ;;  %v1331_v49 = vpop.xlane.xlu1 %1330 }
 0x737   : > { %vm1389_vm4 = vcmp.eq.f32.partialorder %v5364_v3, %v1369_v35  ;;  %vm1339_vm5 = vcmp.eq.f32.partialorder %v4509_v33, %v1331_v49  ;;  %v5484_v49 = vpop.f32.mrf.mxu0 }
 0x738   : > { %v3952_v47 = vsel %vm1339_vm5, 1.0, %v6033_v54  ;;  %v5467_v50 = vsel %vm1339_vm5, -inf, %v5289_v57  ;;  %v1397_v39 = vsel %vm1389_vm4, %v4509_v33, 64.0 }
 0x739   : > { %4034 = vmatmul.msk.f32.gmra.mxu2 %vm787_vm2, %v3952_v47  ;;  %v1407_v48 = vsel %vm787_vm2, %v1397_v39, inf  ;;  %v1385_v19 = vsel %vm787_vm2, %v5467_v50, -inf }
 0x73a   : > { %1408 = vmin.xlane.f32.xlu2 %v1407_v48  ;;  %1386 = vmax.xlane.f32.xlu0 %v1385_v19 }
 0x73d   : > { %v1984_v24 = vpop.f32.mrf.mxu2 }
 0x73e   : > { %v2096_v58 = vsub.f32 %v1984_v24, %v4695_v8  ;;  %v1372_v13 = vpop.xlane.xlu2 %1371  ;;  %v1375_v52 = vpop.xlane.xlu0 %1374 }
 0x73f   : > { %vm1390_vm6 = vcmp.eq.f32.partialorder %v5377_v18, %v1372_v13  ;;  %vm1391_vm7 = vcmp.eq.f32.partialorder %v5380_v17, %v1375_v52 }
 0x740   : > { %v2164_v57 = vadd.f32 %v5142_v61, %v2096_v58  ;;  %v1398_v46 = vsel %vm1390_vm6, %v4509_v33, 64.0  ;;  %v1399_v15 = vsel %vm1391_vm7, %v4509_v33, 64.0 }
 0x741   : > { %v1410_v30 = vsel %vm787_vm2, %v1398_v46, inf  ;;  %v1413_v56 = vsel %vm787_vm2, %v1399_v15, inf }
 0x742   : > { %v2292_v35 = vmul.f32 0.2, %v2164_v57  ;;  %1411 = vmin.xlane.f32.xlu1 %v1410_v30  ;;  %1414 = vmin.xlane.f32.xlu2 %v1413_v56  ;;  %vm2228_vm8 = vcmp.ge.f32.partialorder %v2164_v57, 0.0  ;;  %v5495_v56 = vpop.f32.mrf.mxu0 }
 0x743   : > { %6041 = vst [vmem:[#allocation8_spill] sm:$0xff] %v5495_v56 }
 0x744   : > { %v2356_v47 = vsel %vm2228_vm8, %v2164_v57, %v2292_v35 }
 0x745   : > { %v1987_v39 = vpop.f32.mrf.mxu2  ;;  %4091 = vmatmul.msk.f32.gmra.mxu3 %vm2386_vm11, %v2356_v47 }
 0x746   : > { %v2097_v48 = vsub.f32 %v1987_v39, %v4711_v21  ;;  %v1381_v19 = vpop.xlane.xlu2 %1380  ;;  %v1378_v24 = vpop.xlane.xlu1 %1377 }
 0x747   : > { %vm1393_vm0 = vcmp.eq.f32.partialorder %v5397_v23, %v1381_v19  ;;  %vm1392_vm9 = vcmp.eq.f32.partialorder %v5400_v26, %v1378_v24 }
 0x748   : > { %v2165_v58 = vadd.f32 %v5142_v61, %v2097_v48  ;;  %v1401_v13 = vsel %vm1393_vm0, %v4509_v33, 64.0  ;;  %v1400_v46 = vsel %vm1392_vm9, %v4509_v33, 64.0 }
 0x749   : > { %v1419_v52 = vsel %vm787_vm2, %v1401_v13, inf  ;;  %v1416_v15 = vsel %vm787_vm2, %v1400_v46, inf }
 0x74a   : > { %v2293_v57 = vmul.f32 0.2, %v2165_v58  ;;  %1420 = vmin.xlane.f32.xlu1 %v1419_v52  ;;  %vm2229_vm10 = vcmp.ge.f32.partialorder %v2165_v58, 0.0  ;;  %1417 = vmin.xlane.f32.xlu0 %v1416_v15  ;;  %v5503_v52 = vpop.f32.mrf.mxu0 }
 0x74b   : > { %6042 = vst [vmem:[#allocation9_spill] sm:$0xff] %v5503_v52 }
 0x74c   : > { %v2357_v30 = vsel %vm2229_vm10, %v2165_v58, %v2293_v57 }
 0x74d   : > { %v1990_v35 = vpop.f32.mrf.mxu2  ;;  %4092 = vmatmul.msk.f32.gmra.mxu3 %vm2386_vm11, %v2357_v30 }
 0x74e   : > { %v2098_v47 = vsub.f32 %v1990_v35, %v4728_v1  ;;  %v1384_v39 = vpop.xlane.xlu1 %1383 }
 0x74f   : > { %vm1394_vm12 = vcmp.eq.f32.partialorder %v5415_v43, %v1384_v39 }
 0x750   : > { %v2166_v48 = vadd.f32 %v5142_v61, %v2098_v47  ;;  %v1402_v19 = vsel %vm1394_vm12, %v4509_v33, 64.0 }
 0x751   : > { %v1422_v13 = vsel %vm787_vm2, %v1402_v19, inf }
 0x752   : > { %v2294_v24 = vmul.f32 0.2, %v2166_v48  ;;  %vm2230_vm13 = vcmp.ge.f32.partialorder %v2166_v48, 0.0  ;;  %1423 = vmin.xlane.f32.xlu0 %v1422_v13 }
 0x754   : > { %v2358_v58 = vsel %vm2230_vm13, %v2166_v48, %v2294_v24 }
 0x755   : > { %v1993_v46 = vpop.f32.mrf.mxu2  ;;  %4093 = vmatmul.msk.f32.gmra.mxu3 %vm2386_vm11, %v2358_v58 }
 0x756   : > { %v2099_v57 = vsub.f32 %v1993_v46, %v4749_v41 }
 0x758   : > { %v2167_v15 = vadd.f32 %v5142_v61, %v2099_v57 }
 0x759   : > { %v2713_v30 = vpop.f32.mrf.mxu3 }
 0x75a   : > { %v2295_v35 = vmul.f32 0.2, %v2167_v15  ;;  %v2714_v47 = vadd.f32 %v5244_v16, %v2713_v30  ;;  %vm2231_vm14 = vcmp.ge.f32.partialorder %v2167_v15, 0.0 }
 0x75c   : > { %v2891_v39 = vmul.f32 0.2, %v2714_v47  ;;  %v2359_v54 = vsel %vm2231_vm14, %v2167_v15, %v2295_v35  ;;  %vm2827_vm15 = vcmp.ge.f32.partialorder %v2714_v47, 0.0 }
 0x75d   : > { %v1996_v19 = vpop.f32.mrf.mxu2  ;;  %4094 = vmatmul.msk.f32.gmra.mxu3 %vm2386_vm11, %v2359_v54  ;;  %v5510_v48 = vpop.f32.mrf.mxu0 }
 0x75e   : > { %v2100_v24 = vsub.f32 %v1996_v19, %v4775_v11  ;;  %v2955_v13 = vsel %vm2827_vm15, %v2714_v47, %v2891_v39 }
 0x75f   : > { %4154 = vmatmul.msk.f32.gmra.mxu0 %vm2386_vm11, %v2955_v13 }
 0x760   : > { %v2168_v58 = vadd.f32 %v5142_v61, %v2100_v24 }
 0x762   : > { %v2296_v46 = vmul.f32 0.2, %v2168_v58  ;;  %vm2232_vm1 = vcmp.ge.f32.partialorder %v2168_v58, 0.0 }
 0x764   : > { %v2360_v57 = vsel %vm2232_vm1, %v2168_v58, %v2296_v46 }
 0x765   : > { %v1999_v30 = vpop.f32.mrf.mxu2  ;;  %4095 = vmatmul.msk.f32.gmra.mxu3 %vm2386_vm11, %v2360_v57  ;;  %v5516_v15 = vpop.f32.mrf.mxu0 }
 0x766   : > { %v2101_v35 = vsub.f32 %v1999_v30, %v4794_v22 }
 0x768   : > { %v2169_v54 = vadd.f32 %v5142_v61, %v2101_v35 }
 0x76a   : > { %v2297_v52 = vmul.f32 0.2, %v2169_v54  ;;  %vm2233_vm4 = vcmp.ge.f32.partialorder %v2169_v54, 0.0 }
 0x76c   : > { %v2361_v19 = vsel %vm2233_vm4, %v2169_v54, %v2297_v52  ;;  %v5531_v52 = vld [vmem:[%s6027_s10] ss:$0 sm:$0xff] }
 0x76d   : > { %v2002_v47 = vpop.f32.mrf.mxu2  ;;  %4096 = vmatmul.msk.f32.gmra.mxu3 %vm2386_vm11, %v2361_v19  ;;  %v5521_v39 = vpop.f32.mrf.mxu0  ;;  %v3235_v30 = vadd.f32 %v5531_v52, %v5346_v36  ;;  %v3211_v35 = vadd.f32 %v5531_v52, %v5275_v34 }
 0x76e   : > { %v2102_v24 = vsub.f32 %v2002_v47, %v4804_v6  ;;  %v3283_v47 = vadd.f32 %v5531_v52, %v5484_v49 }
 0x76f   : > { %v3464_v19 = vmul.f32 0.2, %v3235_v30  ;;  %vm3400_vm6 = vcmp.ge.f32.partialorder %v3235_v30, 0.0  ;;  %vm3392_vm7 = vcmp.ge.f32.partialorder %v3211_v35, 0.0 }
 0x770   : > { %v2170_v13 = vadd.f32 %v5142_v61, %v2102_v24  ;;  %v3259_v61 = vadd.f32 %v5531_v52, %v5439_v10  ;;  %v3456_v24 = vmul.f32 0.2, %v3211_v35  ;;  %vm3416_vm0 = vcmp.ge.f32.partialorder %v3283_v47, 0.0 }
 0x772   : > { %v2298_v58 = vmul.f32 0.2, %v2170_v13  ;;  %vm2234_vm5 = vcmp.ge.f32.partialorder %v2170_v13, 0.0  ;;  %vm3408_vm8 = vcmp.ge.f32.partialorder %v3259_v61, 0.0  ;;  %v3520_v36 = vsel %vm3392_vm7, %v3211_v35, %v3456_v24 }
 0x774   : > { %v2362_v46 = vsel %vm2234_vm5, %v2170_v13, %v2298_v58  ;;  %v3472_v13 = vmul.f32 0.2, %v3259_v61  ;;  %v3528_v58 = vsel %vm3400_vm6, %v3235_v30, %v3464_v19  ;;  %v6044_v30 = vmov 0.0  }
 0x775   : > { %4097 = vmatmul.msk.f32.gmra.mxu3 %vm2386_vm11, %v2362_v46  ;;  %v5526_v57 = vpop.f32.mrf.mxu0  ;;  %v3480_v46 = vmul.f32 0.2, %v3283_v47  ;;  %v3584_v34 = vadd.f32 %v3528_v58, %v3520_v36 }
 0x776   : > { %v3536_v14 = vsel %vm3408_vm8, %v3259_v61, %v3472_v13 }
 0x777   : > { %v3544_v59 = vsel %vm3416_vm0, %v3283_v47, %v3480_v46  ;;  %v3592_v56 = vadd.f32 %v3584_v34, %v3536_v14 }
 0x779   : > { %v3600_v63 = vadd.f32 %v3592_v56, %v3544_v59 }
 0x77d   : > { %v5539_v54 = vpop.f32.mrf.mxu0 }
 0x77e   : > { %6043 = vst [vmem:[#allocation10_spill] sm:$0xff] %v5539_v54 }
 0x785   : > { %v3306_v2 = vpop.f32.mrf.mxu0 }
 0x786   : > { %v3307_v10 = vadd.f32 %v5531_v52, %v3306_v2 }
 0x788   : > { %vm3424_vm9 = vcmp.ge.f32.partialorder %v3307_v10, 0.0  ;;  %v3488_v25 = vmul.f32 0.2, %v3307_v10 }
 0x78a   : > { %v3552_v49 = vsel %vm3424_vm9, %v3307_v10, %v3488_v25 }
 0x78b   : > { %v5544_v38 = vadd.f32 %v3600_v63, %v3552_v49  ;;  %v5585_v49 = vld [vmem:[%s6023_s6] ss:$0 sm:$0xff] }
 0x7a5   : > { %v1406_v54 = vpop.xlane.xlu0 %1405 }
 0x7a6   : > { %vm1428_vm10 = vcmp.eq.f32.partialorder %v4509_v33, %v1406_v54 }
 0x7a7   : > { %v3953_v19 = vsel %vm1428_vm10, 1.0, %v6044_v30  ;;  %v5549_v35 = vsel %vm1428_vm10, -inf, %v5353_v60 }
 0x7a8   : > { %4035 = vmatmul.msk.f32.gmra.mxu2 %vm787_vm2, %v3953_v19  ;;  %v1460_v2 = vsel %vm787_vm2, %v5549_v35, -inf }
 0x7a9   : > { %1461 = vmax.xlane.f32.xlu2 %v1460_v2 }
 0x7ad   : > { %v1409_v14 = vpop.xlane.xlu2 %1408  ;;  %v1387_v61 = vpop.xlane.xlu0 %1386 }
 0x7ae   : > { %vm1429_vm12 = vcmp.eq.f32.partialorder %v4509_v33, %v1409_v14  ;;  %vm1395_vm13 = vcmp.eq.f32.partialorder %v5467_v50, %v1387_v61 }
 0x7af   : > { %v3954_v63 = vsel %vm1429_vm12, 1.0, %v6044_v30  ;;  %v5558_v59 = vsel %vm1429_vm12, -inf, %v5364_v3  ;;  %v1403_v60 = vsel %vm1395_vm13, %v4509_v33, 64.0 }
 0x7b0   : > { %4036 = vmatmul.msk.f32.gmra.mxu2 %vm787_vm2, %v3954_v63  ;;  %v1463_v25 = vsel %vm787_vm2, %v5558_v59, -inf  ;;  %v1425_v56 = vsel %vm787_vm2, %v1403_v60, inf }
 0x7b1   : > { %1464 = vmax.xlane.f32.xlu1 %v1463_v25  ;;  %1426 = vmin.xlane.f32.xlu2 %v1425_v56 }
 0x7b5   : > { %v1415_v54 = vpop.xlane.xlu2 %1414  ;;  %v1412_v47 = vpop.xlane.xlu1 %1411 }
 0x7b6   : > { %vm1431_vm14 = vcmp.eq.f32.partialorder %v4509_v33, %v1415_v54  ;;  %vm1430_vm15 = vcmp.eq.f32.partialorder %v4509_v33, %v1412_v47 }
 0x7b7   : > { %v5568_v3 = vsel %vm1431_vm14, -inf, %v5380_v17  ;;  %v3955_v24 = vsel %vm1430_vm15, 1.0, %v6044_v30  ;;  %v5572_v13 = vsel %vm1430_vm15, -inf, %v5377_v18  ;;  %v3956_v18 = vsel %vm1431_vm14, 1.0, %v6044_v30 }
 0x7b8   : > { %4037 = vmatmul.msk.f32.gmra.mxu2 %vm787_vm2, %v3955_v24  ;;  %v1469_v58 = vsel %vm787_vm2, %v5568_v3, -inf  ;;  %v1466_v46 = vsel %vm787_vm2, %v5572_v13, -inf }
 0x7b9   : > { %1470 = vmax.xlane.f32.xlu1 %v1469_v58  ;;  %1467 = vmax.xlane.f32.xlu0 %v1466_v46 }
 0x7bc   : > { %v2005_v36 = vpop.f32.mrf.mxu2 }
 0x7bd   : > { %v2103_v34 = vsub.f32 %v2005_v36, %v4814_v29  ;;  %v1421_v17 = vpop.xlane.xlu1 %1420  ;;  %v1418_v10 = vpop.xlane.xlu0 %1417 }
 0x7be   : > { %vm1433_vm1 = vcmp.eq.f32.partialorder %v4509_v33, %v1421_v17  ;;  %vm1432_vm4 = vcmp.eq.f32.partialorder %v4509_v33, %v1418_v10 }
 0x7bf   : > { %v2171_v19 = vadd.f32 %v5585_v49, %v2103_v34  ;;  %v5592_v2 = vsel %vm1433_vm1, -inf, %v5397_v23  ;;  %v5596_v14 = vsel %vm1432_vm4, -inf, %v5400_v26  ;;  %v3957_v56 = vsel %vm1432_vm4, 1.0, %v6044_v30 }
 0x7c0   : > { %4038 = vmatmul.msk.f32.gmra.mxu2 %vm787_vm2, %v3956_v18  ;;  %v1475_v61 = vsel %vm787_vm2, %v5592_v2, -inf  ;;  %v1472_v60 = vsel %vm787_vm2, %v5596_v14, -inf  ;;  %v3958_v36 = vsel %vm1433_vm1, 1.0, %v6044_v30 }
 0x7c1   : > { %v2299_v63 = vmul.f32 0.2, %v2171_v19  ;;  %1476 = vmax.xlane.f32.xlu0 %v1475_v61  ;;  %vm2235_vm5 = vcmp.ge.f32.partialorder %v2171_v19, 0.0  ;;  %1473 = vmax.xlane.f32.xlu2 %v1472_v60 }
 0x7c3   : > { %v2363_v25 = vsel %vm2235_vm5, %v2171_v19, %v2299_v63 }
 0x7c4   : > { %4098 = vmatmul.msk.f32.gmra.mxu3 %vm2386_vm11, %v2363_v25 }
 0x7c5   : > { %v1424_v23 = vpop.xlane.xlu0 %1423 }
 0x7c6   : > { %vm1434_vm6 = vcmp.eq.f32.partialorder %v4509_v33, %v1424_v23 }
 0x7c7   : > { %v5609_v54 = vsel %vm1434_vm6, -inf, %v5415_v43  ;;  %v3959_v19 = vsel %vm1434_vm6, 1.0, %v6044_v30 }
 0x7c8   : > { %4039 = vmatmul.msk.f32.gmra.mxu2 %vm787_vm2, %v3957_v56  ;;  %v2716_v26 = vpop.f32.mrf.mxu3  ;;  %v1478_v24 = vsel %vm787_vm2, %v5609_v54, -inf }
 0x7c9   : > { %v2717_v47 = vadd.f32 %v5244_v16, %v2716_v26  ;;  %1479 = vmax.xlane.f32.xlu2 %v1478_v24 }
 0x7cb   : > { %vm2828_vm7 = vcmp.ge.f32.partialorder %v2717_v47, 0.0  ;;  %v2892_v58 = vmul.f32 0.2, %v2717_v47 }
 0x7cd   : > { %v2956_v46 = vsel %vm2828_vm7, %v2717_v47, %v2892_v58 }
 0x7ce   : > { %4155 = vmatmul.msk.f32.gmra.mxu0 %vm2386_vm11, %v2956_v46 }
 0x7d0   : > { %4040 = vmatmul.msk.f32.gmra.mxu2 %vm787_vm2, %v3958_v36  ;;  %v2719_v34 = vpop.f32.mrf.mxu3 }
 0x7d1   : > { %v2720_v43 = vadd.f32 %v5244_v16, %v2719_v34 }
 0x7d3   : > { %vm2829_vm8 = vcmp.ge.f32.partialorder %v2720_v43, 0.0  ;;  %v2893_v10 = vmul.f32 0.2, %v2720_v43 }
 0x7d5   : > { %v2957_v18 = vsel %vm2829_vm8, %v2720_v43, %v2893_v10 }
 0x7d6   : > { %4156 = vmatmul.msk.f32.gmra.mxu0 %vm2386_vm11, %v2957_v18 }
 0x7d8   : > { %4041 = vmatmul.msk.f32.gmra.mxu2 %vm787_vm2, %v3959_v19  ;;  %v2722_v61 = vpop.f32.mrf.mxu3 }
 0x7d9   : > { %v2723_v17 = vadd.f32 %v5244_v16, %v2722_v61 }
 0x7db   : > { %vm2830_vm0 = vcmp.ge.f32.partialorder %v2723_v17, 0.0  ;;  %v2894_v63 = vmul.f32 0.2, %v2723_v17 }
 0x7dd   : > { %v2958_v60 = vsel %vm2830_vm0, %v2723_v17, %v2894_v63 }
 0x7de   : > { %4157 = vmatmul.msk.f32.gmra.mxu0 %vm2386_vm11, %v2958_v60 }
 0x7e0   : > { %v2725_v25 = vpop.f32.mrf.mxu3 }
 0x7e1   : > { %v2726_v56 = vadd.f32 %v5244_v16, %v2725_v25 }
 0x7e3   : > { %vm2831_vm9 = vcmp.ge.f32.partialorder %v2726_v56, 0.0  ;;  %v2895_v26 = vmul.f32 0.2, %v2726_v56 }
 0x7e5   : > { %v2959_v47 = vsel %vm2831_vm9, %v2726_v56, %v2895_v26 }
 0x7e6   : > { %4158 = vmatmul.msk.f32.gmra.mxu0 %vm2386_vm11, %v2959_v47 }
 0x7e8   : > { %v2728_v23 = vpop.f32.mrf.mxu3 }
 0x7e9   : > { %v2729_v24 = vadd.f32 %v5244_v16, %v2728_v23 }
 0x7eb   : > { %vm2832_vm10 = vcmp.ge.f32.partialorder %v2729_v24, 0.0  ;;  %v2896_v58 = vmul.f32 0.2, %v2729_v24 }
 0x7ed   : > { %v2960_v46 = vsel %vm2832_vm10, %v2729_v24, %v2896_v58 }
 0x7ee   : > { %4159 = vmatmul.msk.f32.gmra.mxu0 %vm2386_vm11, %v2960_v46 }
 0x7f0   : > { %v2731_v36 = vpop.f32.mrf.mxu3 }
 0x7f1   : > { %v2732_v34 = vadd.f32 %v5244_v16, %v2731_v36 }
 0x7f3   : > { %vm2833_vm12 = vcmp.ge.f32.partialorder %v2732_v34, 0.0  ;;  %v2897_v43 = vmul.f32 0.2, %v2732_v34 }
 0x7f5   : > { %v2961_v10 = vsel %vm2833_vm12, %v2732_v34, %v2897_v43 }
 0x7f6   : > { %4160 = vmatmul.msk.f32.gmra.mxu0 %vm2386_vm11, %v2961_v10 }
 0x7f8   : > { %v2734_v18 = vpop.f32.mrf.mxu3 }
 0x7f9   : > { %v2735_v19 = vadd.f32 %v5244_v16, %v2734_v18 }
 0x7fb   : > { %vm2834_vm13 = vcmp.ge.f32.partialorder %v2735_v19, 0.0  ;;  %v2898_v61 = vmul.f32 0.2, %v2735_v19 }
 0x7fd   : > { %v2962_v17 = vsel %vm2834_vm13, %v2735_v19, %v2898_v61 }
 0x7fe   : > { %4161 = vmatmul.msk.f32.gmra.mxu0 %vm2386_vm11, %v2962_v17 }
 0x81c   : > { %v1462_v63 = vpop.xlane.xlu2 %1461 }
 0x81d   : > { %vm1484_vm14 = vcmp.eq.f32.partialorder %v5549_v35, %v1462_v63 }
 0x81e   : > { %v1492_v60 = vsel %vm1484_vm14, %v4509_v33, 64.0 }
 0x81f   : > { %v1500_v25 = vsel %vm787_vm2, %v1492_v60, inf }
 0x820   : > { %1501 = vmin.xlane.f32.xlu1 %v1500_v25 }
 0x824   : > { %v1427_v56 = vpop.xlane.xlu2 %1426  ;;  %v1465_v26 = vpop.xlane.xlu1 %1464 }
 0x825   : > { %vm1435_vm15 = vcmp.eq.f32.partialorder %v4509_v33, %v1427_v56  ;;  %vm1485_vm1 = vcmp.eq.f32.partialorder %v5558_v59, %v1465_v26 }
 0x826   : > { %v3960_v16 = vsel %vm1435_vm15, 1.0, %v6044_v30  ;;  %v5642_v47 = vsel %vm1435_vm15, -inf, %v5467_v50  ;;  %v1493_v23 = vsel %vm1485_vm1, %v4509_v33, 64.0 }
 0x827   : > { %4042 = vmatmul.msk.f32.gmra.mxu2 %vm787_vm2, %v3960_v16  ;;  %v1481_v35 = vsel %vm787_vm2, %v5642_v47, -inf  ;;  %v1503_v24 = vsel %vm787_vm2, %v1493_v23, inf }
 0x828   : > { %1482 = vmax.xlane.f32.xlu1 %v1481_v35  ;;  %1504 = vmin.xlane.f32.xlu0 %v1503_v24 }
 0x82b   : > { %v2008_v58 = vpop.f32.mrf.mxu2 }
 0x82c   : > { %v2104_v46 = vsub.f32 %v2008_v58, %v4695_v8  ;;  %v1468_v59 = vpop.xlane.xlu0 %1467  ;;  %v1471_v36 = vpop.xlane.xlu1 %1470 }
 0x82d   : > { %vm1486_vm4 = vcmp.eq.f32.partialorder %v5572_v13, %v1468_v59  ;;  %vm1487_vm5 = vcmp.eq.f32.partialorder %v5568_v3, %v1471_v36 }
 0x82e   : > { %v2172_v50 = vadd.f32 %v5585_v49, %v2104_v46  ;;  %v1495_v34 = vsel %vm1487_vm5, %v4509_v33, 64.0  ;;  %v1494_v43 = vsel %vm1486_vm4, %v4509_v33, 64.0 }
 0x82f   : > { %v1506_v10 = vsel %vm787_vm2, %v1494_v43, inf  ;;  %v1509_v18 = vsel %vm787_vm2, %v1495_v34, inf }
 0x830   : > { %v2300_v19 = vmul.f32 0.2, %v2172_v50  ;;  %1507 = vmin.xlane.f32.xlu2 %v1506_v10  ;;  %1510 = vmin.xlane.f32.xlu0 %v1509_v18  ;;  %vm2236_vm6 = vcmp.ge.f32.partialorder %v2172_v50, 0.0 }
 0x832   : > { %v2364_v61 = vsel %vm2236_vm6, %v2172_v50, %v2300_v19 }
 0x833   : > { %v2011_v17 = vpop.f32.mrf.mxu2  ;;  %4099 = vmatmul.msk.f32.gmra.mxu3 %vm2386_vm11, %v2364_v61 }
 0x834   : > { %v2105_v3 = vsub.f32 %v2011_v17, %v4711_v21  ;;  %v1477_v13 = vpop.xlane.xlu0 %1476  ;;  %v1474_v63 = vpop.xlane.xlu2 %1473 }
 0x835   : > { %vm1489_vm7 = vcmp.eq.f32.partialorder %v5592_v2, %v1477_v13  ;;  %vm1488_vm8 = vcmp.eq.f32.partialorder %v5596_v14, %v1474_v63 }
 0x836   : > { %v2173_v60 = vadd.f32 %v5585_v49, %v2105_v3  ;;  %v1497_v25 = vsel %vm1489_vm7, %v4509_v33, 64.0  ;;  %v1496_v56 = vsel %vm1488_vm8, %v4509_v33, 64.0 }
 0x837   : > { %v1515_v26 = vsel %vm787_vm2, %v1497_v25, inf  ;;  %v1512_v23 = vsel %vm787_vm2, %v1496_v56, inf }
 0x838   : > { %v2301_v16 = vmul.f32 0.2, %v2173_v60  ;;  %1516 = vmin.xlane.f32.xlu2 %v1515_v26  ;;  %vm2237_vm0 = vcmp.ge.f32.partialorder %v2173_v60, 0.0  ;;  %1513 = vmin.xlane.f32.xlu1 %v1512_v23 }
 0x83a   : > { %v2365_v35 = vsel %vm2237_vm0, %v2173_v60, %v2301_v16 }
 0x83b   : > { %v2014_v24 = vpop.f32.mrf.mxu2  ;;  %4100 = vmatmul.msk.f32.gmra.mxu3 %vm2386_vm11, %v2365_v35 }
 0x83c   : > { %v2106_v2 = vsub.f32 %v2014_v24, %v4728_v1  ;;  %v1480_v58 = vpop.xlane.xlu2 %1479 }
 0x83d   : > { %vm1490_vm9 = vcmp.eq.f32.partialorder %v5609_v54, %v1480_v58  ;;  %v5678_v54 = vld [vmem:[%s6025_s8] ss:$0 sm:$0xff] }
 0x83e   : > { %v2174_v14 = vadd.f32 %v5585_v49, %v2106_v2  ;;  %v1498_v46 = vsel %vm1490_vm9, %v4509_v33, 64.0 }
 0x83f   : > { %v1518_v36 = vsel %vm787_vm2, %v1498_v46, inf }
 0x840   : > { %v2302_v59 = vmul.f32 0.2, %v2174_v14  ;;  %vm2238_vm10 = vcmp.ge.f32.partialorder %v2174_v14, 0.0  ;;  %1519 = vmin.xlane.f32.xlu0 %v1518_v36 }
 0x842   : > { %v2366_v50 = vsel %vm2238_vm10, %v2174_v14, %v2302_v59 }
 0x843   : > { %v2017_v34 = vpop.f32.mrf.mxu2  ;;  %4101 = vmatmul.msk.f32.gmra.mxu3 %vm2386_vm11, %v2366_v50 }
 0x844   : > { %v2107_v43 = vsub.f32 %v2017_v34, %v4749_v41 }
 0x846   : > { %v2175_v10 = vadd.f32 %v5585_v49, %v2107_v43 }
 0x847   : > { %v2737_v18 = vpop.f32.mrf.mxu3 }
 0x848   : > { %v2303_v19 = vmul.f32 0.2, %v2175_v10  ;;  %v2738_v61 = vadd.f32 %v5678_v54, %v2737_v18  ;;  %vm2239_vm12 = vcmp.ge.f32.partialorder %v2175_v10, 0.0 }
 0x84a   : > { %vm2835_vm13 = vcmp.ge.f32.partialorder %v2738_v61, 0.0  ;;  %v2899_v17 = vmul.f32 0.2, %v2738_v61  ;;  %v2367_v3 = vsel %vm2239_vm12, %v2175_v10, %v2303_v19 }
 0x84b   : > { %v2020_v13 = vpop.f32.mrf.mxu2  ;;  %4102 = vmatmul.msk.f32.gmra.mxu3 %vm2386_vm11, %v2367_v3 }
 0x84c   : > { %v2108_v63 = vsub.f32 %v2020_v13, %v4775_v11  ;;  %v2963_v60 = vsel %vm2835_vm13, %v2738_v61, %v2899_v17 }
 0x84d   : > { %4162 = vmatmul.msk.f32.gmra.mxu0 %vm2386_vm11, %v2963_v60 }
 0x84e   : > { %v2176_v25 = vadd.f32 %v5585_v49, %v2108_v63 }
 0x850   : > { %v2304_v56 = vmul.f32 0.2, %v2176_v25  ;;  %vm2240_vm14 = vcmp.ge.f32.partialorder %v2176_v25, 0.0 }
 0x852   : > { %v2368_v26 = vsel %vm2240_vm14, %v2176_v25, %v2304_v56 }
 0x853   : > { %v2023_v16 = vpop.f32.mrf.mxu2  ;;  %4103 = vmatmul.msk.f32.gmra.mxu3 %vm2386_vm11, %v2368_v26 }
 0x854   : > { %v2109_v23 = vsub.f32 %v2023_v16, %v4794_v22 }
 0x856   : > { %v2177_v35 = vadd.f32 %v5585_v49, %v2109_v23 }
 0x858   : > { %v2305_v24 = vmul.f32 0.2, %v2177_v35  ;;  %vm2241_vm15 = vcmp.ge.f32.partialorder %v2177_v35, 0.0 }
 0x85a   : > { %v2369_v2 = vsel %vm2241_vm15, %v2177_v35, %v2305_v24 }
 0x85b   : > { %v2026_v58 = vpop.f32.mrf.mxu2  ;;  %4104 = vmatmul.msk.f32.gmra.mxu3 %vm2386_vm11, %v2369_v2 }
 0x85c   : > { %v2110_v14 = vsub.f32 %v2026_v58, %v4804_v6 }
 0x85e   : > { %v2178_v46 = vadd.f32 %v5585_v49, %v2110_v14 }
 0x860   : > { %v2306_v59 = vmul.f32 0.2, %v2178_v46  ;;  %vm2242_vm1 = vcmp.ge.f32.partialorder %v2178_v46, 0.0 }
 0x862   : > { %v2370_v36 = vsel %vm2242_vm1, %v2178_v46, %v2306_v59 }
 0x863   : > { %4105 = vmatmul.msk.f32.gmra.mxu3 %vm2386_vm11, %v2370_v36 }
 0x893   : > { %v1502_v50 = vpop.xlane.xlu1 %1501 }
 0x894   : > { %vm1524_vm4 = vcmp.eq.f32.partialorder %v4509_v33, %v1502_v50 }
 0x895   : > { %v3961_v34 = vsel %vm1524_vm4, 1.0, %v6044_v30 }
 0x896   : > { %4043 = vmatmul.msk.f32.gmra.mxu2 %vm787_vm2, %v3961_v34 }
 0x89b   : > { %v1505_v43 = vpop.xlane.xlu0 %1504  ;;  %v1483_v10 = vpop.xlane.xlu1 %1482 }
 0x89c   : > { %vm1525_vm5 = vcmp.eq.f32.partialorder %v4509_v33, %v1505_v43  ;;  %vm1491_vm6 = vcmp.eq.f32.partialorder %v5642_v47, %v1483_v10 }
 0x89d   : > { %v3962_v18 = vsel %vm1525_vm5, 1.0, %v6044_v30  ;;  %v1499_v19 = vsel %vm1491_vm6, %v4509_v33, 64.0 }
 0x89e   : > { %4044 = vmatmul.msk.f32.gmra.mxu2 %vm787_vm2, %v3962_v18  ;;  %v1521_v61 = vsel %vm787_vm2, %v1499_v19, inf }
 0x89f   : > { %1522 = vmin.xlane.f32.xlu1 %v1521_v61 }
 0x8a3   : > { %v1508_v17 = vpop.xlane.xlu2 %1507  ;;  %v1511_v13 = vpop.xlane.xlu0 %1510 }
 0x8a4   : > { %vm1526_vm7 = vcmp.eq.f32.partialorder %v4509_v33, %v1508_v17  ;;  %vm1527_vm8 = vcmp.eq.f32.partialorder %v4509_v33, %v1511_v13 }
 0x8a5   : > { %v3963_v3 = vsel %vm1526_vm7, 1.0, %v6044_v30  ;;  %v3964_v60 = vsel %vm1527_vm8, 1.0, %v6044_v30 }
 0x8a6   : > { %4045 = vmatmul.msk.f32.gmra.mxu2 %vm787_vm2, %v3963_v3 }
 0x8aa   : > { %v2029_v47 = vpop.f32.mrf.mxu2 }
 0x8ab   : > { %v2111_v63 = vsub.f32 %v2029_v47, %v4814_v29  ;;  %v1514_v26 = vpop.xlane.xlu1 %1513  ;;  %v1517_v24 = vpop.xlane.xlu2 %1516 }
 0x8ac   : > { %vm1528_vm9 = vcmp.eq.f32.partialorder %v4509_v33, %v1514_v26  ;;  %vm1529_vm12 = vcmp.eq.f32.partialorder %v4509_v33, %v1517_v24 }
 0x8ad   : > { %v2179_v25 = vadd.f32 %v5585_v49, %v2111_v63  ;;  %v3965_v23 = vsel %vm1528_vm9, 1.0, %v6044_v30  ;;  %v3966_v46 = vsel %vm1529_vm12, 1.0, %v6044_v30 }
 0x8ae   : > { %4046 = vmatmul.msk.f32.gmra.mxu2 %vm787_vm2, %v3964_v60 }
 0x8af   : > { %v2307_v56 = vmul.f32 0.2, %v2179_v25  ;;  %vm2243_vm0 = vcmp.ge.f32.partialorder %v2179_v25, 0.0 }
 0x8b1   : > { %v2371_v16 = vsel %vm2243_vm0, %v2179_v25, %v2307_v56 }
 0x8b2   : > { %4106 = vmatmul.msk.f32.gmra.mxu3 %vm2386_vm11, %v2371_v16 }
 0x8b3   : > { %v1520_v36 = vpop.xlane.xlu0 %1519 }
 0x8b4   : > { %vm1530_vm14 = vcmp.eq.f32.partialorder %v4509_v33, %v1520_v36 }
 0x8b5   : > { %v3967_v10 = vsel %vm1530_vm14, 1.0, %v6044_v30 }
 0x8b6   : > { %4047 = vmatmul.msk.f32.gmra.mxu2 %vm787_vm2, %v3965_v23  ;;  %v2740_v35 = vpop.f32.mrf.mxu3 }
 0x8b7   : > { %v2741_v2 = vadd.f32 %v5678_v54, %v2740_v35 }
 0x8b9   : > { %vm2836_vm10 = vcmp.ge.f32.partialorder %v2741_v2, 0.0  ;;  %v2900_v58 = vmul.f32 0.2, %v2741_v2 }
 0x8bb   : > { %v2964_v14 = vsel %vm2836_vm10, %v2741_v2, %v2900_v58 }
 0x8bc   : > { %4163 = vmatmul.msk.f32.gmra.mxu0 %vm2386_vm11, %v2964_v14 }
 0x8be   : > { %4048 = vmatmul.msk.f32.gmra.mxu2 %vm787_vm2, %v3966_v46  ;;  %v2743_v59 = vpop.f32.mrf.mxu3 }
 0x8bf   : > { %v2744_v50 = vadd.f32 %v5678_v54, %v2743_v59 }
 0x8c1   : > { %vm2837_vm13 = vcmp.ge.f32.partialorder %v2744_v50, 0.0  ;;  %v2901_v34 = vmul.f32 0.2, %v2744_v50 }
 0x8c3   : > { %v2965_v43 = vsel %vm2837_vm13, %v2744_v50, %v2901_v34 }
 0x8c4   : > { %4164 = vmatmul.msk.f32.gmra.mxu0 %vm2386_vm11, %v2965_v43 }
 0x8c6   : > { %4049 = vmatmul.msk.f32.gmra.mxu2 %vm787_vm2, %v3967_v10  ;;  %v2746_v18 = vpop.f32.mrf.mxu3 }
 0x8c7   : > { %v2747_v19 = vadd.f32 %v5678_v54, %v2746_v18 }
 0x8c9   : > { %vm2838_vm15 = vcmp.ge.f32.partialorder %v2747_v19, 0.0  ;;  %v2902_v61 = vmul.f32 0.2, %v2747_v19 }
 0x8cb   : > { %v2966_v17 = vsel %vm2838_vm15, %v2747_v19, %v2902_v61 }
 0x8cc   : > { %4165 = vmatmul.msk.f32.gmra.mxu0 %vm2386_vm11, %v2966_v17 }
 0x8ce   : > { %v2749_v3 = vpop.f32.mrf.mxu3 }
 0x8cf   : > { %v2750_v13 = vadd.f32 %v5678_v54, %v2749_v3 }
 0x8d1   : > { %vm2839_vm1 = vcmp.ge.f32.partialorder %v2750_v13, 0.0  ;;  %v2903_v47 = vmul.f32 0.2, %v2750_v13 }
 0x8d3   : > { %v2967_v63 = vsel %vm2839_vm1, %v2750_v13, %v2903_v47 }
 0x8d4   : > { %4166 = vmatmul.msk.f32.gmra.mxu0 %vm2386_vm11, %v2967_v63 }
 0x8d6   : > { %v2752_v60 = vpop.f32.mrf.mxu3 }
 0x8d7   : > { %v2753_v25 = vadd.f32 %v5678_v54, %v2752_v60 }
 0x8d9   : > { %vm2840_vm4 = vcmp.ge.f32.partialorder %v2753_v25, 0.0  ;;  %v2904_v56 = vmul.f32 0.2, %v2753_v25 }
 0x8db   : > { %v2968_v26 = vsel %vm2840_vm4, %v2753_v25, %v2904_v56 }
 0x8dc   : > { %4167 = vmatmul.msk.f32.gmra.mxu0 %vm2386_vm11, %v2968_v26 }
 0x8de   : > { %v2755_v16 = vpop.f32.mrf.mxu3 }
 0x8df   : > { %v2756_v23 = vadd.f32 %v5678_v54, %v2755_v16 }
 0x8e1   : > { %vm2841_vm5 = vcmp.ge.f32.partialorder %v2756_v23, 0.0  ;;  %v2905_v35 = vmul.f32 0.2, %v2756_v23 }
 0x8e3   : > { %v2969_v24 = vsel %vm2841_vm5, %v2756_v23, %v2905_v35 }
 0x8e4   : > { %4168 = vmatmul.msk.f32.vlgmr.msrb.gmra.mxu1 %vm2386_vm11, %v2969_v24 }
 0x8e6   : > { %v2758_v2 = vpop.f32.mrf.mxu3 }
 0x8e7   : > { %v2759_v58 = vadd.f32 %v5678_v54, %v2758_v2 }
 0x8e9   : > { %vm2842_vm6 = vcmp.ge.f32.partialorder %v2759_v58, 0.0  ;;  %v2906_v14 = vmul.f32 0.2, %v2759_v58 }
 0x8eb   : > { %v2970_v46 = vsel %vm2842_vm6, %v2759_v58, %v2906_v14 }
 0x8ec   : > { %4169 = vmatmul.msk.f32.gmra.mxu1 %vm2386_vm11, %v2970_v46 }
 0x912   : > { %v1523_v59 = vpop.xlane.xlu1 %1522 }
 0x913   : > { %vm1531_vm7 = vcmp.eq.f32.partialorder %v4509_v33, %v1523_v59 }
 0x914   : > { %v3968_v36 = vsel %vm1531_vm7, 1.0, %v6044_v30 }
 0x915   : > { %4050 = vmatmul.msk.f32.gmra.mxu2 %vm787_vm2, %v3968_v36 }
 0x919   : > { %v2032_v50 = vpop.f32.mrf.mxu2 }
 0x91a   : > { %v2112_v34 = vsub.f32 %v2032_v50, %v4695_v8 }
 0x91c   : > { %v2180_v43 = vadd.f32 %v5585_v49, %v2112_v34 }
 0x91e   : > { %v2308_v10 = vmul.f32 0.2, %v2180_v43  ;;  %vm2244_vm8 = vcmp.ge.f32.partialorder %v2180_v43, 0.0 }
 0x920   : > { %v2372_v18 = vsel %vm2244_vm8, %v2180_v43, %v2308_v10 }
 0x921   : > { %v2035_v19 = vpop.f32.mrf.mxu2  ;;  %4107 = vmatmul.msk.f32.gmra.mxu3 %vm2386_vm11, %v2372_v18 }
 0x922   : > { %v2113_v61 = vsub.f32 %v2035_v19, %v4711_v21 }
 0x924   : > { %v2181_v17 = vadd.f32 %v5585_v49, %v2113_v61 }
 0x926   : > { %v2309_v33 = vmul.f32 0.2, %v2181_v17  ;;  %vm2245_vm0 = vcmp.ge.f32.partialorder %v2181_v17, 0.0 }
 0x928   : > { %v2373_v30 = vsel %vm2245_vm0, %v2181_v17, %v2309_v33 }
 0x929   : > { %v2038_v3 = vpop.f32.mrf.mxu2  ;;  %4108 = vmatmul.msk.f32.gmra.mxu3 %vm2386_vm11, %v2373_v30 }
 0x92a   : > { %v2114_v8 = vsub.f32 %v2038_v3, %v4728_v1 }
 0x92c   : > { %v2182_v13 = vadd.f32 %v5585_v49, %v2114_v8 }
 0x92e   : > { %v2310_v47 = vmul.f32 0.2, %v2182_v13  ;;  %vm2246_vm9 = vcmp.ge.f32.partialorder %v2182_v13, 0.0 }
 0x930   : > { %v2374_v63 = vsel %vm2246_vm9, %v2182_v13, %v2310_v47 }
 0x931   : > { %v2041_v60 = vpop.f32.mrf.mxu2  ;;  %4109 = vmatmul.msk.f32.gmra.mxu3 %vm2386_vm11, %v2374_v63 }
 0x932   : > { %v2115_v21 = vsub.f32 %v2041_v60, %v4749_v41 }
 0x934   : > { %v2183_v25 = vadd.f32 %v5585_v49, %v2115_v21 }
 0x935   : > { %v2761_v56 = vpop.f32.mrf.mxu3 }
 0x936   : > { %v2311_v26 = vmul.f32 0.2, %v2183_v25  ;;  %v2762_v16 = vadd.f32 %v5678_v54, %v2761_v56  ;;  %vm2247_vm10 = vcmp.ge.f32.partialorder %v2183_v25, 0.0  ;;  %v5767_v56 = vpop.f32.mrf.mxu0 }
 0x938   : > { %vm2843_vm12 = vcmp.ge.f32.partialorder %v2762_v16, 0.0  ;;  %v2907_v23 = vmul.f32 0.2, %v2762_v16  ;;  %v2375_v1 = vsel %vm2247_vm10, %v2183_v25, %v2311_v26 }
 0x939   : > { %v2044_v35 = vpop.f32.mrf.mxu2  ;;  %4110 = vmatmul.msk.f32.gmra.mxu3 %vm2386_vm11, %v2375_v1 }
 0x93a   : > { %v2116_v24 = vsub.f32 %v2044_v35, %v4775_v11  ;;  %v2971_v2 = vsel %vm2843_vm12, %v2762_v16, %v2907_v23  ;;  %v3644_v16 = vld [vmem:[%s6028_s11 + $0x8] sm:$0xff] }
 0x93b   : > { %4170 = vmatmul.msk.f32.gmra.mxu1 %vm2386_vm11, %v2971_v2 }
 0x93c   : > { %v2184_v41 = vadd.f32 %v5585_v49, %v2116_v24  ;;  %3687 = vmatpush.msra.mxu1 %v3644_v16 }
 0x93e   : > { %v2312_v58 = vmul.f32 0.2, %v2184_v41  ;;  %vm2248_vm13 = vcmp.ge.f32.partialorder %v2184_v41, 0.0  ;;  %v5774_v24 = vpop.f32.mrf.mxu0 }
 0x940   : > { %v2376_v14 = vsel %vm2248_vm13, %v2184_v41, %v2312_v58 }
 0x941   : > { %v2047_v46 = vpop.f32.mrf.mxu2  ;;  %4111 = vmatmul.msk.f32.gmra.mxu3 %vm2386_vm11, %v2376_v14 }
 0x942   : > { %v2117_v59 = vsub.f32 %v2047_v46, %v4794_v22 }
 0x944   : > { %v2185_v36 = vadd.f32 %v5585_v49, %v2117_v59 }
 0x946   : > { %v2313_v50 = vmul.f32 0.2, %v2185_v36  ;;  %vm2249_vm14 = vcmp.ge.f32.partialorder %v2185_v36, 0.0  ;;  %v5778_v46 = vpop.f32.mrf.mxu0 }
 0x948   : > { %v2377_v34 = vsel %vm2249_vm14, %v2185_v36, %v2313_v50 }
 0x949   : > { %v2050_v43 = vpop.f32.mrf.mxu2  ;;  %4112 = vmatmul.msk.f32.gmra.mxu3 %vm2386_vm11, %v2377_v34 }
 0x94a   : > { %v2118_v11 = vsub.f32 %v2050_v43, %v4804_v6 }
 0x94c   : > { %v2186_v10 = vadd.f32 %v5585_v49, %v2118_v11 }
 0x94e   : > { %v2314_v18 = vmul.f32 0.2, %v2186_v10  ;;  %vm2250_vm15 = vcmp.ge.f32.partialorder %v2186_v10, 0.0  ;;  %v5783_v11 = vpop.f32.mrf.mxu0 }
 0x950   : > { %v2378_v19 = vsel %vm2250_vm15, %v2186_v10, %v2314_v18 }
 0x951   : > { %4113 = vmatmul.msk.f32.gmra.mxu3 %vm2386_vm11, %v2378_v19 }
 0x998   : > { %v2053_v61 = vpop.f32.mrf.mxu2 }
 0x999   : > { %v2119_v22 = vsub.f32 %v2053_v61, %v4814_v29 }
 0x99b   : > { %v2187_v17 = vadd.f32 %v5585_v49, %v2119_v22  ;;  %v5787_v22 = vpop.f32.mrf.mxu0 }
 0x99d   : > { %v2315_v33 = vmul.f32 0.2, %v2187_v17  ;;  %vm2251_vm1 = vcmp.ge.f32.partialorder %v2187_v17, 0.0 }
 0x99f   : > { %v2379_v30 = vsel %vm2251_vm1, %v2187_v17, %v2315_v33 }
 0x9a0   : > { %4114 = vmatmul.msk.f32.gmra.mxu3 %vm2386_vm11, %v2379_v30 }
 0x9a3   : > { %v5789_v17 = vpop.f32.mrf.mxu0 }
 0x9a4   : > { %v2764_v3 = vpop.f32.mrf.mxu3 }
 0x9a5   : > { %v2765_v6 = vadd.f32 %v5678_v54, %v2764_v3 }
 0x9a7   : > { %vm2844_vm4 = vcmp.ge.f32.partialorder %v2765_v6, 0.0  ;;  %v2908_v8 = vmul.f32 0.2, %v2765_v6 }
 0x9a9   : > { %v2972_v13 = vsel %vm2844_vm4, %v2765_v6, %v2908_v8  ;;  %v5799_v8 = vpop.f32.mrf.mxu1 }
 0x9aa   : > { %4171 = vmatmul.msk.f32.gmra.mxu1 %vm2386_vm11, %v2972_v13  ;;  %v3196_v13 = vadd.f32 %v5531_v52, %v5230_v42  ;;  %v3220_v42 = vadd.f32 %v5531_v52, %v5332_v51 }
 0x9ab   : > { %v5791_v33 = vpop.f32.mrf.mxu0 }
 0x9ac   : > { %v2767_v47 = vpop.f32.mrf.mxu3  ;;  %vm3387_vm10 = vcmp.ge.f32.partialorder %v3196_v13, 0.0  ;;  %v3459_v51 = vmul.f32 0.2, %v3220_v42  ;;  %vm3395_vm15 = vcmp.ge.f32.partialorder %v3220_v42, 0.0 }
 0x9ad   : > { %v2768_v63 = vadd.f32 %v5678_v54, %v2767_v47  ;;  %v3199_v47 = vadd.f32 %v5531_v52, %v5249_v31  ;;  %v3223_v31 = vadd.f32 %v5531_v52, %v5337_v20 }
 0x9af   : > { %vm2845_vm5 = vcmp.ge.f32.partialorder %v2768_v63, 0.0  ;;  %v2909_v29 = vmul.f32 0.2, %v2768_v63  ;;  %vm3388_vm12 = vcmp.ge.f32.partialorder %v3199_v47, 0.0  ;;  %v3460_v20 = vmul.f32 0.2, %v3223_v31 }
 0x9b0   : > { %vm3396_vm1 = vcmp.ge.f32.partialorder %v3223_v31, 0.0 }
 0x9b1   : > { %v2973_v60 = vsel %vm2845_vm5, %v2768_v63, %v2909_v29  ;;  %v3643_v63 = vld [vmem:[%s6028_s11] sm:$0xff]  ;;  %v3451_v29 = vmul.f32 0.2, %v3196_v13  ;;  %v5818_v16 = vpop.f32.mrf.mxu1 }
 0x9b2   : > { %4172 = vmatmul.msk.f32.gmra.mxu1 %vm2386_vm11, %v2973_v60  ;;  %v3452_v60 = vmul.f32 0.2, %v3199_v47 }
 0x9b3   : > { %v5793_v30 = vpop.f32.mrf.mxu0  ;;  %3688 = vmatpush.msra.mxu1 %v3643_v63 }
 0x9b4   : > { %v2770_v49 = vpop.f32.mrf.mxu3 }
 0x9b5   : > { %v2771_v21 = vadd.f32 %v5678_v54, %v2770_v49  ;;  %v3202_v49 = vadd.f32 %v5531_v52, %v5257_v4  ;;  %v3244_v4 = vadd.f32 %v5531_v52, %v5371_v45 }
 0x9b7   : > { %vm2846_vm6 = vcmp.ge.f32.partialorder %v2771_v21, 0.0  ;;  %v2910_v25 = vmul.f32 0.2, %v2771_v21  ;;  %vm3389_vm13 = vcmp.ge.f32.partialorder %v3202_v49, 0.0  ;;  %v3467_v45 = vmul.f32 0.2, %v3244_v4 }
 0x9b8   : > { %vm3403_vm5 = vcmp.ge.f32.partialorder %v3244_v4, 0.0 }
 0x9b9   : > { %v2974_v26 = vsel %vm2846_vm6, %v2771_v21, %v2910_v25  ;;  %v3205_v21 = vadd.f32 %v5531_v52, %v5266_v5 }
 0x9ba   : > { %4173 = vmatmul.msk.f32.gmra.mxu1 %vm2386_vm11, %v2974_v26  ;;  %v3226_v26 = vadd.f32 %v5531_v52, %v5340_v27  ;;  %v3268_v27 = vadd.f32 %v5531_v52, %v5452_v44  ;;  %v3523_v44 = vsel %vm3395_vm15, %v3220_v42, %v3459_v51 }
 0x9bb   : > { %v5795_v3 = vpop.f32.mrf.mxu0  ;;  %v3454_v5 = vmul.f32 0.2, %v3205_v21  ;;  %vm3390_vm14 = vcmp.ge.f32.partialorder %v3205_v21, 0.0 }
 0x9bc   : > { %v2773_v23 = vpop.f32.mrf.mxu3  ;;  %vm3397_vm4 = vcmp.ge.f32.partialorder %v3226_v26, 0.0 }
 0x9bd   : > { %v2774_v1 = vadd.f32 %v5678_v54, %v2773_v23  ;;  %v3515_v23 = vsel %vm3387_vm10, %v3196_v13, %v3451_v29  ;;  %v3271_v29 = vadd.f32 %v5531_v52, %v5454_v0 }
 0x9be   : > { %v3579_v63 = vadd.f32 %v3523_v44, %v3515_v23 }
 0x9bf   : > { %vm2847_vm7 = vcmp.ge.f32.partialorder %v2774_v1, 0.0  ;;  %v2911_v35 = vmul.f32 0.2, %v2774_v1  ;;  %vm3412_vm10 = vcmp.ge.f32.partialorder %v3271_v29, 0.0 }
 0x9c1   : > { %v2975_v2 = vsel %vm2847_vm7, %v2774_v1, %v2911_v35  ;;  %v3516_v1 = vsel %vm3388_vm12, %v3199_v47, %v3452_v60  ;;  %v3453_v35 = vmul.f32 0.2, %v3202_v49  ;;  %vm3411_vm7 = vcmp.ge.f32.partialorder %v3268_v27, 0.0 }
 0x9c2   : > { %4174 = vmatmul.msk.f32.gmra.mxu1 %vm2386_vm11, %v2975_v2  ;;  %v5824_v2 = vadd.f32 %v5531_v52, %v5271_v53  ;;  %v3292_v53 = vadd.f32 %v5531_v52, %v5510_v48  ;;  %v3531_v48 = vsel %vm3403_vm5, %v3244_v4, %v3467_v45 }
 0x9c3   : > { %v5797_v6 = vpop.f32.mrf.mxu0 }
 0x9c4   : > { %v2776_v41 = vpop.f32.mrf.mxu3  ;;  %v3483_v13 = vmul.f32 0.2, %v3292_v53 }
 0x9c5   : > { %v2777_v58 = vadd.f32 %v5678_v54, %v2776_v41  ;;  %v3461_v41 = vmul.f32 0.2, %v3226_v26 }
 0x9c7   : > { %vm2848_vm8 = vcmp.ge.f32.partialorder %v2777_v58, 0.0  ;;  %v2912_v14 = vmul.f32 0.2, %v2777_v58 }
 0x9c9   : > { %v2976_v59 = vsel %vm2848_vm8, %v2777_v58, %v2912_v14  ;;  %v3229_v58 = vadd.f32 %v5531_v52, %v5342_v40  ;;  %v3247_v14 = vadd.f32 %v5531_v52, %v5387_v9  ;;  %v3316_v40 = vadd.f32 %v5531_v52, %v5778_v46 }
 0x9ca   : > { %4175 = vmatmul.msk.f32.gmra.mxu1 %vm2386_vm11, %v2976_v59  ;;  %v3517_v59 = vsel %vm3389_vm13, %v3202_v49, %v3453_v35 }
 0x9cb   : > { %v3339_v25 = vpop.f32.mrf.mxu0  ;;  %vm3398_vm6 = vcmp.ge.f32.partialorder %v3229_v58, 0.0  ;;  %vm3404_vm8 = vcmp.ge.f32.partialorder %v3247_v14, 0.0 }
 0x9cc   : > { %v2779_v36 = vpop.f32.mrf.mxu3  ;;  %v3340_v47 = vadd.f32 %v5531_v52, %v3339_v25 }
 0x9cd   : > { %v2780_v50 = vadd.f32 %v5678_v54, %v2779_v36  ;;  %v3518_v36 = vsel %vm3390_vm14, %v3205_v21, %v3454_v5  ;;  %v3491_v21 = vmul.f32 0.2, %v3316_v40 }
 0x9ce   : > { %v3499_v35 = vmul.f32 0.2, %v3340_v47  ;;  %vm3435_vm12 = vcmp.ge.f32.partialorder %v3340_v47, 0.0 }
 0x9cf   : > { %vm2849_vm0 = vcmp.ge.f32.partialorder %v2780_v50, 0.0  ;;  %v2913_v34 = vmul.f32 0.2, %v2780_v50 }
 0x9d1   : > { %v2977_v43 = vsel %vm2849_vm0, %v2780_v50, %v2913_v34  ;;  %v5836_v50 = vmul.f32 0.2, %v5824_v2  ;;  %v3524_v34 = vsel %vm3396_vm1, %v3223_v31, %v3460_v20  ;;  %vm3419_vm0 = vcmp.ge.f32.partialorder %v3292_v53, 0.0 }
 0x9d2   : > { %4176 = vmatmul.msk.f32.gmra.mxu1 %vm2386_vm11, %v2977_v43  ;;  %v3475_v43 = vmul.f32 0.2, %v3268_v27  ;;  %v3580_v60 = vadd.f32 %v3524_v34, %v3516_v1  ;;  %v3587_v31 = vadd.f32 %v3579_v63, %v3531_v48  ;;  %v3547_v23 = vsel %vm3419_vm0, %v3292_v53, %v3483_v13 }
 0x9d3   : > { %v3342_v9 = vpop.f32.mrf.mxu0  ;;  %v3476_v1 = vmul.f32 0.2, %v3271_v29  ;;  %v3319_v20 = vadd.f32 %v5531_v52, %v5783_v11  ;;  %v3563_v53 = vsel %vm3435_vm12, %v3340_v47, %v3499_v35 }
 0x9d4   : > { %v2782_v10 = vpop.f32.mrf.mxu3  ;;  %v3539_v49 = vsel %vm3411_vm7, %v3268_v27, %v3475_v43 }
 0x9d5   : > { %v2783_v18 = vadd.f32 %v5678_v54, %v2782_v10  ;;  %v3525_v10 = vsel %vm3397_vm4, %v3226_v26, %v3461_v41  ;;  %v3295_v26 = vadd.f32 %v5531_v52, %v5516_v15  ;;  %v3595_v0 = vadd.f32 %v3587_v31, %v3539_v49 }
 0x9d6   : > { %v5845_v46 = vadd.f32 %v3525_v10, %v3517_v59  ;;  %v3250_v15 = vadd.f32 %v5531_v52, %v5408_v55  ;;  %vm3428_vm4 = vcmp.ge.f32.partialorder %v3319_v20, 0.0 }
 0x9d7   : > { %vm2850_vm9 = vcmp.ge.f32.partialorder %v2783_v18, 0.0  ;;  %v2914_v19 = vmul.f32 0.2, %v2783_v18  ;;  %v3484_v45 = vmul.f32 0.2, %v3295_v26  ;;  %vm3420_vm14 = vcmp.ge.f32.partialorder %v3295_v26, 0.0 }
 0x9d8   : > { %vm3405_vm1 = vcmp.ge.f32.partialorder %v3250_v15, 0.0 }
 0x9d9   : > { %v2978_v61 = vsel %vm2850_vm9, %v2783_v18, %v2914_v19  ;;  %v3462_v18 = vmul.f32 0.2, %v3229_v58  ;;  %v5840_v19 = vpop.f32.mrf.mxu1  ;;  %vm3427_vm9 = vcmp.ge.f32.partialorder %v3316_v40, 0.0  ;;  %v3548_v48 = vsel %vm3420_vm14, %v3295_v26, %v3484_v45 }
 0x9da   : > { %4177 = vmatmul.msk.f32.gmra.mxu1 %vm2386_vm11, %v2978_v61  ;;  %v3468_v61 = vmul.f32 0.2, %v3247_v14  ;;  %v3555_v51 = vsel %vm3427_vm9, %v3316_v40, %v3491_v21  ;;  %v3492_v40 = vmul.f32 0.2, %v3319_v20 }
 0x9db   : > { %v3526_v42 = vsel %vm3398_vm6, %v3229_v58, %v3462_v18  ;;  %v3603_v58 = vadd.f32 %v3595_v0, %v3547_v23  ;;  %v3345_v55 = vpop.f32.mrf.mxu0  ;;  %v3469_v18 = vmul.f32 0.2, %v3250_v15 }
 0x9dc   : > { %v3532_v25 = vsel %vm3404_vm8, %v3247_v14, %v3468_v61  ;;  %v5853_v41 = vadd.f32 %v3526_v42, %v3518_v36  ;;  %v3540_v36 = vsel %vm3412_vm10, %v3271_v29, %v3476_v1  ;;  %v3556_v21 = vsel %vm3428_vm4, %v3319_v20, %v3492_v40 }
 0x9dd   : > { %v3588_v34 = vadd.f32 %v3580_v60, %v3532_v25  ;;  %v3611_v43 = vadd.f32 %v3603_v58, %v3555_v51  ;;  %v3533_v31 = vsel %vm3405_vm1, %v3250_v15, %v3469_v18  ;;  %vm3391_vm8 = vcmp.ge.f32.partialorder %v5824_v2, 0.0 }
 0x9de   : > { %v3589_v20 = vadd.f32 %v5845_v46, %v3533_v31  ;;  %v3519_v31 = vsel %vm3391_vm8, %v5824_v2, %v5836_v50 }
 0x9df   : > { %v3596_v29 = vadd.f32 %v3588_v34, %v3540_v36 }
 0x9e3   : > { %v3348_v15 = vpop.f32.mrf.mxu0 }
 0xa23   : > { %v2785_v4 = vpop.f32.mrf.mxu3 }
 0xa24   : > { %v2786_v5 = vadd.f32 %v5678_v54, %v2785_v4  ;;  %v5860_v54 = vld [vmem:[%s6027_s10] ss:$0 sm:$0xff] }
 0xa25   : > { %v3343_v59 = vadd.f32 %v5860_v54, %v3342_v9  ;;  %v3274_v52 = vadd.f32 %v5860_v54, %v5456_v28  ;;  %v3619_v9 = vadd.f32 %v3611_v43, %v3563_v53  ;;  %v3298_v61 = vadd.f32 %v5860_v54, %v5521_v39 }
 0xa26   : > { %vm2851_vm13 = vcmp.ge.f32.partialorder %v2786_v5, 0.0  ;;  %v2915_v27 = vmul.f32 0.2, %v2786_v5  ;;  %v3253_v63 = vadd.f32 %v5860_v54, %v5426_v12  ;;  %v5874_v28 = vadd.f32 %v5860_v54, %v5344_v7 }
 0xa27   : > { %v3363_v14 = vpop.f32.mrf.mxu1  ;;  %v3500_v13 = vmul.f32 0.2, %v3343_v59  ;;  %vm3436_vm5 = vcmp.ge.f32.partialorder %v3343_v59, 0.0  ;;  %v3477_v49 = vmul.f32 0.2, %v3274_v52  ;;  %v3322_v42 = vadd.f32 %v5860_v54, %v5787_v22 }
 0xa28   : > { %v3364_v11 = vadd.f32 %v5860_v54, %v3363_v14  ;;  %v2979_v44 = vsel %vm2851_vm13, %v2786_v5, %v2915_v27  ;;  %vm3413_vm6 = vcmp.ge.f32.partialorder %v3274_v52, 0.0  ;;  %v3604_v39 = vadd.f32 %v3596_v29, %v3548_v48 }
 0xa29   : > { %4178 = vmatmul.msk.f32.gmra.mxu1 %vm2386_vm11, %v2979_v44  ;;  %v3485_v25 = vmul.f32 0.2, %v3298_v61  ;;  %v3564_v12 = vsel %vm3436_vm5, %v3343_v59, %v3500_v13  ;;  %v3346_v23 = vadd.f32 %v5860_v54, %v3345_v55  ;;  %v3470_v5 = vmul.f32 0.2, %v3253_v63 }
 0xa2a   : > { %vm3443_vm15 = vcmp.ge.f32.partialorder %v3364_v11, 0.0  ;;  %v3507_v10 = vmul.f32 0.2, %v3364_v11  ;;  %v3277_v7 = vadd.f32 %v5860_v54, %v5458_v37  ;;  %vm3421_vm7 = vcmp.ge.f32.partialorder %v3298_v61, 0.0 }
 0xa2b   : > { %v3612_v0 = vadd.f32 %v3604_v39, %v3556_v21  ;;  %v3541_v22 = vsel %vm3413_vm6, %v3274_v52, %v3477_v49  ;;  %v3493_v1 = vmul.f32 0.2, %v3322_v42  ;;  %vm3399_vm9 = vcmp.ge.f32.partialorder %v5874_v28, 0.0  ;;  %v6045_v49 = vld [vmem:[#allocation10_spill] sm:$0xff] }
 0xa2c   : > { %v3571_v47 = vsel %vm3443_vm15, %v3364_v11, %v3507_v10  ;;  %vm3406_vm10 = vcmp.ge.f32.partialorder %v3253_v63, 0.0  ;;  %vm3429_vm12 = vcmp.ge.f32.partialorder %v3322_v42, 0.0  ;;  %v3549_v58 = vsel %vm3421_vm7, %v3298_v61, %v3485_v25 }
 0xa2d   : > { %v3627_v60 = vadd.f32 %v3619_v9, %v3571_v47  ;;  %v3620_v27 = vadd.f32 %v3612_v0, %v3564_v12  ;;  %v3301_v37 = vadd.f32 %v5860_v54, %v5526_v57  ;;  %v3501_v45 = vmul.f32 0.2, %v3346_v23 }
 0xa2e   : > { %v3597_v53 = vadd.f32 %v3589_v20, %v3541_v22  ;;  %v3478_v59 = vmul.f32 0.2, %v3277_v7  ;;  %vm3437_vm13 = vcmp.ge.f32.partialorder %v3346_v23, 0.0  ;;  %v3534_v44 = vsel %vm3406_vm10, %v3253_v63, %v3470_v5  ;;  %v3716_v20 = vld [vmem:[%s6030_s13 + $0x10] sm:$0xff] }
 0xa2f   : > { %v3635_v26 = vmul.f32 0.125, %v3627_v60  ;;  %v3366_v4 = vpop.f32.mrf.mxu1  ;;  %vm3414_vm14 = vcmp.ge.f32.partialorder %v3277_v7, 0.0  ;;  %v3557_v34 = vsel %vm3429_vm12, %v3322_v42, %v3493_v1  ;;  %v3325_v46 = vadd.f32 %v5860_v54, %v5789_v17 }
 0xa30   : > { %v3367_v35 = vadd.f32 %v5860_v54, %v3366_v4  ;;  %v3463_v36 = vmul.f32 0.2, %v5874_v28  ;;  %v3256_v43 = vadd.f32 %v5860_v54, %v5435_v32  ;;  %v3605_v55 = vadd.f32 %v3597_v53, %v3549_v58  ;;  %v6046_v53 = vld [vmem:[#allocation2_spill] sm:$0xff] }
 0xa31   : > { %4179 = vmatmul.msk.f32.vlgmr.msra.gmra.mxu1 %vm2386_vm11, %v3635_v26  ;;  %v3486_v40 = vmul.f32 0.2, %v3301_v37  ;;  %v3565_v10 = vsel %vm3437_vm13, %v3346_v23, %v3501_v45  ;;  %v3349_v18 = vadd.f32 %v5860_v54, %v3348_v15  ;;  %v3590_v48 = vadd.f32 %v5853_v41, %v3534_v44 }
 0xa32   : > { %vm3444_vm0 = vcmp.ge.f32.partialorder %v3367_v35, 0.0  ;;  %v3508_v51 = vmul.f32 0.2, %v3367_v35  ;;  %v3542_v61 = vsel %vm3414_vm14, %v3277_v7, %v3478_v59  ;;  %vm3422_vm15 = vcmp.ge.f32.partialorder %v3301_v37, 0.0 }
 0xa33   : > { %v3613_v13 = vadd.f32 %v3605_v55, %v3557_v34  ;;  %v3280_v17 = vadd.f32 %v5860_v54, %v5470_v62  ;;  %v3494_v32 = vmul.f32 0.2, %v3325_v46  ;;  %vm3407_vm4 = vcmp.ge.f32.partialorder %v3256_v43, 0.0  ;;  %v3351_v62 = vpop.f32.mrf.mxu0 }
 0xa34   : > { %v3572_v14 = vsel %vm3444_vm0, %v3367_v35, %v3508_v51  ;;  %v3471_v63 = vmul.f32 0.2, %v3256_v43  ;;  %vm3430_vm5 = vcmp.ge.f32.partialorder %v3325_v46, 0.0  ;;  %v3550_v60 = vsel %vm3422_vm15, %v3301_v37, %v3486_v40  ;;  %v6048_v40 = vld [vmem:[#allocation6_spill] sm:$0xff] }
 0xa35   : > { %v3628_v11 = vadd.f32 %v3620_v27, %v3572_v14  ;;  %v3621_v29 = vadd.f32 %v3613_v13, %v3565_v10  ;;  %v3304_v21 = vadd.f32 %v5860_v54, %v6045_v49  ;;  %v3502_v41 = vmul.f32 0.2, %v3349_v18  ;;  %v3715_v14 = vld [vmem:[%s6030_s13 + $0x8] sm:$0xff] }
 0xa36   : > { %v3598_v39 = vadd.f32 %v3590_v48, %v3542_v61  ;;  %vm3438_vm6 = vcmp.ge.f32.partialorder %v3349_v18, 0.0  ;;  %v3527_v4 = vsel %vm3399_vm9, %v5874_v28, %v3463_v36  ;;  %v3479_v25 = vmul.f32 0.2, %v3280_v17 }
 0xa37   : > { %v3636_v52 = vmul.f32 0.125, %v3628_v11  ;;  %v3369_v57 = vpop.f32.mrf.mxu1  ;;  %v3558_v12 = vsel %vm3430_vm5, %v3325_v46, %v3494_v32  ;;  %v3328_v23 = vadd.f32 %v5860_v54, %v5791_v33  ;;  %v3535_v35 = vsel %vm3407_vm4, %v3256_v43, %v3471_v63  ;;  %v3717_v33 = vld [vmem:[%s6030_s13 + $0x18] sm:$0xff]  ;;  %v6047_v46 = vld [vmem:[#allocation4_spill] sm:$0xff] }
 0xa38   : > { %v3370_v9 = vadd.f32 %v5860_v54, %v3369_v57  ;;  %vm3415_vm7 = vcmp.ge.f32.partialorder %v3280_v17, 0.0  ;;  %v3606_v5 = vadd.f32 %v3598_v39, %v3550_v60  ;;  %v3487_v2 = vmul.f32 0.2, %v3304_v21  ;;  %3734 = vmatpush.msrb.mxu1 %v3717_v33 }
 0xa39   : > { %4180 = vmatmul.msk.f32.gmra.mxu1 %vm2386_vm11, %v3636_v52  ;;  %v3566_v50 = vsel %vm3438_vm6, %v3349_v18, %v3502_v41  ;;  %v3352_v22 = vadd.f32 %v5860_v54, %v3351_v62  ;;  %v3583_v51 = vadd.f32 %v3527_v4, %v3519_v31  ;;  %vm3423_vm8 = vcmp.ge.f32.partialorder %v3304_v21, 0.0 }
 0xa3a   : > { %vm3445_vm1 = vcmp.ge.f32.partialorder %v3370_v9, 0.0  ;;  %v3509_v47 = vmul.f32 0.2, %v3370_v9  ;;  %v3614_v28 = vadd.f32 %v3606_v5, %v3558_v12  ;;  %v3543_v27 = vsel %vm3415_vm7, %v3280_v17, %v3479_v25  ;;  %3735 = vmatpush.msrb.mxu1 %v3716_v20 }
 0xa3b   : > { %v3495_v15 = vmul.f32 0.2, %v3328_v23  ;;  %v3591_v37 = vadd.f32 %v3583_v51, %v3535_v35  ;;  %vm3431_vm9 = vcmp.ge.f32.partialorder %v3328_v23, 0.0  ;;  %v3214_v59 = vadd.f32 %v5860_v54, %v6046_v53 }
 0xa3c   : > { %v3573_v42 = vsel %vm3445_vm1, %v3370_v9, %v3509_v47  ;;  %v3622_v45 = vadd.f32 %v3614_v28, %v3566_v50  ;;  %v3551_v11 = vsel %vm3423_vm8, %v3304_v21, %v3487_v2  ;;  %v3503_v44 = vmul.f32 0.2, %v3352_v22  ;;  %3736 = vmatpush.msrb.mxu1 %v3715_v14 }
 0xa3d   : > { %v3629_v26 = vadd.f32 %v3621_v29, %v3573_v42  ;;  %v3238_v36 = vadd.f32 %v5860_v54, %v6047_v46  ;;  %v3599_v43 = vadd.f32 %v3591_v37, %v3543_v27  ;;  %vm3439_vm10 = vcmp.ge.f32.partialorder %v3352_v22, 0.0 }
 0xa3e   : > { %v3559_v52 = vsel %vm3431_vm9, %v3328_v23, %v3495_v15  ;;  %v3331_v57 = vadd.f32 %v5860_v54, %v5793_v30  ;;  %v3262_v10 = vadd.f32 %v5860_v54, %v6048_v40  ;;  %v3567_v61 = vsel %vm3439_vm10, %v3352_v22, %v3503_v44  ;;  %v6049_v30 = vld [vmem:[#allocation8_spill] sm:$0xff]  ;;  %v6051_v40 = vld [vmem:[#allocation3_spill] sm:$0xff] }
 0xa3f   : > { %v3637_v7 = vmul.f32 0.125, %v3629_v26  ;;  %v3372_v0 = vpop.f32.mrf.mxu1  ;;  %v3607_v18 = vadd.f32 %v3599_v43, %v3551_v11  ;;  %v3355_v13 = vadd.f32 %v5860_v54, %v5799_v8  ;;  %vm3393_vm12 = vcmp.ge.f32.partialorder %v3214_v59, 0.0 }
 0xa40   : > { %v3373_v1 = vadd.f32 %v5860_v54, %v3372_v0  ;;  %v3457_v32 = vmul.f32 0.2, %v3214_v59  ;;  %v3465_v47 = vmul.f32 0.2, %v3238_v36  ;;  %v3286_v29 = vadd.f32 %v5860_v54, %v6049_v30 }
 0xa41   : > { %4181 = vmatmul.msk.f32.gmra.mxu1 %vm2386_vm11, %v3637_v7  ;;  %v3615_v63 = vadd.f32 %v3607_v18, %v3559_v52  ;;  %v3496_v60 = vmul.f32 0.2, %v3331_v57  ;;  %vm3401_vm14 = vcmp.ge.f32.partialorder %v3238_v36, 0.0  ;;  %v3473_v21 = vmul.f32 0.2, %v3262_v10  ;;  %v6050_v52 = vld [vmem:[#allocation5_spill] sm:$0xff] }
 0xa42   : > { %vm3446_vm0 = vcmp.ge.f32.partialorder %v3373_v1, 0.0  ;;  %v3510_v58 = vmul.f32 0.2, %v3373_v1  ;;  %vm3432_vm15 = vcmp.ge.f32.partialorder %v3331_v57, 0.0  ;;  %vm3409_vm1 = vcmp.ge.f32.partialorder %v3262_v10, 0.0  ;;  %v6052_v18 = vld [vmem:[#allocation7_spill] sm:$0xff] }
 0xa43   : > { %v3623_v41 = vadd.f32 %v3615_v63, %v3567_v61  ;;  %v3310_v8 = vadd.f32 %v5860_v54, %v5767_v56  ;;  %v3504_v42 = vmul.f32 0.2, %v3355_v13  ;;  %vm3440_vm4 = vcmp.ge.f32.partialorder %v3355_v13, 0.0  ;;  %v6053_v61 = vld [vmem:[#allocation9_spill] sm:$0xff] }
 0xa44   : > { %v3574_v34 = vsel %vm3446_vm0, %v3373_v1, %v3510_v58  ;;  %v3529_v62 = vsel %vm3401_vm14, %v3238_v36, %v3465_v47  ;;  %v3481_v26 = vmul.f32 0.2, %v3286_v29  ;;  %v3560_v4 = vsel %vm3432_vm15, %v3331_v57, %v3496_v60 }
 0xa45   : > { %v3630_v55 = vadd.f32 %v3622_v45, %v3574_v34  ;;  %v3334_v25 = vadd.f32 %v5860_v54, %v5795_v3  ;;  %v3521_v12 = vsel %vm3393_vm12, %v3214_v59, %v3457_v32  ;;  %v3537_v23 = vsel %vm3409_vm1, %v3262_v10, %v3473_v21 }
 0xa46   : > { %vm3417_vm5 = vcmp.ge.f32.partialorder %v3286_v29, 0.0  ;;  %v3489_v7 = vmul.f32 0.2, %v3310_v8  ;;  %v3568_v0 = vsel %vm3440_vm4, %v3355_v13, %v3504_v42  ;;  %v3358_v56 = vadd.f32 %v5860_v54, %v5818_v16 }
 0xa47   : > { %v3638_v9 = vmul.f32 0.125, %v3630_v55  ;;  %v3375_v48 = vpop.f32.mrf.mxu1  ;;  %v3585_v50 = vadd.f32 %v3529_v62, %v3521_v12  ;;  %vm3425_vm6 = vcmp.ge.f32.partialorder %v3310_v8, 0.0  ;;  %v3616_v22 = vadd.f32 %v5544_v38, %v3560_v4  ;;  %v3714_v55 = vld [vmem:[%s6030_s13] sm:$0xff] }
 0xa48   : > { %v3376_v17 = vadd.f32 %v5860_v54, %v3375_v48  ;;  %v3545_v3 = vsel %vm3417_vm5, %v3286_v29, %v3481_v26  ;;  %v3497_v1 = vmul.f32 0.2, %v3334_v25  ;;  %vm3433_vm8 = vcmp.ge.f32.partialorder %v3334_v25, 0.0  ;;  %3737 = vmatpush.msrb.mxu1 %v3714_v55 }
 0xa49   : > { %4182 = vmatmul.msk.f32.gmra.mxu1 %vm2386_vm11, %v3638_v9  ;;  %v3593_v28 = vadd.f32 %v3585_v50, %v3537_v23  ;;  %v3624_v33 = vadd.f32 %v3616_v22, %v3568_v0  ;;  %v3553_v20 = vsel %vm3425_vm6, %v3310_v8, %v3489_v7  ;;  %v3505_v27 = vmul.f32 0.2, %v3358_v56  ;;  %v4233_v50 = vld [vmem:[%s4447_s23 + $0x8] sm:$0xff]  ;;  %v4235_v22 = vld [vmem:[%s4447_s23 + $0x18] sm:$0xff] }
 0xa4a   : > { %vm3447_vm13 = vcmp.ge.f32.partialorder %v3376_v17, 0.0  ;;  %v3511_v49 = vmul.f32 0.2, %v3376_v17  ;;  %vm3441_vm0 = vcmp.ge.f32.partialorder %v3358_v56, 0.0  ;;  %v3561_v37 = vsel %vm3433_vm8, %v3334_v25, %v3497_v1  ;;  %v4237_v1 = vld [vmem:[%s4447_s23 + $0x28] sm:$0xff] }
 0xa4b   : > { %v3601_v58 = vadd.f32 %v3593_v28, %v3545_v3  ;;  %v3569_v38 = vsel %vm3441_vm0, %v3358_v56, %v3505_v27  ;;  %v3241_v57 = vadd.f32 %v5860_v54, %v6050_v52  ;;  %v3217_v10 = vadd.f32 %v5860_v54, %v6051_v40  ;;  %v4236_v3 = vld [vmem:[%s4447_s23 + $0x20] sm:$0xff] }
 0xa4c   : > { %v3575_v31 = vsel %vm3447_vm13, %v3376_v17, %v3511_v49  ;;  %v3265_v9 = vadd.f32 %v5860_v54, %v6052_v18  ;;  %v3289_v13 = vadd.f32 %v5860_v54, %v6053_v61  ;;  %v3313_v47 = vadd.f32 %v5860_v54, %v5774_v24 }
 0xa4d   : > { %v3631_v39 = vadd.f32 %v3623_v41, %v3575_v31  ;;  %v3609_v45 = vadd.f32 %v3601_v58, %v3553_v20  ;;  %v3466_v48 = vmul.f32 0.2, %v3241_v57  ;;  %vm3402_vm10 = vcmp.ge.f32.partialorder %v3241_v57, 0.0 }
 0xa4e   : > { %v3458_v17 = vmul.f32 0.2, %v3217_v10  ;;  %v3474_v32 = vmul.f32 0.2, %v3265_v9  ;;  %vm3394_vm12 = vcmp.ge.f32.partialorder %v3217_v10, 0.0  ;;  %vm3410_vm13 = vcmp.ge.f32.partialorder %v3265_v9, 0.0 }
 0xa4f   : > { %v3639_v35 = vmul.f32 0.125, %v3631_v39  ;;  %v3378_v5 = vpop.f32.mrf.mxu1  ;;  %v3617_v11 = vadd.f32 %v3609_v45, %v3561_v37  ;;  %v3530_v63 = vsel %vm3402_vm10, %v3241_v57, %v3466_v48  ;;  %v3482_v30 = vmul.f32 0.2, %v3289_v13 }
 0xa50   : > { %v3379_v2 = vadd.f32 %v5860_v54, %v3378_v5  ;;  %v3337_v29 = vadd.f32 %v5860_v54, %v5797_v6  ;;  %vm3418_vm14 = vcmp.ge.f32.partialorder %v3289_v13, 0.0  ;;  %v3522_v60 = vsel %vm3394_vm12, %v3217_v10, %v3458_v17 }
 0xa51   : > { %4183 = vmatmul.msk.f32.gmra.mxu1 %vm2386_vm11, %v3639_v35  ;;  %v3625_v34 = vadd.f32 %v3617_v11, %v3569_v38  ;;  %v3538_v49 = vsel %vm3410_vm13, %v3265_v9, %v3474_v32  ;;  %v3490_v21 = vmul.f32 0.2, %v3313_v47  ;;  %v3361_v41 = vadd.f32 %v5860_v54, %v5840_v19 }
 0xa52   : > { %vm3448_vm7 = vcmp.ge.f32.partialorder %v3379_v2, 0.0  ;;  %v3512_v51 = vmul.f32 0.2, %v3379_v2  ;;  %v3586_v8 = vadd.f32 %v3530_v63, %v3522_v60  ;;  %vm3426_vm15 = vcmp.ge.f32.partialorder %v3313_v47, 0.0 }
 0xa53   : > { %v3546_v42 = vsel %vm3418_vm14, %v3289_v13, %v3482_v30  ;;  %v3498_v31 = vmul.f32 0.2, %v3337_v29  ;;  %vm3434_vm1 = vcmp.ge.f32.partialorder %v3337_v29, 0.0  ;;  %v3554_v24 = vsel %vm3426_vm15, %v3313_v47, %v3490_v21 }
 0xa54   : > { %v3576_v15 = vsel %vm3448_vm7, %v3379_v2, %v3512_v51  ;;  %v3594_v39 = vadd.f32 %v3586_v8, %v3538_v49  ;;  %v3506_v62 = vmul.f32 0.2, %v3361_v41  ;;  %vm3442_vm4 = vcmp.ge.f32.partialorder %v3361_v41, 0.0  ;;  %v4232_v2 = vld [vmem:[%s4447_s23] sm:$0xff]  ;;  %v4238_v51 = vld [vmem:[%s4447_s23 + $0x30] sm:$0xff] }
 0xa55   : > { %v3632_v16 = vadd.f32 %v3624_v33, %v3576_v15  ;;  %v3562_v6 = vsel %vm3434_vm1, %v3337_v29, %v3498_v31  ;;  %v4239_v33 = vld [vmem:[%s4447_s23 + $0x38] sm:$0xff] }
 0xa56   : > { %v3602_v26 = vadd.f32 %v3594_v39, %v3546_v42  ;;  %v3570_v12 = vsel %vm3442_vm4, %v3361_v41, %v3506_v62 }
 0xa57   : > { %v3640_v14 = vmul.f32 0.125, %v3632_v16  ;;  %v3381_v53 = vpop.f32.mrf.mxu1 }
 0xa58   : > { %v3382_v59 = vadd.f32 %v5860_v54, %v3381_v53  ;;  %v3610_v4 = vadd.f32 %v3602_v26, %v3554_v24  ;;  %v4226_v53 = vld [vmem:[%s6031_s14] ss:$0 sm:$0xff] }
 0xa59   : > { %4184 = vmatmul.msk.f32.gmra.mxu1 %vm2386_vm11, %v3640_v14  ;;  %v4225_v14 = vld [vmem:[%s6029_s12] ss:$0 sm:$0xff] }
 0xa5a   : > { %vm3449_vm9 = vcmp.ge.f32.partialorder %v3382_v59, 0.0  ;;  %v3513_v44 = vmul.f32 0.2, %v3382_v59  ;;  %v3618_v23 = vadd.f32 %v3610_v4, %v3562_v6 }
 0xa5c   : > { %v3577_v46 = vsel %vm3449_vm9, %v3382_v59, %v3513_v44  ;;  %v3626_v5 = vadd.f32 %v3618_v23, %v3570_v12 }
 0xa5d   : > { %v3633_v36 = vadd.f32 %v3625_v34, %v3577_v46 }
 0xa5f   : > { %v3641_v43 = vmul.f32 0.125, %v3633_v36 }
 0xa61   : > { %4185 = vmatmul.msk.f32.gmra.mxu1 %vm2386_vm11, %v3641_v43 }
 0xaa6   : > { %v3384_v25 = vpop.f32.mrf.mxu1 }
 0xaa7   : > { %v3385_v19 = vadd.f32 %v5860_v54, %v3384_v25  ;;  %v4234_v54 = vld [vmem:[%s4447_s23 + $0x10] sm:$0xff] }
 0xaa9   : > { %vm3450_vm5 = vcmp.ge.f32.partialorder %v3385_v19, 0.0  ;;  %v3514_v35 = vmul.f32 0.2, %v3385_v19 }
 0xaab   : > { %v3578_v7 = vsel %vm3450_vm5, %v3385_v19, %v3514_v35 }
 0xaac   : > { %v3634_v0 = vadd.f32 %v3626_v5, %v3578_v7 }
 0xaae   : > { %v3642_v56 = vmul.f32 0.125, %v3634_v0  ;;  %v3690_v28 = vpop.f32.mrf.mxu1 }
 0xaaf   : > { %v3691_v59 = vadd.f32 %v4225_v14, %v3690_v28 }
 0xab0   : > { %4186 = vmatmul.msk.f32.gmra.mxu1 %vm2386_vm11, %v3642_v56 }
 0xab6   : > { %v3693_v20 = vpop.f32.mrf.mxu1 }
 0xab7   : > { %v3694_v43 = vadd.f32 %v4225_v14, %v3693_v20 }
 0xab8   : > { %4187 = vmatmul.msk.f32.vlgmr.msrb.gmra.mxu1 %vm539_vm3, %v4232_v2 }
 0xabe   : > { %v3696_v27 = vpop.f32.mrf.mxu1 }
 0xabf   : > { %v3697_v18 = vadd.f32 %v4225_v14, %v3696_v27 }
 0xac0   : > { %4188 = vmatmul.msk.f32.gmra.mxu1 %vm539_vm3, %v4233_v50 }
 0xac6   : > { %v3699_v15 = vpop.f32.mrf.mxu1 }
 0xac7   : > { %v3700_v32 = vadd.f32 %v4225_v14, %v3699_v15 }
 0xac8   : > { %4189 = vmatmul.msk.f32.gmra.mxu1 %vm539_vm3, %v4234_v54 }
 0xace   : > { %v3702_v58 = vpop.f32.mrf.mxu1 }
 0xacf   : > { %v3703_v49 = vadd.f32 %v4225_v14, %v3702_v58 }
 0xad0   : > { %4190 = vmatmul.msk.f32.gmra.mxu1 %vm539_vm3, %v4235_v22 }
 0xad6   : > { %v3705_v16 = vpop.f32.mrf.mxu1 }
 0xad7   : > { %v3706_v39 = vadd.f32 %v4225_v14, %v3705_v16 }
 0xad8   : > { %4191 = vmatmul.msk.f32.gmra.mxu1 %vm539_vm3, %v4236_v3 }
 0xade   : > { %v3708_v37 = vpop.f32.mrf.mxu1 }
 0xadf   : > { %v3709_v25 = vadd.f32 %v4225_v14, %v3708_v37 }
 0xae0   : > { %4192 = vmatmul.msk.f32.gmra.mxu1 %vm539_vm3, %v4237_v1 }
 0xae8   : > { %4193 = vmatmul.msk.f32.gmra.mxu1 %vm539_vm3, %v4238_v51 }
 0xaf0   : > { %4194 = vmatmul.msk.f32.gmra.mxu1 %vm539_vm3, %v4239_v33 }
 0xb2d   : > { %v3711_v45 = vpop.f32.mrf.mxu1 }
 0xb2e   : > { %v3712_v7 = vadd.f32 %v4225_v14, %v3711_v45 }
 0xb35   : > { %v3739_v38 = vpop.f32.mrf.mxu1 }
 0xb36   : > { %v3740_v11 = vadd.f32 %v4226_v53, %v3739_v38 }
 0xb38   : > { %v3763_v44 = vadd.f32 %v3740_v11, %v3691_v59 }
 0xb3a   : > { %vm3771_vm3 = vcmp.ge.f32.partialorder %v3763_v44, 0.0  ;;  %v3779_v34 = vmul.f32 0.2, %v3763_v44 }
 0xb3c   : > { %v3787_v46 = vsel %vm3771_vm3, %v3763_v44, %v3779_v34 }
 0xb3d   : > { %3795 = vst.msk [vmem:[%s5996_s19] sm:$0xff] %vm787_vm2, %v3787_v46  ;;  %v3742_v36 = vpop.f32.mrf.mxu1 }
 0xb3e   : > { %v3743_v55 = vadd.f32 %v4226_v53, %v3742_v36 }
 0xb40   : > { %v3764_v52 = vadd.f32 %v3743_v55, %v3694_v43 }
 0xb42   : > { %vm3772_vm11 = vcmp.ge.f32.partialorder %v3764_v52, 0.0  ;;  %v3780_v57 = vmul.f32 0.2, %v3764_v52 }
 0xb44   : > { %v3788_v40 = vsel %vm3772_vm11, %v3764_v52, %v3780_v57 }
 0xb45   : > { %3796 = vst.msk [vmem:[%s5996_s19 + $0x8] sm:$0xff] %vm787_vm2, %v3788_v40  ;;  %v3745_v10 = vpop.f32.mrf.mxu1 }
 0xb46   : > { %v3746_v9 = vadd.f32 %v4226_v53, %v3745_v10 }
 0xb48   : > { %v3765_v48 = vadd.f32 %v3746_v9, %v3697_v18 }
 0xb4a   : > { %vm3773_vm6 = vcmp.ge.f32.partialorder %v3765_v48, 0.0  ;;  %v3781_v61 = vmul.f32 0.2, %v3765_v48 }
 0xb4c   : > { %v3789_v13 = vsel %vm3773_vm6, %v3765_v48, %v3781_v61 }
 0xb4d   : > { %3797 = vst.msk [vmem:[%s5996_s19 + $0x10] sm:$0xff] %vm787_vm2, %v3789_v13  ;;  %v3748_v17 = vpop.f32.mrf.mxu1 }
 0xb4e   : > { %v3749_v47 = vadd.f32 %v4226_v53, %v3748_v17 }
 0xb50   : > { %v3766_v63 = vadd.f32 %v3749_v47, %v3700_v32 }
 0xb52   : > { %vm3774_vm7 = vcmp.ge.f32.partialorder %v3766_v63, 0.0  ;;  %v3782_v30 = vmul.f32 0.2, %v3766_v63 }
 0xb54   : > { %v3790_v29 = vsel %vm3774_vm7, %v3766_v63, %v3782_v30 }
 0xb55   : > { %3798 = vst.msk [vmem:[%s5996_s19 + $0x18] sm:$0xff] %vm787_vm2, %v3790_v29  ;;  %v3751_v60 = vpop.f32.mrf.mxu1 }
 0xb56   : > { %v3752_v21 = vadd.f32 %v4226_v53, %v3751_v60 }
 0xb58   : > { %v3767_v41 = vadd.f32 %v3752_v21, %v3703_v49 }
 0xb5a   : > { %vm3775_vm8 = vcmp.ge.f32.partialorder %v3767_v41, 0.0  ;;  %v3783_v8 = vmul.f32 0.2, %v3767_v41 }
 0xb5c   : > { %v3791_v42 = vsel %vm3775_vm8, %v3767_v41, %v3783_v8 }
 0xb5d   : > { %3799 = vst.msk [vmem:[%s5996_s19 + $0x20] sm:$0xff] %vm787_vm2, %v3791_v42  ;;  %v3754_v31 = vpop.f32.mrf.mxu1 }
 0xb5e   : > { %v3755_v24 = vadd.f32 %v4226_v53, %v3754_v31 }
 0xb60   : > { %v3768_v62 = vadd.f32 %v3755_v24, %v3706_v39 }
 0xb62   : > { %vm3776_vm0 = vcmp.ge.f32.partialorder %v3768_v62, 0.0  ;;  %v3784_v26 = vmul.f32 0.2, %v3768_v62 }
 0xb64   : > { %v3792_v6 = vsel %vm3776_vm0, %v3768_v62, %v3784_v26 }
 0xb65   : > { %3800 = vst.msk [vmem:[%s5996_s19 + $0x28] sm:$0xff] %vm787_vm2, %v3792_v6  ;;  %v3757_v4 = vpop.f32.mrf.mxu1 }
 0xb66   : > { %v3758_v12 = vadd.f32 %v4226_v53, %v3757_v4 }
 0xb68   : > { %v3769_v19 = vadd.f32 %v3758_v12, %v3709_v25 }
 0xb6a   : > { %vm3777_vm9 = vcmp.ge.f32.partialorder %v3769_v19, 0.0  ;;  %v3785_v23 = vmul.f32 0.2, %v3769_v19 }
 0xb6c   : > { %v3793_v35 = vsel %vm3777_vm9, %v3769_v19, %v3785_v23 }
 0xb6d   : > { %3801 = vst.msk [vmem:[%s5996_s19 + $0x30] sm:$0xff] %vm787_vm2, %v3793_v35  ;;  %v3760_v5 = vpop.f32.mrf.mxu1 }
 0xb6e   : > { %v3761_v0 = vadd.f32 %v4226_v53, %v3760_v5 }
 0xb70   : > { %v3770_v56 = vadd.f32 %v3761_v0, %v3712_v7 }
 0xb72   : > { %vm3778_vm10 = vcmp.ge.f32.partialorder %v3770_v56, 0.0  ;;  %v3786_v2 = vmul.f32 0.2, %v3770_v56 }
 0xb74   : > { %v3794_v50 = vsel %vm3778_vm10, %v3770_v56, %v3786_v2 }
 0xb75   : > { %3802 = vst.msk [vmem:[%s5996_s19 + $0x38] sm:$0xff] %vm787_vm2, %v3794_v50 }
 0xb76 PF: > { %s25_s18 = sadd.s32 1, %s4246_s18  }
 0xb77   : > { %p22_p4 = scmp.ge.s32.totalorder %s25_s18, 4  }
 0xb79   :  { %24 = sbr.rel (!%p22_p4) target bundleno = 1 (0x1), region = 113 }

</bundles_post_ra>
